<compile_context>
chip_gen: v6e
topology: v6e:2x2x1
jax: 0.10.0
libtpu: 0.0.40
codegen_flags: <defaults>
</compile_context>

<pallas_src>
import functools

import jax
import jax.numpy as jnp
import numpy as np
from jax.experimental import pallas as pl
from jax.experimental.pallas import tpu as pltpu

_BN_EPS = 1e-5


# ----------------------------------------------------------------------------
# In-kernel conv helper: one 3x3x3 conv + folded BN + ReLU on a row chunk
# ----------------------------------------------------------------------------
def _conv_rows(src_ref, w_ref, s_row, b_row, *, top, H, chunk, g0):
    """Conv + BN + ReLU for output rows [g0, g0 + chunk).

    src_ref : (R, Cin*W) bf16 halo-padded scratch (data region starts at `top`)
    w_ref   : (9, Cin*W, Cout*W) bf16 banded weights, taps indexed kd*3+kh
    s_row / b_row : (1, Cout*W) f32 folded-BN scale / bias
    """
    def taps(kh):
        acc = None
        for kd in range(3):
            start = top + g0 + (kd - 1) * H + (kh - 1)
            xs = src_ref[pl.ds(start, chunk), :]
            p = jnp.dot(xs, w_ref[kd * 3 + kh],
                        preferred_element_type=jnp.float32)
            acc = p if acc is None else acc + p
        return acc

    acc = taps(1)                                   # kh = 1 taps: never masked
    if H > 1:
        # Mask the h-1 / h+1 taps on the H boundary (they wrap across d).
        rows = g0 + jax.lax.broadcasted_iota(jnp.int32, (chunk, 1), 0)
        hmod = (rows & (H - 1)) if (H & (H - 1)) == 0 else (rows % H)
        m0 = (hmod >= 1).astype(jnp.float32)
        m2 = (hmod <= H - 2).astype(jnp.float32)
        acc = acc + m0 * taps(0) + m2 * taps(2)
    # else H == 1: the h +/- 1 taps only read zero padding -> skip them.
    return jnp.maximum(acc * s_row + b_row, 0.0)


# ----------------------------------------------------------------------------
# Pallas kernel: one full VGGBlock (+ optional fused 1x1x1 conv + sigmoid)
# ----------------------------------------------------------------------------
def _vgg_block_kernel(*refs, H, DH, top, chunk, widths, offs, has_final, B):
    n_ops = len(widths)
    x_refs = refs[:n_ops]
    w1_ref, s1_ref, b1_ref, w2_ref, s2_ref, b2_ref = refs[n_ops:n_ops + 6]
    pos = n_ops + 6
    if has_final:
        wf_ref, bf_ref = refs[pos:pos + 2]
        pos += 2
    out_ref = refs[pos]
    xpad_ref, hpad_ref = refs[pos + 1:pos + 3]

    # Zero only the halo rows; data rows are overwritten below.  Done every
    # grid step (cheap) because with megacore 'parallel' sharding each core
    # has its own scratch, so a program_id==0 guard could skip init on core 1.
    bot = xpad_ref.shape[0] - top - DH
    xpad_ref[pl.ds(0, top), :] = jnp.zeros((top, xpad_ref.shape[1]),
                                           xpad_ref.dtype)
    xpad_ref[pl.ds(top + DH, bot), :] = jnp.zeros((bot, xpad_ref.shape[1]),
                                                  xpad_ref.dtype)
    hpad_ref[pl.ds(0, top), :] = jnp.zeros((top, hpad_ref.shape[1]),
                                           hpad_ref.dtype)
    hpad_ref[pl.ds(top + DH, bot), :] = jnp.zeros((bot, hpad_ref.shape[1]),
                                                  hpad_ref.dtype)

    s1 = s1_ref[...]
    b1 = b1_ref[...]
    s2 = s2_ref[...]
    b2 = b2_ref[...]
    if has_final:
        wf = wf_ref[...]
        bf = bf_ref[...]

    for b in range(B):
        # Fused channel-concat: each operand lands in its own lane range of
        # the padded scratch (lane = c*W + w, so ranges are contiguous).
        for k in range(n_ops):
            xpad_ref[pl.ds(top, DH), pl.ds(offs[k], widths[k])] = x_refs[k][b]

        # conv1 (+BN+ReLU): intermediate stays in VMEM as bf16 (no HBM trip).
        for g0 in range(0, DH, chunk):
            sz = min(chunk, DH - g0)
            h1 = _conv_rows(xpad_ref, w1_ref, s1, b1,
                            top=top, H=H, chunk=sz, g0=g0)
            hpad_ref[pl.ds(top + g0, sz), :] = h1.astype(jnp.bfloat16)

        # conv2 (+BN+ReLU), optionally fused 1x1x1 conv + sigmoid epilogue.
        for g0 in range(0, DH, chunk):
            sz = min(chunk, DH - g0)
            y = _conv_rows(hpad_ref, w2_ref, s2, b2,
                           top=top, H=H, chunk=sz, g0=g0)
            if has_final:
                z = jnp.dot(y.astype(jnp.bfloat16), wf,
                            preferred_element_type=jnp.float32) + bf
                e = jnp.exp(-jnp.abs(z))
                out_ref[b, pl.ds(g0, sz), :] = jnp.where(
                    z >= 0.0, 1.0 / (1.0 + e), e / (1.0 + e))
            else:
                out_ref[b, pl.ds(g0, sz), :] = y.astype(jnp.bfloat16)


# ----------------------------------------------------------------------------
# Wrapper: one fused VGGBlock pallas_call
# ----------------------------------------------------------------------------
def fused_vgg_block(xs, blk, final=None):
    """xs: list of (N, D, H, Ck, W) bf16 operands at the same (D, H, W);
    they are concatenated over channels *inside* the kernel.

    Returns (N, D, H, Cout, W) bf16, or the (N, D*H, 128) f32 lane-padded
    sigmoid(Conv3d(k=1)) map when `final` = (wf_pad, bf_pad) is given.
    """
    n, d, h, _, w = xs[0].shape
    dh = d * h
    widths = tuple(int(x.shape[3]) * w for x in xs)
    offs = tuple(int(o) for o in np.cumsum((0,) + widths[:-1]))
    w1b, s1, b1, w2b, s2, b2 = blk
    wcin, wcmid = w1b.shape[1], w1b.shape[2]
    wcout = w2b.shape[2]
    assert sum(widths) == wcin, (widths, wcin)
    cout = wcout // w

    # 16-row-aligned start of the data region inside the padded scratch
    # (aligned bf16 stores); bottom halo needs exactly H + 1 zero rows.
    top = -(-(h + 1) // 16) * 16
    r = top + dh + (h + 1)
    chunk = min(64, dh)          # register-resident f32 accumulator per chunk

    # Deep levels (D*H <= 16): fold the whole batch into one grid step -- the
    # ~0.35us per-grid-step overhead exceeds the compute there.
    batch_in_block = dh <= 16
    nb = n if batch_in_block else 1
    grid = (1,) if batch_in_block else (n,)
    bmap3 = (lambda i: (0, 0, 0)) if batch_in_block else (lambda i: (i, 0, 0))

    xf = [x.reshape(n, dh, wk) for x, wk in zip(xs, widths)]   # free reshape
    in_specs = [pl.BlockSpec((nb, dh, wk), bmap3) for wk in widths]
    in_specs += [
        pl.BlockSpec((9, wcin, wcmid), lambda i: (0, 0, 0)),
        pl.BlockSpec((1, wcmid), lambda i: (0, 0)),
        pl.BlockSpec((1, wcmid), lambda i: (0, 0)),
        pl.BlockSpec((9, wcmid, wcout), lambda i: (0, 0, 0)),
        pl.BlockSpec((1, wcout), lambda i: (0, 0)),
        pl.BlockSpec((1, wcout), lambda i: (0, 0)),
    ]
    inputs = xf + [w1b, s1, b1, w2b, s2, b2]

    has_final = final is not None
    if has_final:
        wf_pad, bf_pad = final
        lanes = wf_pad.shape[1]                    # 128 (lane-dense, padded)
        inputs += [wf_pad, bf_pad]
        in_specs += [pl.BlockSpec((wcout, lanes), lambda i: (0, 0)),
                     pl.BlockSpec((1, lanes), lambda i: (0, 0))]
        out_shape = jax.ShapeDtypeStruct((n, dh, lanes), jnp.float32)
        out_specs = pl.BlockSpec((nb, dh, lanes), bmap3)
    else:
        out_shape = jax.ShapeDtypeStruct((n, dh, wcout), jnp.bfloat16)
        out_specs = pl.BlockSpec((nb, dh, wcout), bmap3)

    kernel = functools.partial(_vgg_block_kernel, H=h, DH=dh, top=top,
                               chunk=chunk, widths=widths, offs=offs,
                               has_final=has_final, B=nb)
    out = pl.pallas_call(
        kernel,
        grid=grid,
        in_specs=in_specs,
        out_specs=out_specs,
        out_shape=out_shape,
        scratch_shapes=[pltpu.VMEM((r, wcin), jnp.bfloat16),
                        pltpu.VMEM((r, wcmid), jnp.bfloat16)],
        compiler_params=pltpu.CompilerParams(
            dimension_semantics=("parallel",),   # batch steps -> both TCs (v7x)
            vmem_limit_bytes=32 * 1024 * 1024),  # worst block ~6 MB
    )(*inputs)

    if has_final:
        return out
    return out.reshape(n, d, h, cout, w)


# ----------------------------------------------------------------------------
# Plain-JAX glue (data movement only) on the (N, D, H, C, W) layout
# ----------------------------------------------------------------------------
def maxpool3d_2(x):
    """nn.MaxPool3d(2, 2)."""
    n, d, h, c, w = x.shape
    x = x.reshape(n, d // 2, 2, h // 2, 2, c, w // 2, 2)
    return x.max(axis=(2, 4, 7))


def _upsample_axis_x2(x, axis):
    n = x.shape[axis]
    out_n = 2 * n
    if n == 1:
        return jnp.repeat(x, 2, axis=axis)
    # align_corners=True: in_coord = out_coord * (n - 1) / (out_n - 1)
    coords = jnp.arange(out_n, dtype=jnp.float32) * ((n - 1) / (out_n - 1))
    lo = jnp.floor(coords).astype(jnp.int32)
    hi = jnp.minimum(lo + 1, n - 1)
    frac = coords - lo.astype(jnp.float32)
    xlo = jnp.take(x, lo, axis=axis).astype(jnp.float32)
    xhi = jnp.take(x, hi, axis=axis).astype(jnp.float32)
    shape = [1] * x.ndim
    shape[axis] = out_n
    return xlo * (1.0 - frac.reshape(shape)) + xhi * frac.reshape(shape)


def upsample_trilinear_x2(x):
    """nn.Upsample(scale_factor=2, mode='trilinear', align_corners=True)."""
    for axis in (1, 2, 4):                         # D, H, W
        x = _upsample_axis_x2(x, axis)
    return x.astype(jnp.bfloat16)


# ----------------------------------------------------------------------------
# Parameter construction (deterministic, synthetic)
# ----------------------------------------------------------------------------
def _conv3d_params(key, cin, cout):
    kw, kb = jax.random.split(key)
    fan_in = cin * 27
    w = jax.random.normal(kw, (3, 3, 3, cin, cout), jnp.float32) * (2.0 / fan_in) ** 0.5
    b = 0.01 * jax.random.normal(kb, (cout,), jnp.float32)
    return w, b


def _bn_fold(key, conv_b, c):
    k1, k2 = jax.random.split(key)
    gamma = 1.0 + 0.1 * jax.random.normal(k1, (c,), jnp.float32)
    beta = 0.1 * jax.random.normal(k2, (c,), jnp.float32)
    running_mean = jnp.zeros((c,), jnp.float32)
    running_var = jnp.ones((c,), jnp.float32)
    scale = gamma / jnp.sqrt(running_var + _BN_EPS)
    bias = (conv_b - running_mean) * scale + beta
    return scale, bias


def _build_banded(w_dense, width):
    """(3,3,3,Cin,Cout) dense weight -> (9, Cin*W, Cout*W) channel-major band.

    Entry [kd*3+kh, ci*W+w_in, co*W+w_out] = w[kd, kh, w_in-w_out+1, ci, co]
    (zero outside the |w_in - w_out| <= 1 band), stored as bf16 for the MXU.
    """
    # TODO(synk): on v5e the band is only ~18% dense at W=16 (MXU FLOP
    #             inflation); a coarser fold could be used there if profiling
    #             shows the level-0 blocks become MXU-bound.
    wd = np.asarray(w_dense)
    _, _, _, cin, cout = wd.shape
    wb = np.zeros((3, 3, cin, width, cout, width), np.float32)
    for kw in range(3):
        for w_out in range(width):
            w_in = w_out + kw - 1
            if 0 <= w_in < width:
                wb[:, :, :, w_in, :, w_out] = wd[:, :, kw]
    return jnp.asarray(wb.reshape(9, cin * width, cout * width), jnp.bfloat16)


def _lane(v, width):
    """Per-channel (C,) -> per-lane (1, C*W) row for the channel-major fold."""
    return jnp.repeat(v, width)[None, :].astype(jnp.float32)


def _vgg_block_params(key, cin, cmid, cout, width):
    k1, k2, k3, k4 = jax.random.split(key, 4)
    w1d, b1 = _conv3d_params(k1, cin, cmid)
    s1, sh1 = _bn_fold(k2, b1, cmid)
    w2d, b2 = _conv3d_params(k3, cmid, cout)
    s2, sh2 = _bn_fold(k4, b2, cout)
    return (_build_banded(w1d, width), _lane(s1, width), _lane(sh1, width),
            _build_banded(w2d, width), _lane(s2, width), _lane(sh2, width))


def init_nested_unet_params(key, base_channels=8, num_classes=1,
                            input_channels=1, spatial=16):
    nb = [base_channels * (2 ** i) for i in range(5)]
    specs = {  # name: (level, cin, cmid, cout)
        "conv0_0": (0, input_channels, nb[0], nb[0]),
        "conv1_0": (1, nb[0], nb[1], nb[1]),
        "conv2_0": (2, nb[1], nb[2], nb[2]),
        "conv3_0": (3, nb[2], nb[3], nb[3]),
        "conv4_0": (4, nb[3], nb[4], nb[4]),
        "conv0_1": (0, nb[0] + nb[1], nb[0], nb[0]),
        "conv1_1": (1, nb[1] + nb[2], nb[1], nb[1]),
        "conv2_1": (2, nb[2] + nb[3], nb[2], nb[2]),
        "conv3_1": (3, nb[3] + nb[4], nb[3], nb[3]),
        "conv0_2": (0, nb[0] * 2 + nb[1], nb[0], nb[0]),
        "conv1_2": (1, nb[1] * 2 + nb[2], nb[1], nb[1]),
        "conv2_2": (2, nb[2] * 2 + nb[3], nb[2], nb[2]),
        "conv0_3": (0, nb[0] * 3 + nb[1], nb[0], nb[0]),
        "conv1_3": (1, nb[1] * 3 + nb[2], nb[1], nb[1]),
        "conv0_4": (0, nb[0] * 4 + nb[1], nb[0], nb[0]),
    }
    params = {}
    for i, name in enumerate(sorted(specs)):
        level, cin, cmid, cout = specs[name]
        width = spatial // (2 ** level)
        params[name] = _vgg_block_params(jax.random.fold_in(key, i),
                                         cin, cmid, cout, width)
    # Final Conv3d(kernel_size=1) + Sigmoid, folded to a lane-padded
    # block-diagonal matmul used in the conv0_4 epilogue.
    kf1, kf2 = jax.random.split(jax.random.fold_in(key, 1000))
    wf = jax.random.normal(kf1, (nb[0], num_classes), jnp.float32) * (1.0 / nb[0]) ** 0.5
    bf = 0.01 * jax.random.normal(kf2, (num_classes,), jnp.float32)
    used = num_classes * spatial
    lanes = max(128, ((used + 127) // 128) * 128)
    wf_blk = jnp.kron(wf, jnp.eye(spatial, dtype=jnp.float32))   # (C0*W, ncls*W)
    wf_pad = jnp.pad(wf_blk, ((0, 0), (0, lanes - used))).astype(jnp.bfloat16)
    bf_pad = jnp.pad(jnp.repeat(bf, spatial), (0, lanes - used))[None, :]
    params["final"] = (wf_pad, bf_pad.astype(jnp.float32))
    return params


# ----------------------------------------------------------------------------
# Full NestedUNet forward (deep_supervision=False branch)
# ----------------------------------------------------------------------------
def nested_unet_forward(x_ncdhw, params, *, num_classes=1):
    up = upsample_trilinear_x2
    pool = maxpool3d_2
    vgg = lambda name, ops: fused_vgg_block(ops, params[name])

    n, _, d, h, w = x_ncdhw.shape
    # NCDHW -> channel-major W-folded layout (N, D, H, C, W), bf16.
    x = jnp.transpose(x_ncdhw, (0, 2, 3, 1, 4)).astype(jnp.bfloat16)

    x0_0 = vgg("conv0_0", [x])
    x1_0 = vgg("conv1_0", [pool(x0_0)])
    x0_1 = vgg("conv0_1", [x0_0, up(x1_0)])
    x2_0 = vgg("conv2_0", [pool(x1_0)])
    x1_1 = vgg("conv1_1", [x1_0, up(x2_0)])
    x0_2 = vgg("conv0_2", [x0_0, x0_1, up(x1_1)])
    x3_0 = vgg("conv3_0", [pool(x2_0)])
    x2_1 = vgg("conv2_1", [x2_0, up(x3_0)])
    x1_2 = vgg("conv1_2", [x1_0, x1_1, up(x2_1)])
    x0_3 = vgg("conv0_3", [x0_0, x0_1, x0_2, up(x1_2)])
    x4_0 = vgg("conv4_0", [pool(x3_0)])
    x3_1 = vgg("conv3_1", [x3_0, up(x4_0)])
    x2_2 = vgg("conv2_2", [x2_0, x2_1, up(x3_1)])
    x1_3 = vgg("conv1_3", [x1_0, x1_1, x1_2, up(x2_2)])
    # conv0_4 with the final 1x1x1 conv + sigmoid folded into its epilogue.
    out = fused_vgg_block([x0_0, x0_1, x0_2, x0_3, up(x1_3)],
                          params["conv0_4"], final=params["final"])
    out = out[:, :, :num_classes * w].reshape(n, d, h, num_classes, w)
    return jnp.transpose(out, (0, 3, 1, 2, 4))       # -> NCDHW, f32


# ----------------------------------------------------------------------------
# Self-tests of the fused VGGBlock against the XLA conv reference
# ----------------------------------------------------------------------------
def _ref_vgg_block(x_ndhwc, w1d, s1, b1, w2d, s2, b2):
    def cbr(x, wd, s, b):
        y = jax.lax.conv_general_dilated(
            x, wd, window_strides=(1, 1, 1), padding="SAME",
            dimension_numbers=("NDHWC", "DHWIO", "NDHWC"))
        return jnp.maximum(y * s + b, 0.0)
    return cbr(cbr(x_ndhwc, w1d, s1, b1), w2d, s2, b2)


def _make_test_block(key, cin, cmid, cout, width):
    k1, k2, k3, k4 = jax.random.split(key, 4)
    w1d, b1 = _conv3d_params(k1, cin, cmid)
    s1, sh1 = _bn_fold(k2, b1, cmid)
    w2d, b2 = _conv3d_params(k3, cmid, cout)
    s2, sh2 = _bn_fold(k4, b2, cout)
    blk = (_build_banded(w1d, width), _lane(s1, width), _lane(sh1, width),
           _build_banded(w2d, width), _lane(s2, width), _lane(sh2, width))
    # bf16-rounded dense weights for a like-for-like reference.
    dense = (w1d.astype(jnp.bfloat16).astype(jnp.float32), s1, sh1,
             w2d.astype(jnp.bfloat16).astype(jnp.float32), s2, sh2)
    return blk, dense


def _to_ndhwc(x_ndhcw):
    return jnp.transpose(x_ndhcw, (0, 1, 2, 4, 3)).astype(jnp.float32)


def _self_test(key):
    # (A) multi-operand fused concat, W = 8 (level-1 geometry).
    n, d, h, w = 2, 8, 8, 8
    chans = (16, 32)
    ks = jax.random.split(key, 3)
    xs = [jax.random.normal(ks[i], (n, d, h, c, w), jnp.float32).astype(jnp.bfloat16)
          for i, c in enumerate(chans)]
    blk, dense = _make_test_block(ks[2], sum(chans), 16, 16, w)
    got = _to_ndhwc(fused_vgg_block(xs, blk))
    want = _ref_vgg_block(_to_ndhwc(jnp.concatenate(xs, axis=3)), *dense)
    err = float(jnp.max(jnp.abs(got - want)))
    assert err < 0.25, f"multi-operand VGGBlock mismatch: max |err| = {err}"

    # (B) W = 16 (level-0 geometry) with the fused 1x1 conv + sigmoid epilogue.
    n, d, h, w = 1, 16, 16, 16
    chans = (8, 16)
    ncls = 1
    ks = jax.random.split(jax.random.fold_in(key, 1), 5)
    xs = [jax.random.normal(ks[i], (n, d, h, c, w), jnp.float32).astype(jnp.bfloat16)
          for i, c in enumerate(chans)]
    blk, dense = _make_test_block(ks[2], sum(chans), 8, 8, w)
    wf = jax.random.normal(ks[3], (8, ncls), jnp.float32) * (1.0 / 8) ** 0.5
    bf = 0.01 * jax.random.normal(ks[4], (ncls,), jnp.float32)
    used = ncls * w
    wf_pad = jnp.pad(jnp.kron(wf, jnp.eye(w, dtype=jnp.float32)),
                     ((0, 0), (0, 128 - used))).astype(jnp.bfloat16)
    bf_pad = jnp.pad(jnp.repeat(bf, w), (0, 128 - used))[None, :].astype(jnp.float32)
    out = fused_vgg_block(xs, blk, final=(wf_pad, bf_pad))
    got = jnp.transpose(out[:, :, :used].reshape(n, d, h, ncls, w),
                        (0, 1, 2, 4, 3))            # -> (n, d, h, w, ncls)
    y = _ref_vgg_block(_to_ndhwc(jnp.concatenate(xs, axis=3)), *dense)
    want = jax.nn.sigmoid(jnp.einsum("ndhwc,ck->ndhwk", y, wf) + bf)
    err = float(jnp.max(jnp.abs(got - want)))
    assert err < 0.06, f"final-epilogue mismatch: max |err| = {err}"

    # (C) D = H = W = 1 edge case (level-4 geometry, masked taps all skipped).
    n = 2
    ks = jax.random.split(jax.random.fold_in(key, 2), 2)
    xs = [jax.random.normal(ks[0], (n, 1, 1, 8, 1), jnp.float32).astype(jnp.bfloat16)]
    blk, dense = _make_test_block(ks[1], 8, 8, 8, 1)
    got = _to_ndhwc(fused_vgg_block(xs, blk))
    want = _ref_vgg_block(_to_ndhwc(xs[0]), *dense)
    err = float(jnp.max(jnp.abs(got - want)))
    assert err < 0.1, f"H=1 VGGBlock mismatch: max |err| = {err}"


if __name__ == "__main__":
    key = jax.random.PRNGKey(0)

    # Sanity-check the fused VGGBlock kernel against the XLA conv reference.
    _self_test(jax.random.fold_in(key, 7))

    base_channels = 8
    num_classes = 1
    input_channels = 1
    spatial = 16

    params = init_nested_unet_params(
        key, base_channels=base_channels, num_classes=num_classes,
        input_channels=input_channels, spatial=spatial)

    x = jax.random.normal(jax.random.fold_in(key, 12345),
                          (2, input_channels, spatial, spatial, spatial),
                          jnp.float32)  # NCDHW

    fwd = jax.jit(functools.partial(nested_unet_forward, num_classes=num_classes))
    out = fwd(x, params)
    jax.block_until_ready(out)

    assert out.shape == (2, num_classes, spatial, spatial, spatial), out.shape
    assert bool(jnp.all(jnp.isfinite(out)))
    assert bool(jnp.all((out > 0.0) & (out < 1.0)))  # sigmoid output range
    print("KERNEL_OK")
</pallas_src>

<mosaic_0001>
module attributes {stable_mosaic.version = 11 : i64} {
  func.func @_vgg_block_kernel(%arg0: i32, %arg1: memref<1x64x128xbf16, #tpu.memory_space<vmem>>, %arg2: memref<1x64x256xbf16, #tpu.memory_space<vmem>>, %arg3: memref<9x384x128xbf16, #tpu.memory_space<vmem>>, %arg4: memref<1x128xf32, #tpu.memory_space<vmem>>, %arg5: memref<1x128xf32, #tpu.memory_space<vmem>>, %arg6: memref<9x128x128xbf16, #tpu.memory_space<vmem>>, %arg7: memref<1x128xf32, #tpu.memory_space<vmem>>, %arg8: memref<1x128xf32, #tpu.memory_space<vmem>>, %arg9: memref<1x64x128xbf16, #tpu.memory_space<vmem>>, %arg10: memref<89x384xbf16, #tpu.memory_space<vmem>>, %arg11: memref<89x128xbf16, #tpu.memory_space<vmem>>) attributes {dimension_semantics = [#tpu.dimension_semantics<parallel>], iteration_bounds = array<i64: 2>, scalar_prefetch = 0 : i64, scratch_operands = 2 : i64, tpu.core_type = #tpu.core_type<tc>, window_params = [{transform_indices = @transform_0, window_bounds = array<i64: 1, 64, 128>}, {transform_indices = @transform_1, window_bounds = array<i64: 1, 64, 256>}, {pipeline_mode = #tpu.pipeline_mode<synchronous>, transform_indices = @transform_2, window_bounds = array<i64: 9, 384, 128>}, {pipeline_mode = #tpu.pipeline_mode<synchronous>, transform_indices = @transform_3, window_bounds = array<i64: 1, 128>}, {pipeline_mode = #tpu.pipeline_mode<synchronous>, transform_indices = @transform_4, window_bounds = array<i64: 1, 128>}, {pipeline_mode = #tpu.pipeline_mode<synchronous>, transform_indices = @transform_5, window_bounds = array<i64: 9, 128, 128>}, {pipeline_mode = #tpu.pipeline_mode<synchronous>, transform_indices = @transform_6, window_bounds = array<i64: 1, 128>}, {pipeline_mode = #tpu.pipeline_mode<synchronous>, transform_indices = @transform_7, window_bounds = array<i64: 1, 128>}, {transform_indices = @transform_8, window_bounds = array<i64: 1, 64, 128>}]} {
    %cst = arith.constant 0.000000e+00 : bf16
    %0 = vector.broadcast %cst : bf16 to vector<16x384xbf16>
    %c0 = arith.constant 0 : index
    %c0_0 = arith.constant 0 : index
    %1 = vector.load %arg10[%c0, %c0_0] : memref<89x384xbf16, #tpu.memory_space<vmem>>, vector<16x384xbf16>
    tpu.vector_store %arg10[%c0, %c0_0], %0 {strides = array<i32>} : memref<89x384xbf16, #tpu.memory_space<vmem>>, vector<16x384xbf16>,
    %cst_1 = arith.constant 0.000000e+00 : bf16
    %2 = vector.broadcast %cst_1 : bf16 to vector<9x384xbf16>
    %c80 = arith.constant 80 : index
    %c0_2 = arith.constant 0 : index
    %3 = vector.load %arg10[%c80, %c0_2] : memref<89x384xbf16, #tpu.memory_space<vmem>>, vector<9x384xbf16>
    tpu.vector_store %arg10[%c80, %c0_2], %2 {strides = array<i32>} : memref<89x384xbf16, #tpu.memory_space<vmem>>, vector<9x384xbf16>,
    %cst_3 = arith.constant 0.000000e+00 : bf16
    %4 = vector.broadcast %cst_3 : bf16 to vector<16x128xbf16>
    %c0_4 = arith.constant 0 : index
    %c0_5 = arith.constant 0 : index
    %5 = vector.load %arg11[%c0_4, %c0_5] : memref<89x128xbf16, #tpu.memory_space<vmem>>, vector<16x128xbf16>
    tpu.vector_store %arg11[%c0_4, %c0_5], %4 {strides = array<i32>} : memref<89x128xbf16, #tpu.memory_space<vmem>>, vector<16x128xbf16>,
    %cst_6 = arith.constant 0.000000e+00 : bf16
    %6 = vector.broadcast %cst_6 : bf16 to vector<9x128xbf16>
    %c80_7 = arith.constant 80 : index
    %c0_8 = arith.constant 0 : index
    %7 = vector.load %arg11[%c80_7, %c0_8] : memref<89x128xbf16, #tpu.memory_space<vmem>>, vector<9x128xbf16>
    tpu.vector_store %arg11[%c80_7, %c0_8], %6 {strides = array<i32>} : memref<89x128xbf16, #tpu.memory_space<vmem>>, vector<9x128xbf16>,
    %c0_9 = arith.constant 0 : index
    %c0_10 = arith.constant 0 : index
    %8 = vector.load %arg4[%c0_9, %c0_10] : memref<1x128xf32, #tpu.memory_space<vmem>>, vector<1x128xf32>
    %c0_11 = arith.constant 0 : index
    %c0_12 = arith.constant 0 : index
    %9 = vector.load %arg5[%c0_11, %c0_12] : memref<1x128xf32, #tpu.memory_space<vmem>>, vector<1x128xf32>
    %c0_13 = arith.constant 0 : index
    %c0_14 = arith.constant 0 : index
    %10 = vector.load %arg7[%c0_13, %c0_14] : memref<1x128xf32, #tpu.memory_space<vmem>>, vector<1x128xf32>
    %c0_15 = arith.constant 0 : index
    %c0_16 = arith.constant 0 : index
    %11 = vector.load %arg8[%c0_15, %c0_16] : memref<1x128xf32, #tpu.memory_space<vmem>>, vector<1x128xf32>
    %c0_17 = arith.constant 0 : index
    %c0_18 = arith.constant 0 : index
    %c0_19 = arith.constant 0 : index
    %12 = vector.load %arg1[%c0_17, %c0_18, %c0_19] : memref<1x64x128xbf16, #tpu.memory_space<vmem>>, vector<1x64x128xbf16>
    %13 = vector.shape_cast %12 : vector<1x64x128xbf16> to vector<64x128xbf16>
    %c16 = arith.constant 16 : index
    %c0_20 = arith.constant 0 : index
    %14 = vector.load %arg10[%c16, %c0_20] : memref<89x384xbf16, #tpu.memory_space<vmem>>, vector<64x128xbf16>
    tpu.vector_store %arg10[%c16, %c0_20], %13 {strides = array<i32>} : memref<89x384xbf16, #tpu.memory_space<vmem>>, vector<64x128xbf16>,
    %c0_21 = arith.constant 0 : index
    %c0_22 = arith.constant 0 : index
    %c0_23 = arith.constant 0 : index
    %15 = vector.load %arg2[%c0_21, %c0_22, %c0_23] : memref<1x64x256xbf16, #tpu.memory_space<vmem>>, vector<1x64x256xbf16>
    %16 = vector.shape_cast %15 : vector<1x64x256xbf16> to vector<64x256xbf16>
    %c16_24 = arith.constant 16 : index
    %c128 = arith.constant 128 : index
    %17 = vector.load %arg10[%c16_24, %c128] : memref<89x384xbf16, #tpu.memory_space<vmem>>, vector<64x256xbf16>
    tpu.vector_store %arg10[%c16_24, %c128], %16 {strides = array<i32>} : memref<89x384xbf16, #tpu.memory_space<vmem>>, vector<64x256xbf16>,
    %c8 = arith.constant 8 : index
    %c0_25 = arith.constant 0 : index
    %18 = vector.load %arg10[%c8, %c0_25] : memref<89x384xbf16, #tpu.memory_space<vmem>>, vector<64x384xbf16>
    %c1 = arith.constant 1 : index
    %c0_26 = arith.constant 0 : index
    %c0_27 = arith.constant 0 : index
    %19 = vector.load %arg3[%c1, %c0_26, %c0_27] : memref<9x384x128xbf16, #tpu.memory_space<vmem>>, vector<1x384x128xbf16>
    %20 = vector.shape_cast %19 : vector<1x384x128xbf16> to vector<384x128xbf16>
    %cst_28 = arith.constant dense<0.000000e+00> : vector<64x128xf32>
    %21 = tpu.matmul %18, %20, %cst_28 {dimension_numbers = #tpu.dot_dimension_numbers<[1], [0], [0], [1], [0, 0, 1, 1], [], []>} : vector<64x384xbf16>, vector<384x128xbf16>, vector<64x128xf32> -> vector<64x128xf32>
    %c16_29 = arith.constant 16 : index
    %c0_30 = arith.constant 0 : index
    %22 = vector.load %arg10[%c16_29, %c0_30] : memref<89x384xbf16, #tpu.memory_space<vmem>>, vector<64x384xbf16>
    %c4 = arith.constant 4 : index
    %c0_31 = arith.constant 0 : index
    %c0_32 = arith.constant 0 : index
    %23 = vector.load %arg3[%c4, %c0_31, %c0_32] : memref<9x384x128xbf16, #tpu.memory_space<vmem>>, vector<1x384x128xbf16>
    %24 = vector.shape_cast %23 : vector<1x384x128xbf16> to vector<384x128xbf16>
    %cst_33 = arith.constant dense<0.000000e+00> : vector<64x128xf32>
    %25 = tpu.matmul %22, %24, %cst_33 {dimension_numbers = #tpu.dot_dimension_numbers<[1], [0], [0], [1], [0, 0, 1, 1], [], []>} : vector<64x384xbf16>, vector<384x128xbf16>, vector<64x128xf32> -> vector<64x128xf32>
    %26 = arith.addf %21, %25 : vector<64x128xf32>
    %c24 = arith.constant 24 : index
    %c0_34 = arith.constant 0 : index
    %27 = vector.load %arg10[%c24, %c0_34] : memref<89x384xbf16, #tpu.memory_space<vmem>>, vector<64x384xbf16>
    %c7 = arith.constant 7 : index
    %c0_35 = arith.constant 0 : index
    %c0_36 = arith.constant 0 : index
    %28 = vector.load %arg3[%c7, %c0_35, %c0_36] : memref<9x384x128xbf16, #tpu.memory_space<vmem>>, vector<1x384x128xbf16>
    %29 = vector.shape_cast %28 : vector<1x384x128xbf16> to vector<384x128xbf16>
    %cst_37 = arith.constant dense<0.000000e+00> : vector<64x128xf32>
    %30 = tpu.matmul %27, %29, %cst_37 {dimension_numbers = #tpu.dot_dimension_numbers<[1], [0], [0], [1], [0, 0, 1, 1], [], []>} : vector<64x384xbf16>, vector<384x128xbf16>, vector<64x128xf32> -> vector<64x128xf32>
    %31 = arith.addf %26, %30 : vector<64x128xf32>
    %32 = tpu.iota {dimensions = array<i32: 0>} : vector<64x1xi32>
    %c0_i32 = arith.constant 0 : i32
    %33 = vector.broadcast %c0_i32 : i32 to vector<64x1xi32>
    %34 = arith.addi %33, %32 : vector<64x1xi32>
    %c7_i32 = arith.constant 7 : i32
    %35 = vector.broadcast %c7_i32 : i32 to vector<64x1xi32>
    %36 = arith.andi %34, %35 : vector<64x1xi32>
    %c1_i32 = arith.constant 1 : i32
    %37 = vector.broadcast %c1_i32 : i32 to vector<64x1xi32>
    %38 = arith.cmpi sge, %36, %37 : vector<64x1xi32>
    %39 = arith.extui %38 : vector<64x1xi1> to vector<64x1xi32>
    %40 = arith.sitofp %39 : vector<64x1xi32> to vector<64x1xf32>
    %c6_i32 = arith.constant 6 : i32
    %41 = vector.broadcast %c6_i32 : i32 to vector<64x1xi32>
    %42 = arith.cmpi sle, %36, %41 : vector<64x1xi32>
    %43 = arith.extui %42 : vector<64x1xi1> to vector<64x1xi32>
    %44 = arith.sitofp %43 : vector<64x1xi32> to vector<64x1xf32>
    %c7_38 = arith.constant 7 : index
    %c0_39 = arith.constant 0 : index
    %45 = vector.load %arg10[%c7_38, %c0_39] : memref<89x384xbf16, #tpu.memory_space<vmem>>, vector<64x384xbf16>
    %c0_40 = arith.constant 0 : index
    %c0_41 = arith.constant 0 : index
    %c0_42 = arith.constant 0 : index
    %46 = vector.load %arg3[%c0_40, %c0_41, %c0_42] : memref<9x384x128xbf16, #tpu.memory_space<vmem>>, vector<1x384x128xbf16>
    %47 = vector.shape_cast %46 : vector<1x384x128xbf16> to vector<384x128xbf16>
    %cst_43 = arith.constant dense<0.000000e+00> : vector<64x128xf32>
    %48 = tpu.matmul %45, %47, %cst_43 {dimension_numbers = #tpu.dot_dimension_numbers<[1], [0], [0], [1], [0, 0, 1, 1], [], []>} : vector<64x384xbf16>, vector<384x128xbf16>, vector<64x128xf32> -> vector<64x128xf32>
    %c15 = arith.constant 15 : index
    %c0_44 = arith.constant 0 : index
    %49 = vector.load %arg10[%c15, %c0_44] : memref<89x384xbf16, #tpu.memory_space<vmem>>, vector<64x384xbf16>
    %c3 = arith.constant 3 : index
    %c0_45 = arith.constant 0 : index
    %c0_46 = arith.constant 0 : index
    %50 = vector.load %arg3[%c3, %c0_45, %c0_46] : memref<9x384x128xbf16, #tpu.memory_space<vmem>>, vector<1x384x128xbf16>
    %51 = vector.shape_cast %50 : vector<1x384x128xbf16> to vector<384x128xbf16>
    %cst_47 = arith.constant dense<0.000000e+00> : vector<64x128xf32>
    %52 = tpu.matmul %49, %51, %cst_47 {dimension_numbers = #tpu.dot_dimension_numbers<[1], [0], [0], [1], [0, 0, 1, 1], [], []>} : vector<64x384xbf16>, vector<384x128xbf16>, vector<64x128xf32> -> vector<64x128xf32>
    %53 = arith.addf %48, %52 : vector<64x128xf32>
    %c23 = arith.constant 23 : index
    %c0_48 = arith.constant 0 : index
    %54 = vector.load %arg10[%c23, %c0_48] : memref<89x384xbf16, #tpu.memory_space<vmem>>, vector<64x384xbf16>
    %c6 = arith.constant 6 : index
    %c0_49 = arith.constant 0 : index
    %c0_50 = arith.constant 0 : index
    %55 = vector.load %arg3[%c6, %c0_49, %c0_50] : memref<9x384x128xbf16, #tpu.memory_space<vmem>>, vector<1x384x128xbf16>
    %56 = vector.shape_cast %55 : vector<1x384x128xbf16> to vector<384x128xbf16>
    %cst_51 = arith.constant dense<0.000000e+00> : vector<64x128xf32>
    %57 = tpu.matmul %54, %56, %cst_51 {dimension_numbers = #tpu.dot_dimension_numbers<[1], [0], [0], [1], [0, 0, 1, 1], [], []>} : vector<64x384xbf16>, vector<384x128xbf16>, vector<64x128xf32> -> vector<64x128xf32>
    %58 = arith.addf %53, %57 : vector<64x128xf32>
    %59 = vector.broadcast %40 : vector<64x1xf32> to vector<64x128xf32>
    %60 = arith.mulf %59, %58 : vector<64x128xf32>
    %61 = arith.addf %31, %60 : vector<64x128xf32>
    %c9 = arith.constant 9 : index
    %c0_52 = arith.constant 0 : index
    %62 = vector.load %arg10[%c9, %c0_52] : memref<89x384xbf16, #tpu.memory_space<vmem>>, vector<64x384xbf16>
    %c2 = arith.constant 2 : index
    %c0_53 = arith.constant 0 : index
    %c0_54 = arith.constant 0 : index
    %63 = vector.load %arg3[%c2, %c0_53, %c0_54] : memref<9x384x128xbf16, #tpu.memory_space<vmem>>, vector<1x384x128xbf16>
    %64 = vector.shape_cast %63 : vector<1x384x128xbf16> to vector<384x128xbf16>
    %cst_55 = arith.constant dense<0.000000e+00> : vector<64x128xf32>
    %65 = tpu.matmul %62, %64, %cst_55 {dimension_numbers = #tpu.dot_dimension_numbers<[1], [0], [0], [1], [0, 0, 1, 1], [], []>} : vector<64x384xbf16>, vector<384x128xbf16>, vector<64x128xf32> -> vector<64x128xf32>
    %c17 = arith.constant 17 : index
    %c0_56 = arith.constant 0 : index
    %66 = vector.load %arg10[%c17, %c0_56] : memref<89x384xbf16, #tpu.memory_space<vmem>>, vector<64x384xbf16>
    %c5 = arith.constant 5 : index
    %c0_57 = arith.constant 0 : index
    %c0_58 = arith.constant 0 : index
    %67 = vector.load %arg3[%c5, %c0_57, %c0_58] : memref<9x384x128xbf16, #tpu.memory_space<vmem>>, vector<1x384x128xbf16>
    %68 = vector.shape_cast %67 : vector<1x384x128xbf16> to vector<384x128xbf16>
    %cst_59 = arith.constant dense<0.000000e+00> : vector<64x128xf32>
    %69 = tpu.matmul %66, %68, %cst_59 {dimension_numbers = #tpu.dot_dimension_numbers<[1], [0], [0], [1], [0, 0, 1, 1], [], []>} : vector<64x384xbf16>, vector<384x128xbf16>, vector<64x128xf32> -> vector<64x128xf32>
    %70 = arith.addf %65, %69 : vector<64x128xf32>
    %c25 = arith.constant 25 : index
    %c0_60 = arith.constant 0 : index
    %71 = vector.load %arg10[%c25, %c0_60] : memref<89x384xbf16, #tpu.memory_space<vmem>>, vector<64x384xbf16>
    %c8_61 = arith.constant 8 : index
    %c0_62 = arith.constant 0 : index
    %c0_63 = arith.constant 0 : index
    %72 = vector.load %arg3[%c8_61, %c0_62, %c0_63] : memref<9x384x128xbf16, #tpu.memory_space<vmem>>, vector<1x384x128xbf16>
    %73 = vector.shape_cast %72 : vector<1x384x128xbf16> to vector<384x128xbf16>
    %cst_64 = arith.constant dense<0.000000e+00> : vector<64x128xf32>
    %74 = tpu.matmul %71, %73, %cst_64 {dimension_numbers = #tpu.dot_dimension_numbers<[1], [0], [0], [1], [0, 0, 1, 1], [], []>} : vector<64x384xbf16>, vector<384x128xbf16>, vector<64x128xf32> -> vector<64x128xf32>
    %75 = arith.addf %70, %74 : vector<64x128xf32>
    %76 = vector.broadcast %44 : vector<64x1xf32> to vector<64x128xf32>
    %77 = arith.mulf %76, %75 : vector<64x128xf32>
    %78 = arith.addf %61, %77 : vector<64x128xf32>
    %79 = vector.broadcast %8 : vector<1x128xf32> to vector<64x128xf32>
    %80 = arith.mulf %78, %79 : vector<64x128xf32>
    %81 = vector.broadcast %9 : vector<1x128xf32> to vector<64x128xf32>
    %82 = arith.addf %80, %81 : vector<64x128xf32>
    %cst_65 = arith.constant 0.000000e+00 : f32
    %83 = vector.broadcast %cst_65 : f32 to vector<64x128xf32>
    %84 = arith.maximumf %82, %83 : vector<64x128xf32>
    %85 = arith.truncf %84 : vector<64x128xf32> to vector<64x128xbf16>
    %c16_66 = arith.constant 16 : index
    %c0_67 = arith.constant 0 : index
    %86 = vector.load %arg11[%c16_66, %c0_67] : memref<89x128xbf16, #tpu.memory_space<vmem>>, vector<64x128xbf16>
    tpu.vector_store %arg11[%c16_66, %c0_67], %85 {strides = array<i32>} : memref<89x128xbf16, #tpu.memory_space<vmem>>, vector<64x128xbf16>,
    %c8_68 = arith.constant 8 : index
    %c0_69 = arith.constant 0 : index
    %87 = vector.load %arg11[%c8_68, %c0_69] : memref<89x128xbf16, #tpu.memory_space<vmem>>, vector<64x128xbf16>
    %c1_70 = arith.constant 1 : index
    %c0_71 = arith.constant 0 : index
    %c0_72 = arith.constant 0 : index
    %88 = vector.load %arg6[%c1_70, %c0_71, %c0_72] : memref<9x128x128xbf16, #tpu.memory_space<vmem>>, vector<1x128x128xbf16>
    %89 = vector.shape_cast %88 : vector<1x128x128xbf16> to vector<128x128xbf16>
    %cst_73 = arith.constant dense<0.000000e+00> : vector<64x128xf32>
    %90 = tpu.matmul %87, %89, %cst_73 {dimension_numbers = #tpu.dot_dimension_numbers<[1], [0], [0], [1], [0, 0, 1, 1], [], []>} : vector<64x128xbf16>, vector<128x128xbf16>, vector<64x128xf32> -> vector<64x128xf32>
    %c16_74 = arith.constant 16 : index
    %c0_75 = arith.constant 0 : index
    %91 = vector.load %arg11[%c16_74, %c0_75] : memref<89x128xbf16, #tpu.memory_space<vmem>>, vector<64x128xbf16>
    %c4_76 = arith.constant 4 : index
    %c0_77 = arith.constant 0 : index
    %c0_78 = arith.constant 0 : index
    %92 = vector.load %arg6[%c4_76, %c0_77, %c0_78] : memref<9x128x128xbf16, #tpu.memory_space<vmem>>, vector<1x128x128xbf16>
    %93 = vector.shape_cast %92 : vector<1x128x128xbf16> to vector<128x128xbf16>
    %cst_79 = arith.constant dense<0.000000e+00> : vector<64x128xf32>
    %94 = tpu.matmul %91, %93, %cst_79 {dimension_numbers = #tpu.dot_dimension_numbers<[1], [0], [0], [1], [0, 0, 1, 1], [], []>} : vector<64x128xbf16>, vector<128x128xbf16>, vector<64x128xf32> -> vector<64x128xf32>
    %95 = arith.addf %90, %94 : vector<64x128xf32>
    %c24_80 = arith.constant 24 : index
    %c0_81 = arith.constant 0 : index
    %96 = vector.load %arg11[%c24_80, %c0_81] : memref<89x128xbf16, #tpu.memory_space<vmem>>, vector<64x128xbf16>
    %c7_82 = arith.constant 7 : index
    %c0_83 = arith.constant 0 : index
    %c0_84 = arith.constant 0 : index
    %97 = vector.load %arg6[%c7_82, %c0_83, %c0_84] : memref<9x128x128xbf16, #tpu.memory_space<vmem>>, vector<1x128x128xbf16>
    %98 = vector.shape_cast %97 : vector<1x128x128xbf16> to vector<128x128xbf16>
    %cst_85 = arith.constant dense<0.000000e+00> : vector<64x128xf32>
    %99 = tpu.matmul %96, %98, %cst_85 {dimension_numbers = #tpu.dot_dimension_numbers<[1], [0], [0], [1], [0, 0, 1, 1], [], []>} : vector<64x128xbf16>, vector<128x128xbf16>, vector<64x128xf32> -> vector<64x128xf32>
    %100 = arith.addf %95, %99 : vector<64x128xf32>
    %101 = tpu.iota {dimensions = array<i32: 0>} : vector<64x1xi32>
    %c0_i32_86 = arith.constant 0 : i32
    %102 = vector.broadcast %c0_i32_86 : i32 to vector<64x1xi32>
    %103 = arith.addi %102, %101 : vector<64x1xi32>
    %c7_i32_87 = arith.constant 7 : i32
    %104 = vector.broadcast %c7_i32_87 : i32 to vector<64x1xi32>
    %105 = arith.andi %103, %104 : vector<64x1xi32>
    %c1_i32_88 = arith.constant 1 : i32
    %106 = vector.broadcast %c1_i32_88 : i32 to vector<64x1xi32>
    %107 = arith.cmpi sge, %105, %106 : vector<64x1xi32>
    %108 = arith.extui %107 : vector<64x1xi1> to vector<64x1xi32>
    %109 = arith.sitofp %108 : vector<64x1xi32> to vector<64x1xf32>
    %c6_i32_89 = arith.constant 6 : i32
    %110 = vector.broadcast %c6_i32_89 : i32 to vector<64x1xi32>
    %111 = arith.cmpi sle, %105, %110 : vector<64x1xi32>
    %112 = arith.extui %111 : vector<64x1xi1> to vector<64x1xi32>
    %113 = arith.sitofp %112 : vector<64x1xi32> to vector<64x1xf32>
    %c7_90 = arith.constant 7 : index
    %c0_91 = arith.constant 0 : index
    %114 = vector.load %arg11[%c7_90, %c0_91] : memref<89x128xbf16, #tpu.memory_space<vmem>>, vector<64x128xbf16>
    %c0_92 = arith.constant 0 : index
    %c0_93 = arith.constant 0 : index
    %c0_94 = arith.constant 0 : index
    %115 = vector.load %arg6[%c0_92, %c0_93, %c0_94] : memref<9x128x128xbf16, #tpu.memory_space<vmem>>, vector<1x128x128xbf16>
    %116 = vector.shape_cast %115 : vector<1x128x128xbf16> to vector<128x128xbf16>
    %cst_95 = arith.constant dense<0.000000e+00> : vector<64x128xf32>
    %117 = tpu.matmul %114, %116, %cst_95 {dimension_numbers = #tpu.dot_dimension_numbers<[1], [0], [0], [1], [0, 0, 1, 1], [], []>} : vector<64x128xbf16>, vector<128x128xbf16>, vector<64x128xf32> -> vector<64x128xf32>
    %c15_96 = arith.constant 15 : index
    %c0_97 = arith.constant 0 : index
    %118 = vector.load %arg11[%c15_96, %c0_97] : memref<89x128xbf16, #tpu.memory_space<vmem>>, vector<64x128xbf16>
    %c3_98 = arith.constant 3 : index
    %c0_99 = arith.constant 0 : index
    %c0_100 = arith.constant 0 : index
    %119 = vector.load %arg6[%c3_98, %c0_99, %c0_100] : memref<9x128x128xbf16, #tpu.memory_space<vmem>>, vector<1x128x128xbf16>
    %120 = vector.shape_cast %119 : vector<1x128x128xbf16> to vector<128x128xbf16>
    %cst_101 = arith.constant dense<0.000000e+00> : vector<64x128xf32>
    %121 = tpu.matmul %118, %120, %cst_101 {dimension_numbers = #tpu.dot_dimension_numbers<[1], [0], [0], [1], [0, 0, 1, 1], [], []>} : vector<64x128xbf16>, vector<128x128xbf16>, vector<64x128xf32> -> vector<64x128xf32>
    %122 = arith.addf %117, %121 : vector<64x128xf32>
    %c23_102 = arith.constant 23 : index
    %c0_103 = arith.constant 0 : index
    %123 = vector.load %arg11[%c23_102, %c0_103] : memref<89x128xbf16, #tpu.memory_space<vmem>>, vector<64x128xbf16>
    %c6_104 = arith.constant 6 : index
    %c0_105 = arith.constant 0 : index
    %c0_106 = arith.constant 0 : index
    %124 = vector.load %arg6[%c6_104, %c0_105, %c0_106] : memref<9x128x128xbf16, #tpu.memory_space<vmem>>, vector<1x128x128xbf16>
    %125 = vector.shape_cast %124 : vector<1x128x128xbf16> to vector<128x128xbf16>
    %cst_107 = arith.constant dense<0.000000e+00> : vector<64x128xf32>
    %126 = tpu.matmul %123, %125, %cst_107 {dimension_numbers = #tpu.dot_dimension_numbers<[1], [0], [0], [1], [0, 0, 1, 1], [], []>} : vector<64x128xbf16>, vector<128x128xbf16>, vector<64x128xf32> -> vector<64x128xf32>
    %127 = arith.addf %122, %126 : vector<64x128xf32>
    %128 = vector.broadcast %109 : vector<64x1xf32> to vector<64x128xf32>
    %129 = arith.mulf %128, %127 : vector<64x128xf32>
    %130 = arith.addf %100, %129 : vector<64x128xf32>
    %c9_108 = arith.constant 9 : index
    %c0_109 = arith.constant 0 : index
    %131 = vector.load %arg11[%c9_108, %c0_109] : memref<89x128xbf16, #tpu.memory_space<vmem>>, vector<64x128xbf16>
    %c2_110 = arith.constant 2 : index
    %c0_111 = arith.constant 0 : index
    %c0_112 = arith.constant 0 : index
    %132 = vector.load %arg6[%c2_110, %c0_111, %c0_112] : memref<9x128x128xbf16, #tpu.memory_space<vmem>>, vector<1x128x128xbf16>
    %133 = vector.shape_cast %132 : vector<1x128x128xbf16> to vector<128x128xbf16>
    %cst_113 = arith.constant dense<0.000000e+00> : vector<64x128xf32>
    %134 = tpu.matmul %131, %133, %cst_113 {dimension_numbers = #tpu.dot_dimension_numbers<[1], [0], [0], [1], [0, 0, 1, 1], [], []>} : vector<64x128xbf16>, vector<128x128xbf16>, vector<64x128xf32> -> vector<64x128xf32>
    %c17_114 = arith.constant 17 : index
    %c0_115 = arith.constant 0 : index
    %135 = vector.load %arg11[%c17_114, %c0_115] : memref<89x128xbf16, #tpu.memory_space<vmem>>, vector<64x128xbf16>
    %c5_116 = arith.constant 5 : index
    %c0_117 = arith.constant 0 : index
    %c0_118 = arith.constant 0 : index
    %136 = vector.load %arg6[%c5_116, %c0_117, %c0_118] : memref<9x128x128xbf16, #tpu.memory_space<vmem>>, vector<1x128x128xbf16>
    %137 = vector.shape_cast %136 : vector<1x128x128xbf16> to vector<128x128xbf16>
    %cst_119 = arith.constant dense<0.000000e+00> : vector<64x128xf32>
    %138 = tpu.matmul %135, %137, %cst_119 {dimension_numbers = #tpu.dot_dimension_numbers<[1], [0], [0], [1], [0, 0, 1, 1], [], []>} : vector<64x128xbf16>, vector<128x128xbf16>, vector<64x128xf32> -> vector<64x128xf32>
    %139 = arith.addf %134, %138 : vector<64x128xf32>
    %c25_120 = arith.constant 25 : index
    %c0_121 = arith.constant 0 : index
    %140 = vector.load %arg11[%c25_120, %c0_121] : memref<89x128xbf16, #tpu.memory_space<vmem>>, vector<64x128xbf16>
    %c8_122 = arith.constant 8 : index
    %c0_123 = arith.constant 0 : index
    %c0_124 = arith.constant 0 : index
    %141 = vector.load %arg6[%c8_122, %c0_123, %c0_124] : memref<9x128x128xbf16, #tpu.memory_space<vmem>>, vector<1x128x128xbf16>
    %142 = vector.shape_cast %141 : vector<1x128x128xbf16> to vector<128x128xbf16>
    %cst_125 = arith.constant dense<0.000000e+00> : vector<64x128xf32>
    %143 = tpu.matmul %140, %142, %cst_125 {dimension_numbers = #tpu.dot_dimension_numbers<[1], [0], [0], [1], [0, 0, 1, 1], [], []>} : vector<64x128xbf16>, vector<128x128xbf16>, vector<64x128xf32> -> vector<64x128xf32>
    %144 = arith.addf %139, %143 : vector<64x128xf32>
    %145 = vector.broadcast %113 : vector<64x1xf32> to vector<64x128xf32>
    %146 = arith.mulf %145, %144 : vector<64x128xf32>
    %147 = arith.addf %130, %146 : vector<64x128xf32>
    %148 = vector.broadcast %10 : vector<1x128xf32> to vector<64x128xf32>
    %149 = arith.mulf %147, %148 : vector<64x128xf32>
    %150 = vector.broadcast %11 : vector<1x128xf32> to vector<64x128xf32>
    %151 = arith.addf %149, %150 : vector<64x128xf32>
    %cst_126 = arith.constant 0.000000e+00 : f32
    %152 = vector.broadcast %cst_126 : f32 to vector<64x128xf32>
    %153 = arith.maximumf %151, %152 : vector<64x128xf32>
    %154 = arith.truncf %153 : vector<64x128xf32> to vector<64x128xbf16>
    %c0_127 = arith.constant 0 : index
    %c0_128 = arith.constant 0 : index
    %c0_129 = arith.constant 0 : index
    %155 = vector.load %arg9[%c0_127, %c0_128, %c0_129] : memref<1x64x128xbf16, #tpu.memory_space<vmem>>, vector<1x64x128xbf16>
    %156 = vector.shape_cast %155 : vector<1x64x128xbf16> to vector<64x128xbf16>
    %157 = vector.shape_cast %154 : vector<64x128xbf16> to vector<1x64x128xbf16>
    tpu.vector_store %arg9[%c0_127, %c0_128, %c0_129], %157 {strides = array<i32>} : memref<1x64x128xbf16, #tpu.memory_space<vmem>>, vector<1x64x128xbf16>,
    return
  }
  func.func @transform_0(%arg0: i32) -> (i32, i32, i32) {
    %c0_i32 = arith.constant 0 : i32
    %c0_i32_0 = arith.constant 0 : i32
    %c0_i32_1 = arith.constant 0 : i32
    return %arg0, %c0_i32, %c0_i32_0 : i32, i32, i32
  }
  func.func @transform_1(%arg0: i32) -> (i32, i32, i32) {
    %c0_i32 = arith.constant 0 : i32
    %c0_i32_0 = arith.constant 0 : i32
    %c0_i32_1 = arith.constant 0 : i32
    return %arg0, %c0_i32, %c0_i32_0 : i32, i32, i32
  }
  func.func @transform_2(%arg0: i32) -> (i32, i32, i32) {
    %c0_i32 = arith.constant 0 : i32
    %c0_i32_0 = arith.constant 0 : i32
    %c0_i32_1 = arith.constant 0 : i32
    %c0_i32_2 = arith.constant 0 : i32
    return %c0_i32, %c0_i32_0, %c0_i32_1 : i32, i32, i32
  }
  func.func @transform_3(%arg0: i32) -> (i32, i32) {
    %c0_i32 = arith.constant 0 : i32
    %c0_i32_0 = arith.constant 0 : i32
    %c0_i32_1 = arith.constant 0 : i32
    return %c0_i32, %c0_i32_0 : i32, i32
  }
  func.func @transform_4(%arg0: i32) -> (i32, i32) {
    %c0_i32 = arith.constant 0 : i32
    %c0_i32_0 = arith.constant 0 : i32
    %c0_i32_1 = arith.constant 0 : i32
    return %c0_i32, %c0_i32_0 : i32, i32
  }
  func.func @transform_5(%arg0: i32) -> (i32, i32, i32) {
    %c0_i32 = arith.constant 0 : i32
    %c0_i32_0 = arith.constant 0 : i32
    %c0_i32_1 = arith.constant 0 : i32
    %c0_i32_2 = arith.constant 0 : i32
    return %c0_i32, %c0_i32_0, %c0_i32_1 : i32, i32, i32
  }
  func.func @transform_6(%arg0: i32) -> (i32, i32) {
    %c0_i32 = arith.constant 0 : i32
    %c0_i32_0 = arith.constant 0 : i32
    %c0_i32_1 = arith.constant 0 : i32
    return %c0_i32, %c0_i32_0 : i32, i32
  }
  func.func @transform_7(%arg0: i32) -> (i32, i32) {
    %c0_i32 = arith.constant 0 : i32
    %c0_i32_0 = arith.constant 0 : i32
    %c0_i32_1 = arith.constant 0 : i32
    return %c0_i32, %c0_i32_0 : i32, i32
  }
  func.func @transform_8(%arg0: i32) -> (i32, i32, i32) {
    %c0_i32 = arith.constant 0 : i32
    %c0_i32_0 = arith.constant 0 : i32
    %c0_i32_1 = arith.constant 0 : i32
    return %arg0, %c0_i32, %c0_i32_0 : i32, i32, i32
  }
}

</mosaic_0001>

<bundles_post_ra>
// kernel: tpu_custom_call.1
= control target key start
LH: loop header
LB: loop body
LE: loop exit
PB: predicated region body
PF: predicated region fallthrough
CT: control target
= control target key end

     0   :  { %s10363_s0 = inlined_call_operand.hbm [shape: bf16[2,64,128], index: 0, kind: input, shape index: {}]   ;;  %s10364_s1 = inlined_call_operand.hbm [shape: bf16[2,64,256], index: 1, kind: input, shape index: {}]   ;;  %s10365_s2 = inlined_call_operand.hbm [shape: bf16[9,384,128], index: 2, kind: input, shape index: {}]   ;;  %s10366_s3 = inlined_call_operand.vmem [shape: f32[1,128], index: 3, kind: input, shape index: {}]   ;;  %s10367_s4 = inlined_call_operand.vmem [shape: f32[1,128], index: 4, kind: input, shape index: {}]   ;;  %s10368_s5 = inlined_call_operand.hbm [shape: bf16[9,128,128], index: 5, kind: input, shape index: {}]   ;;  %s10369_s6 = inlined_call_operand.vmem [shape: f32[1,128], index: 6, kind: input, shape index: {}]   ;;  %s10370_s7 = inlined_call_operand.vmem [shape: f32[1,128], index: 7, kind: input, shape index: {}]   ;;  %s10371_s8 = inlined_call_operand.hbm [shape: bf16[2,64,128], index: 8, kind: output, shape index: {}]  }
   0x1   :  { %10429 = sst [smem:[#allocation48_spill]] %s10363_s0 }
   0x2   :  { %10430 = sst [smem:[#allocation49_spill]] %s10365_s2 }
   0x3   :  { %10431 = sst [smem:[#allocation50_spill]] %s10368_s5 }
   0x4   :  { %13 = vsyncpa [#allocation5], 0 }
   0x5   :  { %15 = vsyncpa [#allocation5 + $0x1], 0 }
   0x6   :  { %16 = vsyncpa [#allocation8], 0 }
   0x7   :  { %18 = vsyncpa [#allocation8 + $0x1], 0 }
   0x8   :  { %19 = vsyncpa [#allocation11], 0 }
   0x9   :  { %20 = vsyncpa [#allocation6], 0 }
   0xa   :  { %22 = vsyncpa [#allocation6 + $0x1], 0  ;;  %s8684_s27 = smov 0   ;;  %s8686_s28 = smov 0  }
   0xb   :  { %s8688_s29 = smov 0   ;;  %s8690_s30 = smov 0  }
   0xc LB: > { %10432 = sst [smem:[#allocation18_spill]] %s8620_s29  ;;  %s8705_s9 = sadd.s32 4294967295, %s8624_s30   ;;  %s8624_s30 = sphi %s8690_s30, %s10589_s30   ;;  %s8620_s29 = sphi %s8688_s29, %s10591_s29   ;;  %s8616_s28 = sphi %s8686_s28, %s10593_s28   ;;  %s8612_s27 = sphi %s8684_s27, %s10592_s27  }
   0xd   : > { %s6423_s10 = sadd.s32 4294967294, %s8624_s30   ;;  %p48_p0 = scmp.ne.s32.totalorder %s8616_s28, %s8612_s27 }
   0xe   : > { %p10374_p1 = scmp.eq.s32.totalorder %s8705_s9, 0  ;;  %p224_p2 = scmp.eq.s32.totalorder %s8705_s9, 1 }
   0xf   : > { %p230_p3 = scmp.eq.s32.totalorder %s6423_s10, 1  ;;  %p6424_p5 = scmp.ge.s32.totalorder %s8624_s30, 1 }
  0x10   : > { %p8714_p4 = por %p10374_p1, %p48_p0  ;;  %p237_p7 = scmp.lt.s32.totalorder %s8624_s30, 3 }
  0x11   : > { %p8719_p6 = por %p230_p3, %p48_p0  ;;  %s8626_s14 = smov [#allocation9]  }
  0x12   : > { %s10433_s11 = scalar_select %p8714_p4, 1, 0 }
  0x13   : > { %s10434_s12 = scalar_select %p8719_p6, 1, 0 }
  0x14   : > { %p8724_p8 = pnand %p6424_p5, %p237_p7  ;;  %s249_s15 = sshll.u32 %s8626_s14, 4  ;;  %s250_s15 = int_to_ptr.vmem [resolvable:$true] %s249_s15 }
  0x15   : > { %s8627_s17 = smov [#allocation10]   ;;  %s8451_s19 = scalar_lea.vmem %s250_s15, 27648 }
  0x16   : > { %p7993_p9 = pneg %p8724_p8  ;;  %s268_s18 = sshll.u32 %s8627_s17, 4  ;;  %s269_s18 = int_to_ptr.vmem [resolvable:$true] %s268_s18 }
  0x17   : > { %p8452_p13 = scmp.ne.s32.totalorder %s250_s15, %s8451_s19  ;;  %p8459_p5 = scmp.lt.s32.totalorder %s250_s15, %s250_s15 }
  0x18   : > { %p8733_p11 = pnand %p7993_p9, %p10374_p1  ;;  %p8460_p7 = scmp.lt.s32.totalorder %s8451_s19, %s8451_s19 }
  0x1a   : > { %p8442_p12 = pneg %p8733_p11  ;;  %p8461_p10 = por %p8460_p7, %p8459_p5 }
  0x1c   : > { %p8454_p0 = pnand %p8452_p13, %p8442_p12 }
  0x1e   : > { %p8455_p3 = pneg %p8454_p0 }
  0x20   : > { %p8462_p9 = pnand %p8461_p10, %p8455_p3 }
  0x22   : > { %8465 = shalt.err (!%p8462_p9)
}
  0x23   : > { %s10372_s20 = smov 64   ;;  %s10373_s21 = smov 4  }
  0x24   : > { %s10437_s2 = sld [smem:[#allocation49_spill]]  ;;  %s8477_s24 = scalar_lea.vmem %s269_s18, 9216 }
  0x25   : > { %p8478_p13 = scmp.ne.s32.totalorder %s269_s18, %s8477_s24  ;;  %p8485_p10 = scmp.lt.s32.totalorder %s269_s18, %s269_s18 }
  0x26   : > { %p8486_p3 = scmp.lt.s32.totalorder %s8477_s24, %s8477_s24 }
  0x27   : > { %p8480_p0 = pnand %p8478_p13, %p8442_p12 }
  0x28   : > { %p8487_p7 = por %p8486_p3, %p8485_p10 }
  0x29   : > { %p8481_p5 = pneg %p8480_p0 }
  0x2a   : > { %7996 = dma.hbm_to_vmem [thread:$0]  (!%p8733_p11), %s10437_s2, 27648, %s250_s15, [#allocation8], %s10372_s20, %s10372_s20, %s10373_s21  }
  0x2b   : > { %p8488_p9 = pnand %p8487_p7, %p8481_p5 }
  0x2d   : > { %8491 = shalt.err (!%p8488_p9)
}
  0x2e   : > { %s10438_s5 = sld [smem:[#allocation50_spill]]  ;;  %s8762_s10 = sadd.s32 1, %s8624_s30  }
  0x2f   : > { %10439 = sst [smem:[#allocation19_spill]] %s8762_s10  ;;  %s35_s14 = sadd.s32 1, %s8620_s29 }
  0x30   : > { %s32_s15 = ssub.s32 %s8624_s30, %s8762_s10  ;;  %p42_p12 = scmp.ne.s32.totalorder %s8620_s29, %s8616_s28 }
  0x31   : > { %p33_p13 = scmp.eq.s32.totalorder %s32_s15, 0  ;;  %p43_p0 = scmp.eq.s32.totalorder %s8624_s30, 0 }
  0x32   : > { %p8772_p5 = por %p224_p2, %p42_p12  ;;  %p8013_p10 = scmp.lt.s32.totalorder %s8624_s30, 2 }
  0x33   : > { %s8778_s17 = scalar_select %p33_p13, %s8620_s29, %s35_s14  }
  0x34   : > { %7999 = dma.hbm_to_vmem [thread:$0]  (!%p8733_p11), %s10438_s5, 9216, %s269_s18, [#allocation11], %s10372_s20, %s10372_s20, %s10373_s21  }
  0x35   : > { %s10440_s16 = scalar_select %p8772_p5, 1, 0 }
  0x36   : > { %10441 = sst [smem:[#allocation20_spill]] %s8778_s17  ;;  %p44_p3 = por %p43_p0, %p42_p12 }
  0x37   : > { %s8781_s19 = sand.u32 1, %s8620_s29   ;;  %s6889_s22 = sshll.u32 %s8624_s30, 9 }
  0x38   : > { %s6428_s18 = sshll.u32 %s8781_s19, 5  ;;  %s10442_s0 = sld [smem:[#allocation48_spill]] }
  0x39   : > { %s292_s26 = scalar_lea.vmem [#allocation4], %s6428_s18  ;;  %p8792_p2 = pnand %p8013_p10, %p44_p3 }
  0x3a   : > { %s299_s15 = sshll.u32 %s292_s26, 4  ;;  %s289_s2 = scalar_lea.sflag [#allocation5], %s8781_s19  ;;  %s8790_s15 = int_to_ptr.vmem [resolvable:$true] %s299_s15 }
  0x3b   : > { %p8494_p7 = pneg %p8792_p2 }
  0x3e   : > { %s8788_s25 = scalar_lea.hbm %s10442_s0, %s6889_s22  ;;  %s8497_s23 = scalar_lea.hbm %s10442_s0, 1024 }
  0x3f   : > { %s8492_s5 = scalar_lea.hbm %s8788_s25, 512  ;;  %p8498_p13 = scmp.lt.s32.totalorder %s8788_s25, %s10442_s0 }
  0x40   : > { %p8493_p11 = scmp.ne.s32.totalorder %s8788_s25, %s8492_s5  ;;  %p8499_p0 = scmp.lt.s32.totalorder %s8497_s23, %s8492_s5 }
  0x42   : > { %p8495_p9 = pnand %p8494_p7, %p8493_p11  ;;  %p8500_p10 = por %p8499_p0, %p8498_p13 }
  0x44   : > { %p8496_p12 = pneg %p8495_p9 }
  0x46   : > { %p8501_p3 = pnand %p8500_p10, %p8496_p12 }
  0x48   : > { %8504 = shalt.err (!%p8501_p3)
}
  0x49   : > { %s8505_s20 = scalar_lea.vmem %s8790_s15, 512  ;;  %s8630_s18 = smov [#allocation4]  }
  0x4a   : > { %p8506_p1 = scmp.ne.s32.totalorder %s8790_s15, %s8505_s20  ;;  %s8510_s22 = sshll.u32 %s8630_s18, 4  ;;  %s8511_s22 = int_to_ptr.vmem [resolvable:$false] %s8510_s22 }
  0x4b   : > { %s8512_s21 = scalar_lea.vmem %s8511_s22, 1024  ;;  %p8513_p6 = scmp.lt.s32.totalorder %s8790_s15, %s8511_s22 }
  0x4c   : > { %p8508_p11 = pnand %p8506_p1, %p8494_p7  ;;  %p8514_p5 = scmp.lt.s32.totalorder %s8512_s21, %s8505_s20 }
  0x4e   : > { %p8509_p9 = pneg %p8508_p11  ;;  %p8515_p4 = por %p8514_p5, %p8513_p6 }
  0x50   : > { %p8516_p13 = pnand %p8515_p4, %p8509_p9 }
  0x52   : > { %8519 = shalt.err (!%p8516_p13)
}
  0x53   : > { %s10444_s5 = smov 4   ;;  %s10445_s23 = smov 64  }
  0x54   : > { %8003 = dma.hbm_to_vmem [thread:$0]  (!%p8792_p2), %s8788_s25, 512, %s8790_s15, %s289_s2, %s10445_s23, %s10445_s23, %s10444_s5  }
  0x55   : > { %s6890_s24 = sshll.u32 %s8624_s30, 10  ;;  %s10446_s18 = sshll.u32 %s8781_s19, 6 }
  0x56   : > { %s8832_s21 = scalar_lea.hbm %s10364_s1, %s6890_s24  ;;  %s313_s22 = scalar_lea.vmem [#allocation7], %s10446_s18 }
  0x57   : > { %s320_s0 = sshll.u32 %s313_s22, 4  ;;  %s10447_s17 = sand.u32 1, %s8624_s30   ;;  %s8836_s0 = int_to_ptr.vmem [resolvable:$true] %s320_s0 }
  0x58   : > { %s8840_s29 = scalar_lea.sflag [#allocation8], %s10447_s17  ;;  %s8520_s10 = scalar_lea.hbm %s8832_s21, 1024 }
  0x59   : > { %p8521_p1 = scmp.ne.s32.totalorder %s8832_s21, %s8520_s10  ;;  %s8525_s19 = scalar_lea.hbm %s10364_s1, 2048 }
  0x5a   : > { %p8526_p5 = scmp.lt.s32.totalorder %s8832_s21, %s10364_s1  ;;  %p8527_p12 = scmp.lt.s32.totalorder %s8525_s19, %s8520_s10 }
  0x5b   : > { %p8523_p4 = pnand %p8521_p1, %p8494_p7 }
  0x5c   : > { %p8528_p0 = por %p8527_p12, %p8526_p5 }
  0x5d   : > { %p8524_p6 = pneg %p8523_p4 }
  0x5f   : > { %p8529_p10 = pnand %p8528_p0, %p8524_p6 }
  0x61   : > { %8532 = shalt.err (!%p8529_p10)
}
  0x62   : > { %s8533_s17 = scalar_lea.vmem %s8836_s0, 1024  ;;  %s8631_s23 = smov [#allocation7]  }
  0x63   : > { %p8534_p3 = scmp.ne.s32.totalorder %s8836_s0, %s8533_s17  ;;  %s8538_s24 = sshll.u32 %s8631_s23, 4  ;;  %s8539_s24 = int_to_ptr.vmem [resolvable:$false] %s8538_s24 }
  0x64   : > { %s8540_s26 = scalar_lea.vmem %s8539_s24, 2048  ;;  %p8541_p13 = scmp.lt.s32.totalorder %s8836_s0, %s8539_s24 }
  0x65   : > { %p8536_p11 = pnand %p8534_p3, %p8494_p7  ;;  %p8542_p1 = scmp.lt.s32.totalorder %s8540_s26, %s8533_s17 }
  0x67   : > { %p8537_p9 = pneg %p8536_p11  ;;  %p8543_p4 = por %p8542_p1, %p8541_p13 }
  0x69   : > { %p8544_p5 = pnand %p8543_p4, %p8537_p9 }
  0x6b   : > { %8547 = shalt.err (!%p8544_p5)
}
  0x6c   : > { %s8632_s10 = smov 128   ;;  %s8633_s20 = smov 8  }
  0x6d   : > { %8006 = dma.hbm_to_vmem [thread:$0]  (!%p8792_p2), %s8832_s21, 1024, %s8836_s0, %s8840_s29, %s8632_s10, %s8632_s10, %s8633_s20  }
  0x6e   : > { %332 = sbr.rel (%p8724_p8) target bundleno = 1012 (0x3f4), region = 52 }
  0x73   : > { %s8868_s18 = sand.u32 1, %s8616_s28   ;;  %p10448_p7 = scmp.ne.s32.totalorder %s10433_s11, 0 }
  0x74   : > { %s6435_s22 = sshll.u32 %s8868_s18, 5  ;;  %s335_s2 = scalar_lea.sflag [#allocation5], %s8868_s18 }
  0x75   : > { %s8874_s25 = scalar_lea.vmem [#allocation4], %s6435_s22 }
  0x76   : > { %8591 = dma.done.wait (%p10448_p7), %s335_s2, 512  }
  0x77   : > { %8593 = vsyncadd (%p10448_p7), %s335_s2, 4294966784  ;;  %s343_s0 = sand.u32 1, %s8705_s9   ;;  %s6436_s29 = sshll.u32 %s8868_s18, 6 }
  0x78   : > { %s344_s13 = scalar_lea.sflag [#allocation8], %s343_s0  ;;  %s8882_s14 = scalar_lea.vmem [#allocation7], %s6436_s29 }
  0x79   : > { %8595 = dma.done.wait (%p10448_p7), %s344_s13, 1024  }
  0x7a   : > { %8597 = vsyncadd (%p10448_p7), %s344_s13, 4294966272  ;;  %p10449_p8 = scmp.eq.s32.totalorder %s8705_s9, 0 }
  0x7c   : > { %8599 = dma.done.wait (%p10449_p8), [#allocation8], 27648   ;;  %p10450_p2 = pmov %p10449_p8 }
  0x7e   : > { %8601 = vsyncadd (%p10450_p2), [#allocation8], 4294939648  ;;  %p10451_p6 = pmov %p10450_p2 }
  0x7f   : > { %p10452_p12 = pmov %p10450_p2 }
  0x80   : > { %8603 = dma.done.wait (%p10451_p6), [#allocation11], 9216  }
  0x81   : > { %8605 = vsyncadd (%p10452_p12), [#allocation11], 4294958080  ;;  %v8634_v0 = vmov 0   ;;  %v8059_v1 = vld [vmem:[#allocation9 + $0x378] sm:$0xff]   ;;  %v8062_v4 = vld [vmem:[#allocation9 + $0x370] sm:$0xff]   ;;  %vm403_vm2 = vcmask 1044484  }
  0x82   : > { %396 = vst [vmem:[#allocation2 + $0xc] sm:$0xff] %v8634_v0  ;;  %394 = vst [vmem:[#allocation2] sm:$0xff] %v8634_v0  ;;  %v8060_v2 = vld [vmem:[#allocation9 + $0x338] sm:$0xff]   ;;  %6955 = vmatprep.subr.bf16.mxu0 %v8059_v1  ;;  %v8063_v5 = vld [vmem:[#allocation9 + $0x330] sm:$0xff]   ;;  %vm404_vm0 = vsmask.f32 4352 }
  0x83   : > { %395 = vst [vmem:[#allocation2 + $0x8] sm:$0xf] %v8634_v0  ;;  %397 = vst [vmem:[#allocation2 + $0x14] sm:$0xf] %v8634_v0  ;;  %v8061_v3 = vld [vmem:[#allocation9 + $0x3b8] sm:$0xff]   ;;  %6956 = vmatpush3.bf16.msra.mxu0 %v8060_v2  ;;  %v8064_v6 = vld [vmem:[#allocation9 + $0x3b0] sm:$0xff]  }
  0x84   : > { %398 = vst [vmem:[#allocation2 + $0x78] sm:$0xff] %v8634_v0  ;;  %399 = vst [vmem:[#allocation2 + $0x80] sm:$0xf] %v8634_v0  ;;  %7531 = vmatprep.subr.bf16.mxu1 %v8061_v3  ;;  %6957 = vmatprep.subr.bf16.mxu0 %v8062_v4  ;;  %v8065_v7 = vld [vmem:[#allocation9 + $0x368] sm:$0xff]   ;;  %v8068_v10 = vld [vmem:[#allocation9 + $0x360] sm:$0xff]   ;;  %vm400_vm3 = vcmask 1040384  }
  0x85   : > { %413 = vst [vmem:[#allocation3] sm:$0xf] %v8634_v0  ;;  %414 = vst [vmem:[#allocation3 + $0x4] sm:$0xf] %v8634_v0  ;;  %7532 = vmatpush3.bf16.msra.mxu1 %v8061_v3  ;;  %v8066_v8 = vld [vmem:[#allocation9 + $0x328] sm:$0xff]   ;;  %v8069_v11 = vld [vmem:[#allocation9 + $0x320] sm:$0xff]  }
  0x86   : > { %415 = vst [vmem:[#allocation3 + $0x28] sm:$0xf] %v8634_v0  ;;  %7533 = vmatprep.subr.bf16.mxu1 %v8064_v6  ;;  %v8067_v9 = vld [vmem:[#allocation9 + $0x3a8] sm:$0xff]   ;;  %v8070_v12 = vld [vmem:[#allocation9 + $0x3a0] sm:$0xff]   ;;  %v8071_v13 = vld [vmem:[#allocation9 + $0x358] sm:$0xff]   ;;  %s6907_s26 = sshll.u32 %s8705_s9, 9 }
  0x87   : > { %6958 = vmatpush3.bf16.msra.mxu0 %v8063_v5  ;;  %v8073_v14 = vld [vmem:[#allocation9 + $0x398] sm:$0xff]   ;;  %v8074_v16 = vld [vmem:[#allocation9 + $0x350] sm:$0xff]   ;;  %v8077_v19 = vld [vmem:[#allocation9 + $0x348] sm:$0xff]   ;;  %vm3282_vm1 = vsmask.f32 7424  ;;  %s392_s10 = scalar_lea.vmem [#allocation12], %s6435_s22  ;;  %s10318_s0 = scalar_lea.hbm %s10371_s8, %s6907_s26 }
  0x88   : > { %6959 = vmatprep.subr.bf16.mxu0 %v8065_v7  ;;  %v8072_v15 = vld [vmem:[#allocation9 + $0x318] sm:$0xff]   ;;  %v8076_v17 = vld [vmem:[#allocation9 + $0x390] sm:$0xff]   ;;  %v8078_v20 = vld [vmem:[#allocation9 + $0x308] sm:$0xff]   ;;  %vm401_vm4 = vsmask.f32 256  ;;  %s6308_s20 = sshll.u32 %s392_s10, 4  ;;  %s10320_s20 = int_to_ptr.vmem [resolvable:$true] %s6308_s20 }
  0x89   : > { %7534 = vmatpush3.bf16.msra.mxu1 %v8064_v6  ;;  %v8075_v18 = vld [vmem:[#allocation9 + $0x310] sm:$0xff]   ;;  %v8079_v21 = vld [vmem:[#allocation9 + $0x388] sm:$0xff]   ;;  %v8080_v22 = vld [vmem:[#allocation9 + $0x340] sm:$0xff]   ;;  %s6295_s9 = scalar_lea.sflag [#allocation6], %s8868_s18  ;;  %s8548_s22 = scalar_lea.vmem %s10320_s20, 512 }
  0x8a   : > { %7535 = vmatprep.subr.bf16.mxu1 %v8067_v9  ;;  %v423_v23 = vld [vmem:[%s8874_s25] sm:$0xf]  ;;  %v424_v24 = vld [vmem:[%s8874_s25 + $0x4] sm:$0xf]  ;;  %v440_v26 = vld [vmem:[%s8882_s14 + $0x8] sm:$0xff]  ;;  %p8549_p0 = scmp.ne.s32.totalorder %s10320_s20, %s8548_s22  ;;  %p10586_p10 = scmp.ne.s32.totalorder %s10440_s16, 0 }
  0x8b   : > { %6960 = vmatpush3.bf16.msra.mxu0 %v8066_v8  ;;  %v439_v25 = vld [vmem:[%s8882_s14] sm:$0xff]  ;;  %431 = vst [vmem:[#allocation2 + $0x18] sm:$0xf] %v423_v23  ;;  %432 = vst [vmem:[#allocation2 + $0x24] sm:$0xf] %v424_v24  ;;  %v441_v29 = vld [vmem:[%s8882_s14 + $0x10] sm:$0xff] }
  0x8c   : > { %6961 = vmatprep.subr.bf16.mxu0 %v8068_v10  ;;  %447 = vst [vmem:[#allocation2 + $0x1c] sm:$0xff] %v439_v25  ;;  %v8082_v27 = vld [vmem:[#allocation9 + $0x380] sm:$0xff]   ;;  %448 = vst [vmem:[#allocation2 + $0x28] sm:$0xff] %v440_v26  ;;  %v442_v30 = vld [vmem:[%s8882_s14 + $0x18] sm:$0xff]  ;;  %p8550_p3 = pnand %p8549_p0, %p10586_p10  ;;  %s8636_s29 = smov [#allocation12]  }
  0x8d   : > { %7536 = vmatpush3.bf16.msra.mxu1 %v8067_v9  ;;  %v8081_v28 = vld [vmem:[#allocation9 + $0x300] sm:$0xff]   ;;  %v8085_v31 = vld [vmem:[#allocation9 + $0x138] sm:$0xff]   ;;  %449 = vst [vmem:[#allocation2 + $0x34] sm:$0xff] %v441_v29  ;;  %450 = vst [vmem:[#allocation2 + $0x40] sm:$0xff] %v442_v30  ;;  %s8552_s13 = sshll.u32 %s8636_s29, 4  ;;  %s8553_s13 = int_to_ptr.vmem [resolvable:$false] %s8552_s13 }
  0x8e   : > { %7537 = vmatprep.subr.bf16.mxu1 %v8070_v12  ;;  %v8089_v32 = vld [vmem:[#allocation9 + $0x178] sm:$0xff]   ;;  %v425_v36 = vld [vmem:[%s8874_s25 + $0x8] sm:$0xf]  ;;  %v426_v39 = vld [vmem:[%s8874_s25 + $0xc] sm:$0xf]  ;;  %p8551_p11 = pneg %p8550_p3  ;;  %p8555_p9 = scmp.lt.s32.totalorder %s10320_s20, %s8553_s13 }
  0x8f   : > { %6962 = vmatpush3.bf16.msra.mxu0 %v8069_v11  ;;  %v8087_v35 = vld [vmem:[#allocation9 + $0xf8] sm:$0xff]   ;;  %433 = vst [vmem:[#allocation2 + $0x30] sm:$0xf] %v425_v36  ;;  %v8090_v43 = vld [vmem:[#allocation9 + $0x130] sm:$0xff]   ;;  %434 = vst [vmem:[#allocation2 + $0x3c] sm:$0xf] %v426_v39 }
  0x90   : > { %6963 = vmatprep.subr.bf16.mxu0 %v8071_v13  ;;  %v8092_v47 = vld [vmem:[#allocation9 + $0x170] sm:$0xff]   ;;  %v8095_v49 = vld [vmem:[#allocation9 + $0x128] sm:$0xff]   ;;  %v8098_v54 = vld [vmem:[#allocation9 + $0x120] sm:$0xff]  }
  0x91   : > { %7538 = vmatpush3.bf16.msra.mxu1 %v8070_v12  ;;  %v8091_v48 = vld [vmem:[#allocation9 + $0xf0] sm:$0xff]   ;;  %v8097_v50 = vld [vmem:[#allocation9 + $0x168] sm:$0xff]   ;;  %v443_v59 = vld [vmem:[%s8882_s14 + $0x20] sm:$0xff] }
  0x92   : > { %7539 = vmatprep.subr.bf16.mxu1 %v8073_v14  ;;  %v8096_v52 = vld [vmem:[#allocation9 + $0xe8] sm:$0xff]   ;;  %v427_v57 = vld [vmem:[%s8874_s25 + $0x10] sm:$0xf]  ;;  %v428_v58 = vld [vmem:[%s8874_s25 + $0x14] sm:$0xf]  ;;  %451 = vst [vmem:[#allocation2 + $0x4c] sm:$0xff] %v443_v59 }
  0x93   : > { %6964 = vmatpush3.bf16.msra.mxu0 %v8072_v15  ;;  %v8911_v33 = vld [vmem:[#allocation2 + $0x18] sm:$0xff]  ;;  %v8913_v34 = vld [vmem:[#allocation2 + $0x20] sm:$0xf]  ;;  %v8916_v37 = vld [vmem:[#allocation2 + $0x24] sm:$0xff]  ;;  %435 = vst [vmem:[#allocation2 + $0x48] sm:$0xf] %v427_v57 }
  0x94   : > { %6965 = vmatprep.subr.bf16.mxu0 %v8074_v16  ;;  %v8918_v38 = vld [vmem:[#allocation2 + $0x2c] sm:$0xf]  ;;  %v8923_v40 = vcombine.high %v8911_v33, %v8916_v37  ;;  %v8927_v41 = vcombine.low %v8911_v33, %v8916_v37  ;;  %v8933_v44 = vld [vmem:[#allocation2 + $0x38] sm:$0xf]  ;;  %v8935_v45 = vld [vmem:[#allocation2 + $0x44] sm:$0xf]  ;;  %v6477_v29 = vcombine.high %v8634_v0, %v8911_v33 }
  0x95   : > { %7540 = vmatpush3.bf16.msra.mxu1 %v8073_v14  ;;  %v8931_v42 = vcombine.low %v8913_v34, %v8918_v38  ;;  %v8942_v46 = vcombine.low %v8933_v44, %v8935_v45  ;;  %436 = vst [vmem:[#allocation2 + $0x54] sm:$0xf] %v428_v58  ;;  %v444_v60 = vld [vmem:[%s8882_s14 + $0x28] sm:$0xff]  ;;  %v8100_v61 = vld [vmem:[#allocation9 + $0x160] sm:$0xff]   ;;  %v445_v63 = vld [vmem:[%s8882_s14 + $0x30] sm:$0xff]  ;;  %v9015_v39 = vcombine.low %v8918_v38, %v8933_v44 }
  0x96   : > { %7541 = vmatprep.subr.bf16.mxu1 %v8076_v17  ;;  %811 = vmatprep.mubr.bf16.mxu0 %v8923_v40  ;;  %v8945_v51 = vld [vmem:[#allocation2 + $0x30] sm:$0xff]  ;;  %v8947_v53 = vld [vmem:[#allocation2 + $0x3c] sm:$0xff]  ;;  %452 = vst [vmem:[#allocation2 + $0x58] sm:$0xff] %v444_v60  ;;  %453 = vst [vmem:[#allocation2 + $0x64] sm:$0xff] %v445_v63  ;;  %v2255_v44 = vshrl.u32 %v8923_v40, 16  ;;  %v2238_v58 = vshrl.u32 %v8927_v41, 16 }
  0x97   : > { %6966 = vmatpush3.bf16.msra.mxu0 %v8075_v18  ;;  %7547 = vmatprep.mubr.bf16.mxu1 %v8931_v42  ;;  %v8951_v55 = vcombine.high %v8945_v51, %v8947_v53  ;;  %v8955_v56 = vcombine.low %v8945_v51, %v8947_v53  ;;  %v8099_v62 = vld [vmem:[#allocation9 + $0xe0] sm:$0xff]   ;;  %v446_v1 = vld [vmem:[%s8882_s14 + $0x38] sm:$0xff]  ;;  %v8110_v5 = vld [vmem:[#allocation9 + $0x110] sm:$0xff]   ;;  %v2241_v59 = vshll.u32 %v8927_v41, 16  ;;  %v2272_v60 = vshrl.u32 %v8931_v42, 16  ;;  %s8554_s14 = scalar_lea.vmem %s8553_s13, 1024 }
  0x98   : > { %6967 = vmatprep.subr.bf16.mxu0 %v8077_v19  ;;  %v8103_v2 = vld [vmem:[#allocation9 + $0x118] sm:$0xff]   ;;  %454 = vst [vmem:[#allocation2 + $0x70] sm:$0xff] %v446_v1  ;;  %v8112_v15 = vld [vmem:[#allocation9 + $0x150] sm:$0xff]   ;;  %v8115_v19 = vld [vmem:[#allocation9 + $0x108] sm:$0xff]   ;;  %v2275_v63 = vshll.u32 %v8931_v42, 16  ;;  %p8556_p13 = scmp.lt.s32.totalorder %s8554_s14, %s8548_s22 }
  0x99   : > { %7542 = vmatpush3.bf16.msra.mxu1 %v8076_v17  ;;  %v8105_v3 = vld [vmem:[#allocation9 + $0xd8] sm:$0xff]   ;;  %v466_v8 = vld [vmem:[#allocation2 + $0x50] sm:$0xf]  ;;  %v8118_v23 = vld [vmem:[#allocation9 + $0x100] sm:$0xff]  }
  0x9a   : > { %7543 = vmatprep.subr.bf16.mxu1 %v8079_v21  ;;  %v8109_v4 = vld [vmem:[#allocation9 + $0x158] sm:$0xff]   ;;  %v8965_v6 = vld [vmem:[#allocation2 + $0x48] sm:$0xff]  ;;  %v8111_v17 = vld [vmem:[#allocation9 + $0xd0] sm:$0xff]   ;;  %p8557_p1 = por %p8556_p13, %p8555_p9 }
  0x9b   : > { %6968 = vmatpush3.bf16.msra.mxu0 %v8078_v20  ;;  %v429_v12 = vld [vmem:[%s8874_s25 + $0x18] sm:$0xf]  ;;  %v430_v13 = vld [vmem:[%s8874_s25 + $0x1c] sm:$0xf]  ;;  %v8119_v30 = vld [vmem:[#allocation9 + $0xc0] sm:$0xff]  }
  0x9c   : > { %6969 = vmatprep.subr.bf16.mxu0 %v8080_v22  ;;  %437 = vst [vmem:[#allocation2 + $0x60] sm:$0xf] %v429_v12  ;;  %438 = vst [vmem:[#allocation2 + $0x6c] sm:$0xf] %v430_v13  ;;  %v8116_v22 = vld [vmem:[#allocation9 + $0xc8] sm:$0xff]   ;;  %v8124_v36 = vld [vmem:[#allocation9 + $0x5f8] sm:$0xff]   ;;  %p8558_p4 = pnand %p8557_p1, %p8551_p11 }
  0x9d   : > { %7544 = vmatpush3.bf16.msra.mxu1 %v8079_v21  ;;  %v8967_v7 = vld [vmem:[#allocation2 + $0x54] sm:$0xff]  ;;  %v8977_v11 = vld [vmem:[#allocation2 + $0x5c] sm:$0xf]  ;;  %v8985_v16 = vld [vmem:[#allocation2 + $0x68] sm:$0xf] }
  0x9e   : > { %7545 = vmatprep.subr.bf16.mxu1 %v8082_v27  ;;  %v8971_v9 = vcombine.high %v8965_v6, %v8967_v7  ;;  %v8975_v10 = vcombine.low %v8965_v6, %v8967_v7  ;;  %v8982_v14 = vcombine.low %v466_v8, %v8977_v11  ;;  %v8117_v21 = vld [vmem:[#allocation9 + $0x148] sm:$0xff]   ;;  %v8126_v38 = vld [vmem:[#allocation9 + $0x570] sm:$0xff]   ;;  %v8133_v1 = vld [vmem:[#allocation9 + $0x5e0] sm:$0xff]  }
  0x9f   : > { %6970 = vmatpush3.bf16.msra.mxu0 %v8081_v28  ;;  %v8989_v18 = vld [vmem:[#allocation2 + $0x74] sm:$0xf]  ;;  %v8120_v28 = vld [vmem:[#allocation9 + $0x140] sm:$0xff]   ;;  %v8128_v57 = vld [vmem:[#allocation9 + $0x5a8] sm:$0xff]  }
  0xa0   : > { %7007 = vmatprep.subr.bf16.mxu0 %v8085_v31  ;;  %v6451_v20 = vcombine.low %v8985_v16, %v8989_v18  ;;  %v8121_v31 = vld [vmem:[#allocation9 + $0x5b8] sm:$0xff]   ;;  %v8154_v42 = vld [vmem:[#allocation9 + $0x2b0] sm:$0xff]   ;;  %vm9531_vm5 = vmand %vm403_vm2, %vm404_vm0 }
  0xa1   : > { %7546 = vmatpush3.bf16.msra.mxu1 %v8082_v27  ;;  %v8134_v13 = vld [vmem:[#allocation9 + $0x598] sm:$0xff]   ;;  %vm9544_vm6 = vmand %vm400_vm3, %vm401_vm4 }
  0xa2   : > { %7555 = vmatprep.subr.bf16.mxu1 %v8089_v32  ;;  %812 = vmatmul.mubr.bf16.vlgmr.msra.gmra.mxu0 %v8927_v41  ;;  %v2299_v41 = vshrl.u32 %v8942_v46, 16  ;;  %vm406_vm7 = vmor %vm9531_vm5, %vm9544_vm6 }
  0xa3   : > { %7008 = vmatpush3.bf16.msra.mxu0 %v8087_v35  ;;  %819 = vmatprep.mubr.bf16.mxu0 %v8951_v55  ;;  %v8993_v24 = vld [vmem:[#allocation2 + $0x60] sm:$0xff]  ;;  %v8995_v25 = vld [vmem:[#allocation2 + $0x6c] sm:$0xff] }
  0xa4   : > { %7548 = vmatmul.mubr.bf16.vlgmr.msra.gmra.mxu1 %v8942_v46  ;;  %7009 = vmatprep.subr.bf16.mxu0 %v8090_v43  ;;  %v8999_v26 = vcombine.high %v8993_v24, %v8995_v25  ;;  %v9003_v27 = vcombine.low %v8993_v24, %v8995_v25  ;;  %v6476_v43 = vcombine.low %v8634_v0, %v8911_v33  ;;  %v8130_v0 = vld [vmem:[#allocation9 + $0x5e8] sm:$0xff]   ;;  %v9056_v12 = vrot.slane %v2299_v41, 3 }
  0xa5   : > { %7556 = vmatpush3.bf16.msra.mxu1 %v8089_v32  ;;  %7551 = vmatprep.mubr.bf16.mxu1 %v8982_v14  ;;  %v9008_v32 = vld [vmem:[#allocation2 + $0x14] sm:$0xf]  ;;  %v8141_v41 = vld [vmem:[#allocation9 + $0x548] sm:$0xff]  }
  0xa6   : > { %7557 = vmatprep.subr.bf16.mxu1 %v8092_v47  ;;  %v6478_v35 = vcombine.low %v9008_v32, %v8913_v34 }
  0xa7   : > { %7010 = vmatpush3.bf16.msra.mxu0 %v8091_v48  ;;  %v8127_v48 = vld [vmem:[#allocation9 + $0x5f0] sm:$0xff]  }
  0xa8   : > { %7011 = vmatprep.subr.bf16.mxu0 %v8095_v49  ;;  %v8125_v49 = vld [vmem:[#allocation9 + $0x5b0] sm:$0xff]  }
  0xa9   : > { %7558 = vmatpush3.bf16.msra.mxu1 %v8092_v47  ;;  %v8122_v47 = vld [vmem:[#allocation9 + $0x578] sm:$0xff]  }
  0xaa   : > { %820 = vmatmul.mubr.bf16.gmra.mxu0 %v8955_v56  ;;  %7559 = vmatprep.subr.bf16.mxu1 %v8097_v50 }
  0xab   : > { %7012 = vmatpush3.bf16.msra.mxu0 %v8096_v52  ;;  %827 = vmatprep.mubr.bf16.mxu0 %v8971_v9  ;;  %v9025_v52 = vcombine.low %v8935_v45, %v466_v8  ;;  %v9035_v45 = vcombine.low %v8977_v11, %v8985_v16  ;;  %v8136_v8 = vld [vmem:[#allocation9 + $0x5d8] sm:$0xff]   ;;  %v10382_v11 = vshrl.u32 %v9015_v39, 16 }
  0xac   : > { %7013 = vmatprep.subr.bf16.mxu0 %v8098_v54  ;;  %7552 = vmatmul.mubr.bf16.gmra.mxu1 %v6451_v20  ;;  %v9065_v20 = vcombine.low %v8947_v53, %v8965_v6 }
  0xad   : > { %7560 = vmatpush3.bf16.msra.mxu1 %v8097_v50  ;;  %7571 = vmatprep.mubr.bf16.mxu1 %v6478_v35  ;;  %v9021_v50 = vcombine.high %v8916_v37, %v8945_v51  ;;  %10453 = vst [vmem:[#allocation21_spill] sm:$0xff] %v9025_v52  ;;  %v9074_v35 = vld [vmem:[#allocation2 + $0x2c] sm:$0xf] }
  0xae   : > { %7561 = vmatprep.subr.bf16.mxu1 %v8100_v61 }
  0xaf   : > { %7014 = vmatpush3.bf16.msra.mxu0 %v8099_v62  ;;  %v8129_v62 = vld [vmem:[#allocation9 + $0x568] sm:$0xff]  }
  0xb0   : > { %7015 = vmatprep.subr.bf16.mxu0 %v8103_v2  ;;  %v8131_v2 = vld [vmem:[#allocation9 + $0x5a0] sm:$0xff]  }
  0xb1   : > { %7562 = vmatpush3.bf16.msra.mxu1 %v8100_v61  ;;  %v9040_v61 = vcombine.low %v8916_v37, %v8945_v51  ;;  %v9052_v37 = vrot.slane %v2241_v59, 4  ;;  %v8132_v51 = vld [vmem:[#allocation9 + $0x560] sm:$0xff]  }
  0xb2   : > { %7563 = vmatprep.subr.bf16.mxu1 %v8109_v4  ;;  %828 = vmatmul.mubr.bf16.gmra.mxu0 %v8975_v10 }
  0xb3   : > { %7016 = vmatpush3.bf16.msra.mxu0 %v8105_v3  ;;  %835 = vmatprep.mubr.bf16.mxu0 %v8999_v26  ;;  %10454 = vst [vmem:[#allocation22_spill] sm:$0xff] %v9040_v61  ;;  %v9046_v3 = vcombine.high %v8947_v53, %v8965_v6  ;;  %v1215_v53 = vld [vmem:[#allocation2 + $0x38] sm:$0xf]  ;;  %v10385_v6 = vshll.u32 %v9015_v39, 16 }
  0xb4   : > { %7017 = vmatprep.subr.bf16.mxu0 %v8110_v5  ;;  %v2302_v5 = vshll.u32 %v8942_v46, 16 }
  0xb5   : > { %7564 = vmatpush3.bf16.msra.mxu1 %v8109_v4  ;;  %10455 = vst [vmem:[#allocation23_spill] sm:$0xff] %v9046_v3  ;;  %v9048_v4 = vrot.slane %v2238_v58, 3  ;;  %v8142_v58 = vld [vmem:[#allocation9 + $0x5c8] sm:$0xff]  }
  0xb6   : > { %7565 = vmatprep.subr.bf16.mxu1 %v8112_v15  ;;  %v9059_v46 = vrot.slane %v2302_v5, 4  ;;  %v9113_v5 = vrot.slane %v2255_v44, 3  ;;  %v1219_v44 = vld [vmem:[#allocation2 + $0x50] sm:$0xf] }
  0xb7   : > { %7018 = vmatpush3.bf16.msra.mxu0 %v8111_v17  ;;  %v1689_v17 = vld [vmem:[#allocation2 + $0x8] sm:$0x8] }
  0xb8   : > { %7019 = vmatprep.subr.bf16.mxu0 %v8115_v19  ;;  %v10384_v19 = vshll.u32 %v9021_v50, 16 }
  0xb9   : > { %7566 = vmatpush3.bf16.msra.mxu1 %v8112_v15  ;;  %v10381_v15 = vshrl.u32 %v9021_v50, 16 }
  0xba   : > { %7567 = vmatprep.subr.bf16.mxu1 %v8117_v21  ;;  %836 = vmatmul.mubr.bf16.gmra.mxu0 %v9003_v27 }
  0xbb   : > { %7020 = vmatpush3.bf16.msra.mxu0 %v8116_v22  ;;  %1114 = vmatprep.mubr.bf16.mxu0 %v6477_v29  ;;  %v10380_v22 = vshrl.u32 %v9040_v61, 16  ;;  %v8137_v29 = vld [vmem:[#allocation9 + $0x590] sm:$0xff]  }
  0xbc   : > { %7021 = vmatprep.subr.bf16.mxu0 %v8118_v23  ;;  %v8139_v23 = vld [vmem:[#allocation9 + $0x5d0] sm:$0xff]  }
  0xbd   : > { %7568 = vmatpush3.bf16.msra.mxu1 %v8117_v21  ;;  %v8135_v21 = vld [vmem:[#allocation9 + $0x558] sm:$0xff]  }
  0xbe   : > { %7569 = vmatprep.subr.bf16.mxu1 %v8120_v28 }
  0xbf   : > { %7022 = vmatpush3.bf16.msra.mxu0 %v8119_v30  ;;  %v9071_v30 = vcombine.high %v8967_v7, %v8993_v24 }
  0xc0   : > { %7059 = vmatprep.subr.bf16.mxu0 %v8121_v31  ;;  %v10388_v31 = vshrl.u32 %v8955_v56, 16 }
  0xc1   : > { %7570 = vmatpush3.bf16.msra.mxu1 %v8120_v28  ;;  %v10383_v28 = vshll.u32 %v9040_v61, 16 }
  0xc2   : > { %7579 = vmatprep.subr.bf16.mxu1 %v8124_v36  ;;  %1115 = vmatmul.mubr.bf16.vlgmr.msra.gmra.mxu0 %v6476_v43  ;;  %v8138_v43 = vld [vmem:[#allocation9 + $0x550] sm:$0xff]  }
  0xc3   : > { %7060 = vmatpush3.bf16.msra.mxu0 %v8122_v47  ;;  %1122 = vmatprep.mubr.bf16.mxu0 %v9021_v50  ;;  %v9079_v47 = vld [vmem:[#allocation2 + $0x44] sm:$0xf] }
  0xc4   : > { %7572 = vmatmul.mubr.bf16.vlgmr.msra.gmra.mxu1 %v9015_v39  ;;  %7061 = vmatprep.subr.bf16.mxu0 %v8125_v49  ;;  %v9084_v49 = vrot.slane %v10381_v15, 3  ;;  %v9096_v59 = vcombine.low %v1215_v53, %v9079_v47  ;;  %v1223_v15 = vld [vmem:[#allocation2 + $0x68] sm:$0xf] }
  0xc5   : > { %7580 = vmatpush3.bf16.msra.mxu1 %v8124_v36  ;;  %7575 = vmatprep.mubr.bf16.mxu1 %v9025_v52  ;;  %v10389_v36 = vshll.u32 %v8955_v56, 16 }
  0xc6   : > { %7581 = vmatprep.subr.bf16.mxu1 %v8127_v48 }
  0xc7   : > { %7062 = vmatpush3.bf16.msra.mxu0 %v8126_v38  ;;  %v9088_v38 = vrot.slane %v10384_v19, 4  ;;  %v2286_v54 = vrot.slane %v10389_v36, 4  ;;  %v8170_v36 = vld [vmem:[#allocation9 + $0x2d8] sm:$0xff]  }
  0xc8   : > { %7063 = vmatprep.subr.bf16.mxu0 %v8128_v57  ;;  %v9093_v57 = vrot.slane %v10380_v22, 3  ;;  %v10390_v22 = vshrl.u32 %v9046_v3, 16 }
  0xc9   : > { %7582 = vmatpush3.bf16.msra.mxu1 %v8127_v48  ;;  %v6514_v48 = vcombine.low %v9074_v35, %v1215_v53  ;;  %v8144_v53 = vld [vmem:[#allocation9 + $0x540] sm:$0xff]  }
  0xca   : > { %7583 = vmatprep.subr.bf16.mxu1 %v8130_v0  ;;  %1123 = vmatmul.mubr.bf16.gmra.mxu0 %v9040_v61 }
  0xcb   : > { %7064 = vmatpush3.bf16.msra.mxu0 %v8129_v62  ;;  %1130 = vmatprep.mubr.bf16.mxu0 %v9046_v3  ;;  %v9100_v62 = vrot.slane %v10383_v28, 4  ;;  %v8155_v28 = vld [vmem:[#allocation9 + $0x270] sm:$0xff]  }
  0xcc   : > { %7576 = vmatmul.mubr.bf16.gmra.mxu1 %v9035_v45  ;;  %7065 = vmatprep.subr.bf16.mxu0 %v8131_v2  ;;  %v9109_v2 = vrot.slane %v10385_v6, 4  ;;  %v8162_v6 = vld [vmem:[#allocation9 + $0x2e0] sm:$0xff]  }
  0xcd   : > { %7584 = vmatpush3.bf16.msra.mxu1 %v8130_v0  ;;  %v6596_v0 = vcombine.low %v1689_v17, %v9008_v32  ;;  %7595 = vmatprep.mubr.bf16.mxu1 %v6514_v48  ;;  %v9105_v32 = vrot.slane %v10382_v11, 3  ;;  %v9131_v11 = vor.u32 %v9059_v46, %v9056_v12  ;;  %v10391_v12 = vshll.u32 %v9046_v3, 16  ;;  %v9143_v46 = vld [vmem:[#allocation2 + $0x80] sm:$0xf] }
  0xce   : > { %7585 = vmatprep.subr.bf16.mxu1 %v8133_v1 }
  0xcf   : > { %7066 = vmatpush3.bf16.msra.mxu0 %v8132_v51  ;;  %v9117_v51 = vcombine.low %v8967_v7, %v8993_v24  ;;  %v2267_v17 = vshll.u32 %v6596_v0, 16  ;;  %v8146_v24 = vld [vmem:[#allocation9 + $0x2b8] sm:$0xff]  }
  0xd0   : > { %7067 = vmatprep.subr.bf16.mxu0 %v8134_v13  ;;  %v8145_v13 = vld [vmem:[#allocation9 + $0x5c0] sm:$0xff]  }
  0xd1   : > { %7586 = vmatpush3.bf16.msra.mxu1 %v8133_v1  ;;  %v8140_v1 = vld [vmem:[#allocation9 + $0x588] sm:$0xff]  }
  0xd2   : > { %7587 = vmatprep.subr.bf16.mxu1 %v8136_v8  ;;  %1131 = vmatmul.mubr.bf16.gmra.mxu0 %v9065_v20 }
  0xd3   : > { %7068 = vmatpush3.bf16.msra.mxu0 %v8135_v21  ;;  %1138 = vmatprep.mubr.bf16.mxu0 %v9071_v30  ;;  %v8143_v21 = vld [vmem:[#allocation9 + $0x580] sm:$0xff]  }
  0xd4   : > { %7069 = vmatprep.subr.bf16.mxu0 %v8137_v29 }
  0xd5   : > { %7588 = vmatpush3.bf16.msra.mxu1 %v8136_v8  ;;  %v2264_v8 = vshrl.u32 %v6596_v0, 16  ;;  %v6517_v0 = vcombine.low %v9079_v47, %v1219_v44  ;;  %v10386_v47 = vshrl.u32 %v9025_v52, 16 }
  0xd6   : > { %7589 = vmatprep.subr.bf16.mxu1 %v8139_v23 }
  0xd7   : > { %7070 = vmatpush3.bf16.msra.mxu0 %v8138_v43  ;;  %v2266_v7 = vrot.slane %v2264_v8, 3  ;;  %v2269_v43 = vrot.slane %v2267_v17, 4  ;;  %v8156_v8 = vld [vmem:[#allocation9 + $0x2f0] sm:$0xff]  }
  0xd8   : > { %7071 = vmatprep.subr.bf16.mxu0 %v8140_v1  ;;  %v2274_v1 = vrot.slane %v2272_v60, 3  ;;  %v9135_v60 = vcombine.low %v8989_v18, %v8989_v18  ;;  %v8159_v18 = vld [vmem:[#allocation9 + $0x2e8] sm:$0xff]  }
  0xd9   : > { %7590 = vmatpush3.bf16.msra.mxu1 %v8139_v23  ;;  %v8153_v23 = vld [vmem:[#allocation9 + $0x2f8] sm:$0xff]   ;;  %v2270_v17 = vor.u32 %v2269_v43, %v2266_v7  ;;  %v1225_v43 = vld [vmem:[#allocation2 + $0x74] sm:$0xf] }
  0xda   : > { %7591 = vmatprep.subr.bf16.mxu1 %v8142_v58  ;;  %1139 = vmatmul.mubr.bf16.gmra.mxu0 %v9117_v51  ;;  %v9145_v19 = vcombine.low %v1223_v15, %v1225_v43 }
  0xdb   : > { %7072 = vmatpush3.bf16.msra.mxu0 %v8141_v41  ;;  %1517 = vmatprep.mubr.bf16.mxu0 %v9021_v50  ;;  %v2277_v41 = vrot.slane %v2275_v63, 4 }
  0xdc   : > { %7073 = vmatprep.subr.bf16.mxu0 %v8143_v21  ;;  %v1221_v21 = vld [vmem:[#allocation2 + $0x5c] sm:$0xf] }
  0xdd   : > { %7592 = vmatpush3.bf16.msra.mxu1 %v8142_v58  ;;  %v8152_v58 = vld [vmem:[#allocation9 + $0x278] sm:$0xff]   ;;  %v9138_v63 = vcombine.low %v1219_v44, %v1221_v21  ;;  %v6520_v7 = vcombine.low %v1221_v21, %v1223_v15  ;;  %v8157_v15 = vld [vmem:[#allocation9 + $0x2a8] sm:$0xff]  }
  0xde   : > { %7593 = vmatprep.subr.bf16.mxu1 %v8145_v13 }
  0xdf   : > { %7074 = vmatpush3.bf16.msra.mxu0 %v8144_v53  ;;  %v10387_v53 = vshll.u32 %v9025_v52, 16  ;;  %v8175_v52 = vld [vmem:[#allocation9 + $0x248] sm:$0xff]  }
  0xe0   : > { %7111 = vmatprep.subr.bf16.mxu0 %v8146_v24 }
  0xe1   : > { %7594 = vmatpush3.bf16.msra.mxu1 %v8145_v13  ;;  %v2278_v13 = vor.u32 %v2277_v41, %v2274_v1  ;;  %v9161_v41 = vrot.slane %v10386_v47, 3  ;;  %v9165_v21 = vrot.slane %v10387_v53, 4  ;;  %v10392_v47 = vshrl.u32 %v9035_v45, 16  ;;  %v8160_v1 = vld [vmem:[#allocation9 + $0x2a0] sm:$0xff]  }
  0xe2   : > { %7603 = vmatprep.subr.bf16.mxu1 %v8153_v23  ;;  %1518 = vmatmul.mubr.bf16.vlgmr.msra.gmra.mxu0 %v9040_v61 }
  0xe3   : > { %7112 = vmatpush3.bf16.msra.mxu0 %v8152_v58  ;;  %v9148_v44 = vsel %vm404_vm0, %v2270_v17, %v2278_v13  ;;  %v9152_v24 = vsel %vm404_vm0, %v2278_v13, %v9131_v11  ;;  %1525 = vmatprep.mubr.bf16.mxu0 %v9046_v3  ;;  %v6523_v17 = vcombine.low %v1225_v43, %v9143_v46  ;;  %v8158_v13 = vld [vmem:[#allocation9 + $0x268] sm:$0xff]  }
  0xe4   : > { %7596 = vmatmul.mubr.bf16.vlgmr.msra.gmra.mxu1 %v6517_v0  ;;  %7113 = vmatprep.subr.bf16.mxu0 %v8154_v42  ;;  %v2283_v42 = vrot.slane %v10388_v31, 3  ;;  %v8161_v31 = vld [vmem:[#allocation9 + $0x260] sm:$0xff]   ;;  %v8173_v0 = vld [vmem:[#allocation9 + $0x2d0] sm:$0xff]   ;;  %v8174_v3 = vld [vmem:[#allocation9 + $0x288] sm:$0xff]  }
  0xe5   : > { %7604 = vmatpush3.bf16.msra.mxu1 %v8153_v23  ;;  %7599 = vmatprep.mubr.bf16.mxu1 %v6520_v7  ;;  %v9203_v23 = vrot.slane %v10392_v47, 3 }
  0xe6   : > { %7605 = vmatprep.subr.bf16.mxu1 %v8156_v8  ;;  %v9179_v43 = vor.u32 %v2286_v54, %v2283_v42  ;;  %v8163_v54 = vld [vmem:[#allocation9 + $0x298] sm:$0xff]   ;;  %v9194_v42 = vrot.slane %v10390_v22, 3  ;;  %v9205_v22 = vld [vmem:[#allocation2 + $0xc] sm:$0xff] }
  0xe7   : > { %7114 = vmatpush3.bf16.msra.mxu0 %v8155_v28  ;;  %v1739_v28 = vld [vmem:[#allocation2 + $0x14] sm:$0x8] }
  0xe8   : > { %7115 = vmatprep.subr.bf16.mxu0 %v8157_v15 }
  0xe9   : > { %7606 = vmatpush3.bf16.msra.mxu1 %v8156_v8  ;;  %v9177_v8 = vor.u32 %v9052_v37, %v9048_v4  ;;  %v1738_v37 = vld [vmem:[#allocation2 + $0xc] sm:$0x88] }
  0xea   : > { %7607 = vmatprep.subr.bf16.mxu1 %v8159_v18  ;;  %1526 = vmatmul.mubr.bf16.gmra.mxu0 %v9065_v20  ;;  %v6564_v15 = vcombine.low %v1738_v37, %v8911_v33  ;;  %v8171_v4 = vld [vmem:[#allocation9 + $0x290] sm:$0xff]  }
  0xeb   : > { %7116 = vmatpush3.bf16.msra.mxu0 %v8158_v13  ;;  %1533 = vmatprep.mubr.bf16.mxu0 %v9071_v30  ;;  %v9198_v13 = vrot.slane %v10391_v12, 4 }
  0xec   : > { %7600 = vmatmul.mubr.bf16.gmra.mxu1 %v6523_v17  ;;  %v9187_v17 = vsel %vm404_vm0, %v9177_v8, %v9179_v43  ;;  %7117 = vmatprep.subr.bf16.mxu0 %v8160_v1  ;;  %v8166_v1 = vld [vmem:[#allocation9 + $0x258] sm:$0xff]   ;;  %v1804_v48 = vshll.u32 %v6564_v15, 16 }
  0xed   : > { %7608 = vmatpush3.bf16.msra.mxu1 %v8159_v18  ;;  %v6565_v18 = vcombine.high %v1738_v37, %v8911_v33  ;;  %v6566_v33 = vcombine.low %v1739_v28, %v8913_v34  ;;  %v8172_v37 = vld [vmem:[#allocation9 + $0x250] sm:$0xff]  }
  0xee   : > { %7609 = vmatprep.subr.bf16.mxu1 %v8162_v6 }
  0xef   : > { %7118 = vmatpush3.bf16.msra.mxu0 %v8161_v31  ;;  %v1818_v7 = vshrl.u32 %v6565_v18, 16  ;;  %v1821_v58 = vshll.u32 %v6565_v18, 16  ;;  %v8176_v31 = vld [vmem:[#allocation9 + $0x2c8] sm:$0xff]   ;;  %v1801_v18 = vshrl.u32 %v6564_v15, 16  ;;  %v1835_v29 = vshrl.u32 %v6566_v33, 16  ;;  %v8179_v15 = vld [vmem:[#allocation9 + $0x2c0] sm:$0xff]  }
  0xf0   : > { %7119 = vmatprep.subr.bf16.mxu0 %v8163_v54  ;;  %v1838_v47 = vshll.u32 %v6566_v33, 16  ;;  %v6599_v54 = vcombine.low %v8985_v16, %v8985_v16  ;;  %v1832_v33 = vor.u32 %v9088_v38, %v9084_v49  ;;  %v6521_v16 = vcombine.low %v8995_v25, %v9205_v22 }
  0xf1   : > { %7610 = vmatpush3.bf16.msra.mxu1 %v8162_v6  ;;  %v6522_v6 = vcombine.high %v8995_v25, %v9205_v22  ;;  %v1820_v12 = vrot.slane %v1818_v7, 3  ;;  %v1823_v53 = vrot.slane %v1821_v58, 4  ;;  %v1837_v34 = vrot.slane %v1835_v29, 3 }
  0xf2   : > { %7611 = vmatprep.subr.bf16.mxu1 %v8170_v36  ;;  %1534 = vmatmul.mubr.bf16.gmra.mxu0 %v9117_v51  ;;  %v1840_v28 = vrot.slane %v1838_v47, 4  ;;  %v1849_v58 = vor.u32 %v9109_v2, %v9105_v32  ;;  %v10456_v7 = vshrl.u32 %v8982_v14, 16  ;;  %v10457_v29 = vshll.u32 %v8982_v14, 16  ;;  %v8178_v14 = vld [vmem:[#allocation9 + $0x240] sm:$0xff]  }
  0xf3   : > { %7120 = vmatpush3.bf16.msra.mxu0 %v8166_v1  ;;  %1541 = vmatprep.mubr.bf16.mxu0 %v6522_v6  ;;  %v1824_v61 = vor.u32 %v1823_v53, %v1820_v12  ;;  %v1806_v32 = vrot.slane %v1804_v48, 4  ;;  %v2353_v2 = vshrl.u32 %v6599_v54, 16  ;;  %v8177_v6 = vld [vmem:[#allocation9 + $0x280] sm:$0xff]   ;;  %v10458_v38 = vshll.u32 %v9035_v45, 16 }
  0xf4   : > { %7121 = vmatprep.subr.bf16.mxu0 %v8171_v4  ;;  %v1803_v4 = vrot.slane %v1801_v18, 3  ;;  %v1841_v1 = vor.u32 %v1840_v28, %v1837_v34  ;;  %v2331_v47 = vrot.slane %v10457_v29, 4  ;;  %v1876_v48 = vor.u32 %v9165_v21, %v9161_v41  ;;  %v8182_v34 = vld [vmem:[#allocation9 + $0xb8] sm:$0xff]   ;;  %v2648_v29 = vld [vmem:[#allocation2 + $0x20] sm:$0x8] }
  0xf5   : > { %7612 = vmatpush3.bf16.msra.mxu1 %v8170_v36  ;;  %v2328_v36 = vrot.slane %v10456_v7, 3  ;;  %v2356_v7 = vshll.u32 %v6599_v54, 16  ;;  %v1833_v49 = vsel %vm404_vm0, %v1824_v61, %v1832_v33  ;;  %v2355_v18 = vrot.slane %v2353_v2, 3  ;;  %v8180_v41 = vld [vmem:[#allocation9 + $0x78] sm:$0xff]  }
  0xf6   : > { %7613 = vmatprep.subr.bf16.mxu1 %v8173_v0  ;;  %v1850_v53 = vsel %vm404_vm0, %v1841_v1, %v1849_v58  ;;  %v1807_v54 = vor.u32 %v1806_v32, %v1803_v4  ;;  %v1815_v61 = vor.u32 %v9100_v62, %v9093_v57  ;;  %v10459_v28 = vshrl.u32 %v9065_v20, 16 }
  0xf7   : > { %7122 = vmatpush3.bf16.msra.mxu0 %v8172_v37  ;;  %v2332_v12 = vor.u32 %v2331_v47, %v2328_v36  ;;  %7619 = vmatprep.mubr.bf16.mxu1 %v1850_v53  ;;  %v2358_v37 = vrot.slane %v2356_v7, 4  ;;  %v10461_v57 = vshrl.u32 %v9071_v30, 16  ;;  %v10462_v4 = vshrl.u32 %v9135_v60, 16  ;;  %v8181_v47 = vld [vmem:[#allocation9 + $0x38] sm:$0xff]  }
  0xf8   : > { %7123 = vmatprep.subr.bf16.mxu0 %v8174_v3  ;;  %v1854_v36 = vrot.slane %v10459_v28, 3  ;;  %v1877_v32 = vsel %vm404_vm0, %v1849_v58, %v1876_v48 }
  0xf9   : > { %7614 = vmatpush3.bf16.msra.mxu1 %v8173_v0  ;;  %v1902_v0 = vrot.slane %v10458_v38, 4  ;;  %v9231_v3 = vsel %vm404_vm0, %v9131_v11, %v2332_v12  ;;  %v10460_v11 = vshll.u32 %v9065_v20, 16  ;;  %v1890_v62 = vrot.slane %v10461_v57, 3  ;;  %v8186_v57 = vld [vmem:[#allocation9 + $0x68] sm:$0xff]  }
  0xfa   : > { %7615 = vmatprep.subr.bf16.mxu1 %v8176_v31  ;;  %1542 = vmatmul.mubr.bf16.gmra.mxu0 %v6521_v16  ;;  %v1867_v16 = vor.u32 %v9198_v13, %v9194_v42  ;;  %v1926_v1 = vrot.slane %v10462_v4, 3  ;;  %v1816_v42 = vsel %vm404_vm0, %v1807_v54, %v1815_v61  ;;  %v8185_v13 = vld [vmem:[#allocation9 + $0xb0] sm:$0xff]   ;;  %v10464_v38 = vshll.u32 %v9071_v30, 16 }
  0xfb   : > { %7124 = vmatpush3.bf16.msra.mxu0 %v8175_v52  ;;  %2120 = vmatprep.mubr.bf16.mxu0 %v1833_v49  ;;  %v1857_v21 = vrot.slane %v10460_v11, 4  ;;  %v2359_v52 = vor.u32 %v2358_v37, %v2355_v18  ;;  %v1903_v2 = vor.u32 %v1902_v0, %v9203_v23  ;;  %v6567_v23 = vcombine.low %v8995_v25, %v8995_v25  ;;  %v8184_v37 = vld [vmem:[#allocation9 + $0x30] sm:$0xff]  }
  0xfc   : > { %7125 = vmatprep.subr.bf16.mxu0 %v8177_v6  ;;  %v10463_v6 = vshll.u32 %v9135_v60, 16  ;;  %v1893_v58 = vrot.slane %v10464_v38, 4  ;;  %v1868_v60 = vsel %vm404_vm0, %v1832_v33, %v1867_v16  ;;  %v10466_v18 = vshll.u32 %v9117_v51, 16  ;;  %v8188_v33 = vld [vmem:[#allocation9 + $0xa8] sm:$0xff]  }
  0xfd   : > { %7616 = vmatpush3.bf16.msra.mxu1 %v8176_v31  ;;  %v9239_v31 = vcombine.high %v8995_v25, %v8995_v25  ;;  %v9254_v7 = vsel %vm404_vm0, %v2332_v12, %v2359_v52  ;;  %v10465_v12 = vshrl.u32 %v9117_v51, 16  ;;  %v1904_v54 = vsel %vm404_vm0, %v1876_v48, %v1903_v2 }
  0xfe   : > { %7617 = vmatprep.subr.bf16.mxu1 %v8179_v15  ;;  %v1929_v53 = vrot.slane %v10463_v6, 4  ;;  %v6626_v11 = vcombine.low %v2648_v29, %v9074_v35  ;;  %v1858_v25 = vor.u32 %v1857_v21, %v1854_v36  ;;  %v1894_v4 = vor.u32 %v1893_v58, %v1890_v62  ;;  %v1688_v29 = vld [vmem:[#allocation2] sm:$0x88] }
  0xff   : > { %7126 = vmatpush3.bf16.msra.mxu0 %v8178_v14  ;;  %v1915_v49 = vshrl.u32 %v9239_v31, 16  ;;  %v1881_v0 = vrot.slane %v10465_v12, 3  ;;  %v1884_v14 = vrot.slane %v10466_v18, 4  ;;  %v1909_v48 = vshll.u32 %v6567_v23, 16  ;;  %v8191_v21 = vld [vmem:[#allocation9 + $0xa0] sm:$0xff]   ;;  %v8194_v12 = vld [vmem:[#allocation9 + $0x98] sm:$0xff]  }
 0x100   : > { %7163 = vmatprep.subr.bf16.mxu0 %v8180_v41  ;;  %v1930_v28 = vor.u32 %v1929_v53, %v1926_v1  ;;  %v1918_v41 = vshll.u32 %v9239_v31, 16  ;;  %v2791_v1 = vshll.u32 %v9138_v63, 16  ;;  %v8187_v31 = vld [vmem:[#allocation9 + $0x28] sm:$0xff]   ;;  %v1859_v36 = vsel %vm404_vm0, %v1815_v61, %v1858_v25  ;;  %v8189_v6 = vld [vmem:[#allocation9 + $0x60] sm:$0xff]  }
 0x101   : > { %7618 = vmatpush3.bf16.msra.mxu1 %v8179_v15  ;;  %v8183_v15 = vld [vmem:[#allocation9 + $0x70] sm:$0xff]   ;;  %v9270_v52 = vrot.slane %v1915_v49, 3  ;;  %v2753_v62 = vshrl.u32 %v6626_v11, 16  ;;  %v1895_v53 = vsel %vm404_vm0, %v1867_v16, %v1894_v4  ;;  %v2761_v49 = vshrl.u32 %v9096_v59, 16  ;;  %v8190_v16 = vld [vmem:[#allocation9 + $0x20] sm:$0xff]  }
 0x102   : > { %7627 = vmatprep.subr.bf16.mxu1 %v8182_v34  ;;  %2121 = vmatmul.mubr.bf16.vlgmr.msra.gmra.mxu0 %v1816_v42  ;;  %v1931_v35 = vsel %vm404_vm0, %v1903_v2, %v1930_v28  ;;  %v1920_v42 = vrot.slane %v1918_v41, 4  ;;  %v1885_v38 = vor.u32 %v1884_v14, %v1881_v0  ;;  %v1911_v58 = vrot.slane %v1909_v48, 4  ;;  %v8193_v14 = vld [vmem:[#allocation9 + $0x18] sm:$0xff]  }
 0x103   : > { %7164 = vmatpush3.bf16.msra.mxu0 %v8181_v47  ;;  %2128 = vmatprep.mubr.bf16.mxu0 %v1868_v60  ;;  %v6595_v47 = vcombine.high %v1688_v29, %v9205_v22  ;;  %v8192_v60 = vld [vmem:[#allocation9 + $0x58] sm:$0xff]  }
 0x104   : > { %7620 = vmatmul.mubr.bf16.vlgmr.msra.gmra.mxu1 %v1877_v32  ;;  %7165 = vmatprep.subr.bf16.mxu0 %v8183_v15  ;;  %v1906_v32 = vshrl.u32 %v6567_v23, 16  ;;  %v2756_v15 = vshll.u32 %v6626_v11, 16  ;;  %v2793_v23 = vrot.slane %v2791_v1, 4  ;;  %v1886_v0 = vsel %vm404_vm0, %v1858_v25, %v1885_v38 }
 0x105   : > { %7628 = vmatpush3.bf16.msra.mxu1 %v8182_v34  ;;  %v2788_v34 = vshrl.u32 %v9138_v63, 16  ;;  %7623 = vmatprep.mubr.bf16.mxu1 %v1904_v54  ;;  %v2247_v18 = vshrl.u32 %v6595_v47, 16  ;;  %v1921_v54 = vor.u32 %v1920_v42, %v9270_v52  ;;  %v2250_v28 = vshll.u32 %v6595_v47, 16 }
 0x106   : > { %7629 = vmatprep.subr.bf16.mxu1 %v8185_v13  ;;  %v9280_v2 = vrot.slane %v1906_v32, 3  ;;  %v2758_v41 = vrot.slane %v2756_v15, 4  ;;  %v2763_v11 = vrot.slane %v2761_v49, 3  ;;  %v8200_v15 = vld [vmem:[#allocation9 + $0x48] sm:$0xff]  }
 0x107   : > { %7166 = vmatpush3.bf16.msra.mxu0 %v8184_v37  ;;  %v2790_v61 = vrot.slane %v2788_v34, 3  ;;  %v2755_v37 = vrot.slane %v2753_v62, 3  ;;  %v2252_v47 = vrot.slane %v2250_v28, 4 }
 0x108   : > { %7167 = vmatprep.subr.bf16.mxu0 %v8186_v57  ;;  %v6594_v57 = vcombine.low %v1688_v29, %v9205_v22  ;;  %v1912_v22 = vor.u32 %v1911_v58, %v9280_v2  ;;  %v8202_v29 = vld [vmem:[#allocation9 + $0x88] sm:$0xff]  }
 0x109   : > { %7630 = vmatpush3.bf16.msra.mxu1 %v8185_v13  ;;  %v2764_v13 = vshll.u32 %v9096_v59, 16  ;;  %v2759_v32 = vor.u32 %v2758_v41, %v2755_v37  ;;  %v9294_v48 = vor.u32 %v2793_v23, %v2790_v61  ;;  %v2293_v61 = vshll.u32 %v8951_v55, 16  ;;  %v8201_v2 = vld [vmem:[#allocation9 + $0x8] sm:$0xff]  }
 0x10a   : > { %7631 = vmatprep.subr.bf16.mxu1 %v8188_v33  ;;  %2129 = vmatmul.mubr.bf16.gmra.mxu0 %v1859_v36  ;;  %v1922_v36 = vsel %vm404_vm0, %v1894_v4, %v1921_v54  ;;  %v2290_v4 = vshrl.u32 %v8951_v55, 16  ;;  %v2317_v37 = vshrl.u32 %v8971_v9, 16  ;;  %v8203_v54 = vld [vmem:[#allocation9 + $0x40] sm:$0xff]   ;;  %v8264_v55 = vld [vmem:[#allocation9 + $0x1b0] sm:$0xff]  }
 0x10b   : > { %7168 = vmatpush3.bf16.msra.mxu0 %v8187_v31  ;;  %2136 = vmatprep.mubr.bf16.mxu0 %v1895_v53  ;;  %v2766_v52 = vrot.slane %v2764_v13, 4  ;;  %v10467_v31 = vshll.u32 %v8923_v40, 16  ;;  %v2233_v53 = vshll.u32 %v6594_v57, 16 }
 0x10c   : > { %7624 = vmatmul.mubr.bf16.gmra.mxu1 %v1931_v35  ;;  %7169 = vmatprep.subr.bf16.mxu0 %v8189_v6  ;;  %v8196_v35 = vld [vmem:[#allocation9 + $0x10] sm:$0xff]   ;;  %v2230_v6 = vshrl.u32 %v6594_v57, 16  ;;  %v2292_v41 = vrot.slane %v2290_v4, 3  ;;  %v8208_v57 = vld [vmem:[#allocation9 + $0x538] sm:$0xff]  }
 0x10d   : > { %7632 = vmatpush3.bf16.msra.mxu1 %v8188_v33  ;;  %7643 = vmatprep.mubr.bf16.mxu1 %v9148_v44  ;;  %v8197_v33 = vld [vmem:[#allocation9 + $0x90] sm:$0xff]   ;;  %v2260_v25 = vrot.slane %v10467_v31, 4  ;;  %v2767_v62 = vor.u32 %v2766_v52, %v2763_v11  ;;  %v2308_v11 = vshrl.u32 %v8975_v10, 16  ;;  %v8206_v52 = vld [vmem:[#allocation9 + $0x4f8] sm:$0xff]   ;;  %v2818_v31 = vshll.u32 %v9145_v19, 16 }
 0x10e   : > { %7633 = vmatprep.subr.bf16.mxu1 %v8191_v21  ;;  %v8195_v44 = vld [vmem:[#allocation9 + $0x50] sm:$0xff]  }
 0x10f   : > { %7170 = vmatpush3.bf16.msra.mxu0 %v8190_v16  ;;  %v9301_v42 = vsel %vm404_vm0, %v2759_v32, %v2767_v62  ;;  %v9305_v40 = vsel %vm404_vm0, %v2767_v62, %v9294_v48  ;;  %v2261_v23 = vor.u32 %v2260_v25, %v9113_v5  ;;  %v8205_v16 = vld [vmem:[#allocation9 + $0x80] sm:$0xff]   ;;  %v2295_v5 = vrot.slane %v2293_v61, 4  ;;  %v8207_v62 = vld [vmem:[#allocation9 + $0x4b8] sm:$0xff]  }
 0x110   : > { %7171 = vmatprep.subr.bf16.mxu0 %v8192_v60  ;;  %v1913_v60 = vsel %vm404_vm0, %v1885_v38, %v1912_v22  ;;  %v6638_v38 = vcombine.low %v9143_v46, %v9143_v46  ;;  %v2815_v32 = vshrl.u32 %v9145_v19, 16  ;;  %v8211_v22 = vld [vmem:[#allocation9 + $0x530] sm:$0xff]  }
 0x111   : > { %7634 = vmatpush3.bf16.msra.mxu1 %v8191_v21  ;;  %v2249_v21 = vrot.slane %v2247_v18, 3  ;;  %v2235_v18 = vrot.slane %v2233_v53, 4  ;;  %v9324_v25 = vor.u32 %v2295_v5, %v2292_v41  ;;  %v8209_v53 = vld [vmem:[#allocation9 + $0x4f0] sm:$0xff]  }
 0x112   : > { %7635 = vmatprep.subr.bf16.mxu1 %v8194_v12  ;;  %2137 = vmatmul.mubr.bf16.gmra.mxu0 %v1886_v0  ;;  %v2320_v0 = vshll.u32 %v8971_v9, 16  ;;  %v2842_v46 = vshrl.u32 %v6638_v38, 16 }
 0x113   : > { %7172 = vmatpush3.bf16.msra.mxu0 %v8193_v14  ;;  %2144 = vmatprep.mubr.bf16.mxu0 %v1922_v36  ;;  %v2253_v58 = vor.u32 %v2252_v47, %v2249_v21  ;;  %v8204_v14 = vld [vmem:[#allocation9] sm:$0xff]  }
 0x114   : > { %7173 = vmatprep.subr.bf16.mxu0 %v8195_v44  ;;  %v2311_v44 = vshll.u32 %v8975_v10, 16  ;;  %v8433_v36 = vld [vmem:[#allocation2 + $0x60] sm:$0xff]  ;;  %v2844_v41 = vrot.slane %v2842_v46, 3 }
 0x115   : > { %7636 = vmatpush3.bf16.msra.mxu1 %v8194_v12  ;;  %v2232_v12 = vrot.slane %v2230_v6, 3  ;;  %v2262_v28 = vsel %vm404_vm0, %v2253_v58, %v2261_v23  ;;  %v6598_v21 = vcombine.high %v8433_v36, %v8433_v36  ;;  %v2322_v6 = vrot.slane %v2320_v0, 4  ;;  %v8217_v46 = vld [vmem:[#allocation9 + $0x520] sm:$0xff]  }
 0x116   : > { %7637 = vmatprep.subr.bf16.mxu1 %v8197_v33  ;;  %v2310_v58 = vrot.slane %v2308_v11, 3 }
 0x117   : > { %7174 = vmatpush3.bf16.msra.mxu0 %v8196_v35  ;;  %v2845_v35 = vshll.u32 %v6638_v38, 16  ;;  %v2647_v38 = vld [vmem:[#allocation2 + $0x18] sm:$0x88] }
 0x118   : > { %7175 = vmatprep.subr.bf16.mxu0 %v8200_v15  ;;  %v6597_v15 = vcombine.low %v8433_v36, %v8433_v36  ;;  %v8213_v36 = vld [vmem:[#allocation9 + $0x4a8] sm:$0xff]  }
 0x119   : > { %7638 = vmatpush3.bf16.msra.mxu1 %v8197_v33  ;;  %v2236_v33 = vor.u32 %v2235_v18, %v2232_v12  ;;  %v2313_v12 = vrot.slane %v2311_v44, 4  ;;  %v2344_v18 = vshrl.u32 %v6598_v21, 16 }
 0x11a   : > { %7639 = vmatprep.subr.bf16.mxu1 %v8202_v29  ;;  %2145 = vmatmul.mubr.bf16.gmra.mxu0 %v1913_v60  ;;  %v8210_v60 = vld [vmem:[#allocation9 + $0x4b0] sm:$0xff]   ;;  %v2335_v5 = vshrl.u32 %v6597_v15, 16 }
 0x11b   : > { %7176 = vmatpush3.bf16.msra.mxu0 %v8201_v2  ;;  %2549 = vmatprep.mubr.bf16.mxu0 %v2262_v28  ;;  %v2245_v47 = vsel %vm404_vm0, %v2236_v33, %v9177_v8  ;;  %v2817_v2 = vrot.slane %v2815_v32, 3  ;;  %v2297_v8 = vsel %vm404_vm0, %v2261_v23, %v9324_v25  ;;  %v8212_v23 = vld [vmem:[#allocation9 + $0x4e8] sm:$0xff]   ;;  %v2338_v33 = vshll.u32 %v6597_v15, 16 }
 0x11c   : > { %7177 = vmatprep.subr.bf16.mxu0 %v8203_v54  ;;  %v2347_v54 = vshll.u32 %v6598_v21, 16  ;;  %v2346_v21 = vrot.slane %v2344_v18, 3 }
 0x11d   : > { %7640 = vmatpush3.bf16.msra.mxu1 %v8202_v29  ;;  %v2319_v29 = vrot.slane %v2317_v37, 3 }
 0x11e   : > { %7641 = vmatprep.subr.bf16.mxu1 %v8205_v16 }
 0x11f   : > { %7178 = vmatpush3.bf16.msra.mxu0 %v8204_v14  ;;  %v9343_v14 = vor.u32 %v2322_v6, %v2319_v29  ;;  %v2349_v29 = vrot.slane %v2347_v54, 4  ;;  %v9350_v6 = vld [vmem:[#allocation2 + $0x24] sm:$0xff]  ;;  %v8435_v54 = vld [vmem:[#allocation2 + $0x2c] sm:$0xf] }
 0x120   : > { %7215 = vmatprep.subr.bf16.mxu0 %v8206_v52  ;;  %v2847_v52 = vrot.slane %v2845_v35, 4  ;;  %v2337_v35 = vrot.slane %v2335_v5, 3 }
 0x121   : > { %7642 = vmatpush3.bf16.msra.mxu1 %v8205_v16  ;;  %v2820_v16 = vrot.slane %v2818_v31, 4 }
 0x122   : > { %7651 = vmatprep.subr.bf16.mxu1 %v8208_v57  ;;  %2550 = vmatmul.mubr.bf16.vlgmr.msra.gmra.mxu0 %v2245_v47  ;;  %v2848_v47 = vor.u32 %v2847_v52, %v2844_v41 }
 0x123   : > { %7216 = vmatpush3.bf16.msra.mxu0 %v8207_v62  ;;  %v2821_v28 = vor.u32 %v2820_v16, %v2817_v2  ;;  %2557 = vmatprep.mubr.bf16.mxu0 %v2297_v8  ;;  %v3214_v62 = vld [vmem:[#allocation2 + $0x20] sm:$0xf]  ;;  %v9363_v8 = vor.u32 %v2313_v12, %v2310_v58  ;;  %v8220_v16 = vld [vmem:[#allocation9 + $0x518] sm:$0xff]   ;;  %v8223_v12 = vld [vmem:[#allocation9 + $0x510] sm:$0xff]  }
 0x124   : > { %7644 = vmatmul.mubr.bf16.vlgmr.msra.gmra.mxu1 %v9152_v24  ;;  %v8214_v24 = vld [vmem:[#allocation9 + $0x528] sm:$0xff]   ;;  %7217 = vmatprep.subr.bf16.mxu0 %v8209_v53  ;;  %v8215_v53 = vld [vmem:[#allocation9 + $0x4e0] sm:$0xff]   ;;  %v6665_v41 = vcombine.low %v3214_v62, %v8435_v54 }
 0x125   : > { %7652 = vmatpush3.bf16.msra.mxu1 %v8208_v57  ;;  %7647 = vmatprep.mubr.bf16.mxu1 %v9231_v3  ;;  %v9348_v57 = vsel %vm404_vm0, %v9294_v48, %v2821_v28  ;;  %v6625_v3 = vcombine.high %v2647_v38, %v9350_v6  ;;  %v9356_v48 = vsel %vm404_vm0, %v9324_v25, %v9343_v14  ;;  %v8216_v2 = vld [vmem:[#allocation9 + $0x4a0] sm:$0xff]  }
 0x126   : > { %7653 = vmatprep.subr.bf16.mxu1 %v8211_v22  ;;  %v9360_v15 = vsel %vm404_vm0, %v2821_v28, %v2848_v47  ;;  %v8219_v28 = vld [vmem:[#allocation9 + $0x498] sm:$0xff]   ;;  %v9371_v58 = vsel %vm404_vm0, %v9179_v43, %v9363_v8  ;;  %v3302_v47 = vshrl.u32 %v6665_v41, 16  ;;  %v8231_v54 = vld [vmem:[#allocation9 + $0x500] sm:$0xff]  }
 0x127   : > { %7218 = vmatpush3.bf16.msra.mxu0 %v8210_v60  ;;  %v8218_v60 = vld [vmem:[#allocation9 + $0x4d8] sm:$0xff]   ;;  %v2736_v18 = vshrl.u32 %v6625_v3, 16  ;;  %v2739_v5 = vshll.u32 %v6625_v3, 16  ;;  %v8226_v3 = vld [vmem:[#allocation9 + $0x4c8] sm:$0xff]  }
 0x128   : > { %7219 = vmatprep.subr.bf16.mxu0 %v8212_v23  ;;  %v2350_v23 = vor.u32 %v2349_v29, %v2346_v21  ;;  %v3308_v29 = vrot.slane %v2764_v13, 1 }
 0x129   : > { %7654 = vmatpush3.bf16.msra.mxu1 %v8211_v22  ;;  %v2340_v22 = vrot.slane %v2338_v33, 4  ;;  %v8222_v33 = vld [vmem:[#allocation9 + $0x490] sm:$0xff]   ;;  %v2741_v21 = vrot.slane %v2739_v5, 4  ;;  %v8230_v5 = vld [vmem:[#allocation9 + $0x480] sm:$0xff]  }
 0x12a   : > { %7655 = vmatprep.subr.bf16.mxu1 %v8214_v24  ;;  %2558 = vmatmul.mubr.bf16.gmra.mxu0 %v9187_v17  ;;  %v8221_v17 = vld [vmem:[#allocation9 + $0x4d0] sm:$0xff]   ;;  %v2351_v52 = vsel %vm404_vm0, %v9343_v14, %v2350_v23  ;;  %v3316_v13 = vor.u32 %v3308_v29, %v2761_v49  ;;  %v9390_v23 = vrot.slane %v2818_v31, 1  ;;  %v8236_v49 = vld [vmem:[#allocation9 + $0x478] sm:$0xff]   ;;  %v2809_v31 = vshll.u32 %v8999_v26, 16 }
 0x12b   : > { %7220 = vmatpush3.bf16.msra.mxu0 %v8213_v36  ;;  %2565 = vmatprep.mubr.bf16.mxu0 %v9356_v48  ;;  %v8228_v36 = vld [vmem:[#allocation9 + $0x508] sm:$0xff]   ;;  %v2341_v62 = vor.u32 %v2340_v22, %v2337_v35 }
 0x12c   : > { %7648 = vmatmul.mubr.bf16.gmra.mxu1 %v9254_v7  ;;  %7221 = vmatprep.subr.bf16.mxu0 %v8215_v53  ;;  %v6624_v7 = vcombine.low %v2647_v38, %v9350_v6 }
 0x12d   : > { %7656 = vmatpush3.bf16.msra.mxu1 %v8214_v24  ;;  %7667 = vmatprep.mubr.bf16.mxu1 %v9301_v42  ;;  %v2738_v24 = vrot.slane %v2736_v18, 3  ;;  %v3304_v42 = vshll.u32 %v6665_v41, 16  ;;  %v8229_v41 = vld [vmem:[#allocation9 + $0x4c0] sm:$0xff]  }
 0x12e   : > { %7657 = vmatprep.subr.bf16.mxu1 %v8217_v46  ;;  %v2719_v38 = vshrl.u32 %v6624_v7, 16 }
 0x12f   : > { %7222 = vmatpush3.bf16.msra.mxu0 %v8216_v2  ;;  %v3306_v53 = vrot.slane %v3304_v42, 1  ;;  %v3317_v2 = vrot.slane %v2791_v1, 1  ;;  %v2742_v18 = vor.u32 %v2741_v21, %v2738_v24  ;;  %v8235_v24 = vld [vmem:[#allocation9 + $0x3f8] sm:$0xff]  }
 0x130   : > { %7223 = vmatprep.subr.bf16.mxu0 %v8218_v60  ;;  %v8227_v60 = vld [vmem:[#allocation9 + $0x488] sm:$0xff]   ;;  %v2721_v35 = vrot.slane %v2719_v38, 3  ;;  %v8239_v38 = vld [vmem:[#allocation9 + $0x470] sm:$0xff]  }
 0x131   : > { %7658 = vmatpush3.bf16.msra.mxu1 %v8217_v46  ;;  %v2722_v46 = vshll.u32 %v6624_v7, 16  ;;  %v2342_v7 = vsel %vm404_vm0, %v9363_v8, %v2341_v62  ;;  %v3325_v1 = vor.u32 %v3317_v2, %v2788_v34  ;;  %v9396_v63 = vsel %vm3282_vm1, %v3316_v13, %v3317_v2  ;;  %v8234_v34 = vld [vmem:[#allocation9 + $0x438] sm:$0xff]   ;;  %v8242_v62 = vld [vmem:[#allocation9 + $0x468] sm:$0xff]  }
 0x132   : > { %7659 = vmatprep.subr.bf16.mxu1 %v8220_v16  ;;  %2566 = vmatmul.mubr.bf16.gmra.mxu0 %v9371_v58 }
 0x133   : > { %7224 = vmatpush3.bf16.msra.mxu0 %v8219_v28  ;;  %2573 = vmatprep.mubr.bf16.mxu0 %v2351_v52  ;;  %v2724_v22 = vrot.slane %v2722_v46, 4  ;;  %v2751_v28 = vsel %vm404_vm0, %v2742_v18, %v9324_v25  ;;  %v2806_v25 = vshrl.u32 %v8999_v26, 16  ;;  %v8237_v52 = vld [vmem:[#allocation9 + $0x430] sm:$0xff]   ;;  %v2811_v46 = vrot.slane %v2809_v31, 4  ;;  %v8241_v18 = vld [vmem:[#allocation9 + $0x3e8] sm:$0xff]  }
 0x134   : > { %7225 = vmatprep.subr.bf16.mxu0 %v8221_v17  ;;  %v8276_v26 = vld [vmem:[#allocation9 + $0x1d0] sm:$0xff]  }
 0x135   : > { %7660 = vmatpush3.bf16.msra.mxu1 %v8220_v16  ;;  %v3307_v16 = vor.u32 %v3306_v53, %v3302_v47  ;;  %v2725_v59 = vor.u32 %v2724_v22, %v2721_v35  ;;  %v2808_v42 = vrot.slane %v2806_v25, 3  ;;  %v8238_v47 = vld [vmem:[#allocation9 + $0x3f0] sm:$0xff]   ;;  %v2800_v53 = vshll.u32 %v9003_v27, 16  ;;  %v8243_v35 = vld [vmem:[#allocation9 + $0x420] sm:$0xff]  }
 0x136   : > { %7661 = vmatprep.subr.bf16.mxu1 %v8223_v12 }
 0x137   : > { %7226 = vmatpush3.bf16.msra.mxu0 %v8222_v33  ;;  %v9393_v17 = vsel %vm3282_vm1, %v3307_v16, %v3308_v29  ;;  %v2734_v33 = vsel %vm404_vm0, %v2725_v59, %v9179_v43  ;;  %v2797_v43 = vshrl.u32 %v9003_v27, 16  ;;  %v8248_v59 = vld [vmem:[#allocation9 + $0x458] sm:$0xff]   ;;  %v8302_v27 = vld [vmem:[#allocation2 + $0x74] ss:$0 sps:$4 sm:$0x11]  }
 0x138   : > { %7227 = vmatprep.subr.bf16.mxu0 %v8226_v3  ;;  %v2812_v3 = vor.u32 %v2811_v46, %v2808_v42  ;;  %v8249_v42 = vld [vmem:[#allocation9 + $0x410] sm:$0xff]  }
 0x139   : > { %7662 = vmatpush3.bf16.msra.mxu1 %v8223_v12  ;;  %v9402_v12 = vsel %vm3282_vm1, %v3325_v1, %v9390_v23  ;;  %v8244_v1 = vld [vmem:[#allocation9 + $0x3e0] sm:$0xff]  }
 0x13a   : > { %7663 = vmatprep.subr.bf16.mxu1 %v8228_v36  ;;  %2574 = vmatmul.mubr.bf16.gmra.mxu0 %v2342_v7  ;;  %v8245_v7 = vld [vmem:[#allocation9 + $0x460] sm:$0xff]   ;;  %v2813_v22 = vsel %vm404_vm0, %v9343_v14, %v2812_v3  ;;  %v8247_v14 = vld [vmem:[#allocation9 + $0x3d8] sm:$0xff]  }
 0x13b   : > { %7228 = vmatpush3.bf16.msra.mxu0 %v8227_v60  ;;  %3038 = vmatprep.mubr.bf16.mxu0 %v2751_v28  ;;  %v3213_v60 = vld [vmem:[#allocation2 + $0x18] sm:$0xff] }
 0x13c   : > { %7229 = vmatprep.subr.bf16.mxu0 %v8229_v41 }
 0x13d   : > { %7664 = vmatpush3.bf16.msra.mxu1 %v8228_v36  ;;  %v9406_v36 = vld [vmem:[#allocation2 + $0xc] sm:$0xff] }
 0x13e   : > { %7665 = vmatprep.subr.bf16.mxu1 %v8231_v54  ;;  %v6637_v21 = vcombine.high %v9406_v36, %v9406_v36  ;;  %v6636_v16 = vcombine.low %v9406_v36, %v9406_v36 }
 0x13f   : > { %7230 = vmatpush3.bf16.msra.mxu0 %v8230_v5 }
 0x140   : > { %7267 = vmatprep.subr.bf16.mxu0 %v8234_v34  ;;  %v2833_v29 = vshrl.u32 %v6637_v21, 16  ;;  %v2836_v2 = vshll.u32 %v6637_v21, 16  ;;  %v2824_v28 = vshrl.u32 %v6636_v16, 16  ;;  %v8246_v34 = vld [vmem:[#allocation9 + $0x418] sm:$0xff]  }
 0x141   : > { %7666 = vmatpush3.bf16.msra.mxu1 %v8231_v54  ;;  %v2799_v54 = vrot.slane %v2797_v43, 3 }
 0x142   : > { %7675 = vmatprep.subr.bf16.mxu1 %v8236_v49  ;;  %3039 = vmatmul.mubr.bf16.vlgmr.msra.gmra.mxu0 %v2734_v33  ;;  %v2835_v13 = vrot.slane %v2833_v29, 3  ;;  %v2838_v41 = vrot.slane %v2836_v2, 4  ;;  %v8253_v2 = vld [vmem:[#allocation9 + $0x3c8] sm:$0xff]  }
 0x143   : > { %7268 = vmatpush3.bf16.msra.mxu0 %v8235_v24  ;;  %3046 = vmatprep.mubr.bf16.mxu0 %v9356_v48  ;;  %v2802_v48 = vrot.slane %v2800_v53, 4 }
 0x144   : > { %7668 = vmatmul.mubr.bf16.vlgmr.msra.gmra.mxu1 %v9305_v40  ;;  %7269 = vmatprep.subr.bf16.mxu0 %v8237_v52  ;;  %v8240_v40 = vld [vmem:[#allocation9 + $0x428] sm:$0xff]   ;;  %v8251_v52 = vld [vmem:[#allocation9 + $0x450] sm:$0xff]  }
 0x145   : > { %7676 = vmatpush3.bf16.msra.mxu1 %v8236_v49  ;;  %7671 = vmatprep.mubr.bf16.mxu1 %v9348_v57  ;;  %v6664_v57 = vcombine.high %v3213_v60, %v9350_v6  ;;  %v2803_v5 = vor.u32 %v2802_v48, %v2799_v54  ;;  %v2827_v49 = vshll.u32 %v6636_v16, 16  ;;  %v3299_v54 = vrot.slane %v2293_v61, 1  ;;  %v3161_v48 = vld [vmem:[#allocation2 + $0x14] sm:$0xf] }
 0x146   : > { %7677 = vmatprep.subr.bf16.mxu1 %v8239_v38 }
 0x147   : > { %7270 = vmatpush3.bf16.msra.mxu0 %v8238_v47  ;;  %v3295_v24 = vshll.u32 %v6664_v57, 16  ;;  %v2804_v33 = vsel %vm404_vm0, %v9363_v8, %v2803_v5  ;;  %v2829_v21 = vrot.slane %v2827_v49, 4  ;;  %v3293_v46 = vshrl.u32 %v6664_v57, 16  ;;  %v8252_v8 = vld [vmem:[#allocation9 + $0x408] sm:$0xff]   ;;  %v8262_v49 = vld [vmem:[#allocation9 + $0x238] sm:$0xff]  }
 0x148   : > { %7271 = vmatprep.subr.bf16.mxu0 %v8240_v40  ;;  %v8254_v40 = vld [vmem:[#allocation9 + $0x448] sm:$0xff]   ;;  %v8274_v57 = vld [vmem:[#allocation2 + $0x80] ss:$0 sps:$4 sm:$0x11]  }
 0x149   : > { %7678 = vmatpush3.bf16.msra.mxu1 %v8239_v38  ;;  %v2839_v38 = vor.u32 %v2838_v41, %v2835_v13  ;;  %v3297_v47 = vrot.slane %v3295_v24, 1  ;;  %v8256_v13 = vld [vmem:[#allocation9 + $0x3c0] sm:$0xff]   ;;  %v3313_v24 = vor.u32 %v3299_v54, %v2290_v4 }
 0x14a   : > { %7679 = vmatprep.subr.bf16.mxu1 %v8242_v62  ;;  %3047 = vmatmul.mubr.bf16.gmra.mxu0 %v9371_v58  ;;  %v6663_v58 = vcombine.low %v3213_v60, %v9350_v6  ;;  %v8257_v60 = vld [vmem:[#allocation9 + $0x440] sm:$0xff]  }
 0x14b   : > { %7272 = vmatpush3.bf16.msra.mxu0 %v8241_v18  ;;  %3054 = vmatprep.mubr.bf16.mxu0 %v2813_v22  ;;  %v3298_v18 = vor.u32 %v3297_v47, %v3293_v46  ;;  %v8437_v41 = vld [vmem:[#allocation2 + $0x20] sm:$0xf] }
 0x14c   : > { %7672 = vmatmul.mubr.bf16.gmra.mxu1 %v9360_v15  ;;  %7273 = vmatprep.subr.bf16.mxu0 %v8243_v35  ;;  %v2826_v15 = vrot.slane %v2824_v28, 3  ;;  %v3286_v29 = vshll.u32 %v6663_v58, 16  ;;  %v3284_v16 = vshrl.u32 %v6663_v58, 16  ;;  %v8255_v35 = vld [vmem:[#allocation9 + $0x400] sm:$0xff]   ;;  %v10468_v28 = vshll.u32 %v8955_v56, 16 }
 0x14d   : > { %7680 = vmatpush3.bf16.msra.mxu1 %v8242_v62  ;;  %7691 = vmatprep.mubr.bf16.mxu1 %v9393_v17  ;;  %v2840_v62 = vsel %vm404_vm0, %v2812_v3, %v2839_v38  ;;  %v8250_v17 = vld [vmem:[#allocation9 + $0x3d0] sm:$0xff]   ;;  %v3300_v22 = vsel %vm3282_vm1, %v3298_v18, %v3299_v54  ;;  %v3314_v38 = vrot.slane %v2320_v0, 1  ;;  %v9448_v0 = vld [vmem:[#allocation2 + $0x78] sm:$0x11]  ;;  %v8266_v18 = vld [vmem:[#allocation9 + $0x1e8] sm:$0xff]  }
 0x14e   : > { %7681 = vmatprep.subr.bf16.mxu1 %v8245_v7  ;;  %v2830_v6 = vor.u32 %v2829_v21, %v2826_v15  ;;  %v3288_v3 = vrot.slane %v3286_v29, 1  ;;  %v8263_v21 = vld [vmem:[#allocation9 + $0x1f0] sm:$0xff]   ;;  %v8268_v54 = vld [vmem:[#allocation9 + $0x228] sm:$0xff]  }
 0x14f   : > { %7274 = vmatpush3.bf16.msra.mxu0 %v8244_v1  ;;  %v6695_v1 = vcombine.low %v3161_v48, %v8437_v41  ;;  %v3315_v4 = vsel %vm3282_vm1, %v3313_v24, %v3314_v38  ;;  %v8269_v41 = vld [vmem:[#allocation9 + $0x1e0] sm:$0xff]  }
 0x150   : > { %7275 = vmatprep.subr.bf16.mxu0 %v8246_v34  ;;  %v3289_v61 = vor.u32 %v3288_v3, %v3284_v16  ;;  %v3342_v34 = vshll.u32 %v8274_v57, 16  ;;  %v3323_v3 = vrot.slane %v2809_v31, 1  ;;  %v10470_v57 = vshll.u32 %v9015_v39, 16 }
 0x151   : > { %7682 = vmatpush3.bf16.msra.mxu1 %v8245_v7  ;;  %v2831_v7 = vsel %vm404_vm0, %v2803_v5, %v2830_v6  ;;  %v8260_v5 = vld [vmem:[#allocation9 + $0x1f8] sm:$0xff]   ;;  %v3669_v15 = vshll.u32 %v6695_v1, 16 }
 0x152   : > { %7683 = vmatprep.subr.bf16.mxu1 %v8248_v59  ;;  %3055 = vmatmul.mubr.bf16.gmra.mxu0 %v2804_v33 }
 0x153   : > { %7276 = vmatpush3.bf16.msra.mxu0 %v8247_v14  ;;  %3062 = vmatprep.mubr.bf16.mxu0 %v2840_v62  ;;  %v8261_v14 = vld [vmem:[#allocation9 + $0x1b8] sm:$0xff]   ;;  %v3671_v29 = vrot.slane %v3669_v15, 1  ;;  %v3320_v15 = vrot.slane %v2800_v53, 1 }
 0x154   : > { %7277 = vmatprep.subr.bf16.mxu0 %v8249_v42  ;;  %v3344_v42 = vrot.slane %v3342_v34, 1 }
 0x155   : > { %7684 = vmatpush3.bf16.msra.mxu1 %v8248_v59  ;;  %v3290_v59 = vrot.slane %v10468_v28, 1 }
 0x156   : > { %7685 = vmatprep.subr.bf16.mxu1 %v8251_v52 }
 0x157   : > { %7278 = vmatpush3.bf16.msra.mxu0 %v8250_v17  ;;  %v3291_v33 = vsel %vm3282_vm1, %v3289_v61, %v3290_v59  ;;  %v3340_v17 = vor.u32 %v9390_v23, %v2815_v32  ;;  %v3322_v23 = vor.u32 %v3314_v38, %v2317_v37  ;;  %v8270_v61 = vld [vmem:[#allocation9 + $0x1a0] sm:$0xff]  }
 0x158   : > { %7279 = vmatprep.subr.bf16.mxu0 %v8252_v8 }
 0x159   : > { %7686 = vmatpush3.bf16.msra.mxu1 %v8251_v52  ;;  %v8265_v52 = vld [vmem:[#allocation9 + $0x230] sm:$0xff]   ;;  %v3345_v48 = vsel %vm3282_vm1, %v3340_v17, %v3344_v42  ;;  %v3324_v28 = vsel %vm3282_vm1, %v3322_v23, %v3323_v3 }
 0x15a   : > { %7687 = vmatprep.subr.bf16.mxu1 %v8254_v40  ;;  %3063 = vmatmul.mubr.bf16.gmra.mxu0 %v2831_v7  ;;  %v8267_v7 = vld [vmem:[#allocation9 + $0x1a8] sm:$0xff]  }
 0x15b   : > { %7280 = vmatpush3.bf16.msra.mxu0 %v8253_v2  ;;  %3534 = vmatprep.mubr.bf16.mxu0 %v3300_v22  ;;  %v9469_v22 = vrot.slane %v10470_v57, 1 }
 0x15c   : > { %7281 = vmatprep.subr.bf16.mxu0 %v8255_v35 }
 0x15d   : > { %7688 = vmatpush3.bf16.msra.mxu1 %v8254_v40  ;;  %v3667_v40 = vshrl.u32 %v6695_v1, 16 }
 0x15e   : > { %7689 = vmatprep.subr.bf16.mxu1 %v8257_v60 }
 0x15f   : > { %7282 = vmatpush3.bf16.msra.mxu0 %v8256_v13  ;;  %v3672_v35 = vor.u32 %v3671_v29, %v3667_v40 }
 0x160   : > { %7319 = vmatprep.subr.bf16.mxu0 %v8260_v5 }
 0x161   : > { %7690 = vmatpush3.bf16.msra.mxu1 %v8257_v60  ;;  %v3311_v60 = vrot.slane %v2311_v44, 1  ;;  %v3674_v24 = vsel %vm3282_vm1, %v3672_v35, %v9469_v22 }
 0x162   : > { %v6971_v58 = vpop.f32.mrf.mxu0  ;;  %7699 = vmatprep.subr.bf16.mxu1 %v8262_v49  ;;  %3535 = vmatmul.mubr.bf16.vlgmr.msra.gmra.mxu0 %v3291_v33  ;;  %v8275_v33 = vld [vmem:[#allocation9 + $0x218] sm:$0xff]  }
 0x163   : > { %7320 = vmatpush3.bf16.msra.mxu0 %v8261_v14  ;;  %3542 = vmatprep.mubr.bf16.mxu0 %v3315_v4  ;;  %v3319_v14 = vor.u32 %v3311_v60, %v2308_v11  ;;  %v8273_v4 = vld [vmem:[#allocation9 + $0x198] sm:$0xff]  }
 0x164   : > { %v6972_v46 = vpop.f32.mrf.mxu0  ;;  %v7549_v47 = vpop.f32.mrf.mxu1  ;;  %7692 = vmatmul.mubr.bf16.vlgmr.msra.gmra.mxu1 %v9396_v63  ;;  %v10469_v63 = vshrl.u32 %v8955_v56, 16  ;;  %7321 = vmatprep.subr.bf16.mxu0 %v8263_v21  ;;  %v6667_v56 = vcombine.high %v9448_v0, %v9448_v0 }
 0x165   : > { %v6973_v62 = vadd.f32 %v6972_v46, %v6971_v58  ;;  %7700 = vmatpush3.bf16.msra.mxu1 %v8262_v49  ;;  %7695 = vmatprep.mubr.bf16.mxu1 %v9402_v12  ;;  %v8271_v12 = vld [vmem:[#allocation9 + $0x220] sm:$0xff]   ;;  %v8438_v49 = vld [vmem:[#allocation2 + $0x18] sm:$0xff]  ;;  %v3334_v46 = vor.u32 %v3323_v3, %v2806_v25  ;;  %v8282_v3 = vld [vmem:[#allocation9 + $0x188] sm:$0xff]  }
 0x166   : > { %v6974_v6 = vpop.f32.mrf.mxu0  ;;  %v878_v8 = vpop.f32.mrf.mxu1  ;;  %7701 = vmatprep.subr.bf16.mxu1 %v8265_v52  ;;  %v3310_v2 = vor.u32 %v3290_v59, %v10469_v63  ;;  %v3336_v59 = vshll.u32 %v6667_v56, 16  ;;  %v6694_v5 = vcombine.high %v9406_v36, %v8438_v49  ;;  %v8272_v58 = vld [vmem:[#allocation9 + $0x1d8] sm:$0xff]   ;;  %v9489_v10 = vcombine.low %v9406_v36, %v8438_v49  ;;  %v10474_v49 = vld [vmem:[#allocation21_spill] sm:$0xff] }
 0x167   : > { %v9457_v16 = vadd.f32 %v6973_v62, %v878_v8  ;;  %7322 = vmatpush3.bf16.msra.mxu0 %v8264_v55  ;;  %v8277_v8 = vld [vmem:[#allocation9 + $0x190] sm:$0xff]  }
 0x168   : > { %v6975_v19 = vpop.f32.mrf.mxu0  ;;  %v7550_v32 = vpop.f32.mrf.mxu1  ;;  %v3312_v31 = vsel %vm3282_vm1, %v3310_v2, %v3311_v60  ;;  %7323 = vmatprep.subr.bf16.mxu0 %v8266_v18  ;;  %v3338_v55 = vrot.slane %v3336_v59, 1  ;;  %v3660_v11 = vshll.u32 %v6694_v5, 16  ;;  %v3651_v36 = vshll.u32 %v9489_v10, 16  ;;  %v8283_v18 = vld [vmem:[#allocation9 + $0x208] sm:$0xff]   ;;  %v8284_v59 = vld [vmem:[#allocation9 + $0x1c0] sm:$0xff]  }
 0x169   : > { %v6976_v44 = vadd.f32 %v6975_v19, %v6974_v6  ;;  %7702 = vmatpush3.bf16.msra.mxu1 %v8265_v52  ;;  %v6666_v52 = vcombine.low %v9448_v0, %v9448_v0  ;;  %v3321_v0 = vsel %vm3282_vm1, %v3319_v14, %v3320_v15  ;;  %v3658_v29 = vshrl.u32 %v6694_v5, 16 }
 0x16a   : > { %v6977_v9 = vpop.f32.mrf.mxu0  ;;  %v881_v37 = vpop.f32.mrf.mxu1  ;;  %7703 = vmatprep.subr.bf16.mxu1 %v8268_v54  ;;  %3543 = vmatmul.mubr.bf16.gmra.mxu0 %v3312_v31  ;;  %v3339_v40 = vsel %vm3282_vm1, %v3334_v46, %v3338_v55  ;;  %v3662_v6 = vrot.slane %v3660_v11, 1  ;;  %v3328_v2 = vor.u32 %v3320_v15, %v2797_v43  ;;  %v3649_v56 = vshrl.u32 %v9489_v10, 16  ;;  %v8286_v31 = vld [vmem:[#allocation9 + $0x200] sm:$0xff]   ;;  %v9518_v15 = vld [vmem:[#allocation2 + $0x2c] ss:$12 sps:$4 sm:$0xff]  }
 0x16b   : > { %v9472_v13 = vadd.f32 %v6976_v44, %v881_v37  ;;  %7324 = vmatpush3.bf16.msra.mxu0 %v8267_v7  ;;  %3550 = vmatprep.mubr.bf16.mxu0 %v3324_v28  ;;  %v3330_v62 = vshll.u32 %v6666_v52, 16  ;;  %v3653_v44 = vrot.slane %v3651_v36, 1  ;;  %v10475_v5 = vshll.u32 %v10474_v49, 16  ;;  %v8289_v52 = vld [vmem:[#allocation9 + $0x6b8] sm:$0xff]  }
 0x16c   : > { %v6978_v1 = vpop.f32.mrf.mxu0  ;;  %7696 = vmatmul.mubr.bf16.gmra.mxu1 %v3345_v48  ;;  %7325 = vmatprep.subr.bf16.mxu0 %v8269_v41  ;;  %v9498_v19 = vpop.f32.mrf.mxu1  ;;  %v3663_v7 = vor.u32 %v3662_v6, %v3658_v29  ;;  %v10471_v48 = vshll.u32 %v9021_v50, 16  ;;  %v10479_v55 = vshll.u32 %v9071_v30, 16 }
 0x16d   : > { %v6979_v34 = vadd.f32 %v6978_v1, %v6977_v9  ;;  %7704 = vmatpush3.bf16.msra.mxu1 %v8268_v54  ;;  %7715 = vmatprep.mubr.bf16.mxu1 %v3674_v24  ;;  %v3332_v60 = vrot.slane %v3330_v62, 1  ;;  %v10476_v24 = vld [vmem:[#allocation23_spill] sm:$0xff]  ;;  %v3654_v6 = vor.u32 %v3653_v44, %v3649_v56 }
 0x16e   : > { %v6980_v38 = vpop.f32.mrf.mxu0  ;;  %7705 = vmatprep.subr.bf16.mxu1 %v8271_v12  ;;  %v3664_v35 = vrot.slane %v10471_v48, 1  ;;  %v894_v57 = vpop.f32.mrf.mxu1  ;;  %v9527_v10 = vrot.slane %v10479_v55, 1  ;;  %v8290_v44 = vld [vmem:[#allocation9 + $0x670] sm:$0xff]  }
 0x16f   : > { %v9484_v21 = vadd.f32 %v7549_v47, %v6979_v34  ;;  %7326 = vmatpush3.bf16.msra.mxu0 %v8270_v61  ;;  %v8278_v47 = vld [vmem:[#allocation9 + $0x210] sm:$0xff]   ;;  %v3333_v37 = vsel %vm3282_vm1, %v3328_v2, %v3332_v60  ;;  %v3682_v34 = vrot.slane %v10475_v5, 1  ;;  %v10487_v2 = vshll.u32 %v9035_v45, 16 }
 0x170   : > { %v6981_v42 = vpop.f32.mrf.mxu0  ;;  %7327 = vmatprep.subr.bf16.mxu0 %v8272_v58  ;;  %v9510_v28 = vpop.f32.mrf.mxu1  ;;  %v8285_v58 = vld [vmem:[#allocation9 + $0x180] sm:$0xff]  }
 0x171   : > { %v6982_v53 = vadd.f32 %v6981_v42, %v6980_v38  ;;  %7706 = vmatpush3.bf16.msra.mxu1 %v8271_v12  ;;  %v10472_v12 = vld [vmem:[#allocation22_spill] sm:$0xff]  ;;  %v10477_v38 = vshll.u32 %v10476_v24, 16  ;;  %v10478_v42 = vshll.u32 %v9065_v20, 16  ;;  %v3691_v60 = vrot.slane %v10487_v2, 1 }
 0x172   : > { %7707 = vmatprep.subr.bf16.mxu1 %v8275_v33  ;;  %v6983_v25 = vpop.f32.mrf.mxu0  ;;  %3551 = vmatmul.mubr.bf16.gmra.mxu0 %v3321_v0  ;;  %v10473_v41 = vshll.u32 %v10472_v12, 16  ;;  %v8287_v0 = vld [vmem:[#allocation9 + $0x678] sm:$0xff]  }
 0x173   : > { %v9492_v17 = vadd.f32 %v7550_v32, %v6982_v53  ;;  %7328 = vmatpush3.bf16.msra.mxu0 %v8273_v4  ;;  %3558 = vmatprep.mubr.bf16.mxu0 %v3339_v40  ;;  %v8281_v32 = vld [vmem:[#allocation9 + $0x1c8] sm:$0xff]   ;;  %v9516_v14 = vrot.slane %v10477_v38, 1  ;;  %v9523_v46 = vrot.slane %v10478_v42, 1  ;;  %v897_v4 = vpop.f32.mrf.mxu1  ;;  %v3707_v40 = vshll.u32 %v8302_v27, 16 }
 0x174   : > { %v6984_v63 = vpop.f32.mrf.mxu0  ;;  %7329 = vmatprep.subr.bf16.mxu0 %v8276_v26  ;;  %v9508_v1 = vrot.slane %v10473_v41, 1  ;;  %v10483_v26 = vshll.u32 %v9117_v51, 16  ;;  %v8295_v38 = vld [vmem:[#allocation9 + $0x6a8] sm:$0xff]  }
 0x175   : > { %7708 = vmatpush3.bf16.msra.mxu1 %v8275_v33  ;;  %v6985_v54 = vadd.f32 %v6984_v63, %v6983_v25  ;;  %v3665_v33 = vsel %vm3282_vm1, %v3663_v7, %v3664_v35  ;;  %v10488_v7 = vshrl.u32 %v10474_v49, 16 }
 0x176   : > { %7709 = vmatprep.subr.bf16.mxu1 %v8278_v47  ;;  %v6986_v23 = vpop.f32.mrf.mxu0  ;;  %v9540_v25 = vrot.slane %v10483_v26, 1  ;;  %v10490_v26 = vshrl.u32 %v10472_v12, 16  ;;  %v8296_v12 = vld [vmem:[#allocation9 + $0x660] sm:$0xff]  }
 0x177   : > { %v9503_v43 = vadd.f32 %v6985_v54, %v894_v57  ;;  %7330 = vmatpush3.bf16.msra.mxu0 %v8277_v8  ;;  %v410_v8 = vld [vmem:[#allocation2 + $0x8c] sm:$0x1]  ;;  %v4151_v54 = vshll.u32 %v9518_v15, 16  ;;  %v3690_v48 = vor.u32 %v3682_v34, %v10488_v7 }
 0x178   : > { %v6987_v9 = vpop.f32.mrf.mxu0  ;;  %7331 = vmatprep.subr.bf16.mxu0 %v8281_v32  ;;  %v411_v57 = vsel %vm9544_vm6, 0, %v410_v8  ;;  %v8294_v8 = vld [vmem:[#allocation9 + $0x628] sm:$0xff]  }
 0x179   : > { %7710 = vmatpush3.bf16.msra.mxu1 %v8278_v47  ;;  %v6988_v61 = vadd.f32 %v6987_v9, %v6986_v23  ;;  %v10482_v47 = vshrl.u32 %v9015_v39, 16  ;;  %v8288_v23 = vld [vmem:[#allocation9 + $0x638] sm:$0xff]   ;;  %v3656_v9 = vsel %vm3282_vm1, %v3654_v6, %v9508_v1  ;;  %412 = vst [vmem:[#allocation2 + $0x8c] sm:$0x1] %v411_v57  ;;  %v3692_v11 = vsel %vm3282_vm1, %v3690_v48, %v3691_v60 }
 0x17a   : > { %7711 = vmatprep.subr.bf16.mxu1 %v8283_v18  ;;  %v6989_v53 = vpop.f32.mrf.mxu0  ;;  %3559 = vmatmul.mubr.bf16.gmra.mxu0 %v3333_v37  ;;  %v8292_v37 = vld [vmem:[#allocation9 + $0x6b0] sm:$0xff]  }
 0x17b   : > { %v3681_v62 = vor.u32 %v9469_v22, %v10482_v47  ;;  %v9548_v29 = vadd.f32 %v6988_v61, %v897_v4  ;;  %7332 = vmatpush3.bf16.msra.mxu0 %v8282_v3  ;;  %3899 = vmatprep.mubr.bf16.mxu0 %v3665_v33  ;;  %v10486_v22 = vshrl.u32 %v9021_v50, 16  ;;  %v407_v3 = vld [vmem:[#allocation2 + $0x84] sm:$0x11]  ;;  %v4153_v33 = vrot.slane %v4151_v54, 1 }
 0x17c   : > { %v6990_v39 = vpop.f32.mrf.mxu0  ;;  %7333 = vmatprep.subr.bf16.mxu0 %v8284_v59  ;;  %v4149_v59 = vshrl.u32 %v9518_v15, 16  ;;  %v8293_v15 = vld [vmem:[#allocation9 + $0x668] sm:$0xff]   ;;  %v9601_v54 = vld [vmem:[#allocation2 + $0x24] ss:$12 sps:$4 sm:$0xff]  }
 0x17d   : > { %7712 = vmatpush3.bf16.msra.mxu1 %v8283_v18  ;;  %v3678_v63 = vor.u32 %v3664_v35, %v10486_v22  ;;  %v9554_v18 = vld [vmem:[#allocation2 + $0x44] ss:$12 sps:$4 sm:$0xff]   ;;  %v6991_v32 = vadd.f32 %v6990_v39, %v6989_v53  ;;  %v3683_v50 = vsel %vm3282_vm1, %v3681_v62, %v3682_v34  ;;  %v10489_v53 = vshrl.u32 %v9035_v45, 16 }
 0x17e   : > { %7713 = vmatprep.subr.bf16.mxu1 %v8286_v31  ;;  %v6992_v56 = vpop.f32.mrf.mxu0  ;;  %v3162_v35 = vld [vmem:[#allocation2 + $0x6c] sm:$0x11]  ;;  %v4156_v42 = vshll.u32 %v9554_v18, 16  ;;  %v8298_v39 = vld [vmem:[#allocation9 + $0x6a0] sm:$0xff]   ;;  %v10491_v45 = vshrl.u32 %v10476_v24, 16 }
 0x17f   : > { %v9567_v27 = vadd.f32 %v9498_v19, %v6991_v32  ;;  %7334 = vmatpush3.bf16.msra.mxu0 %v8285_v58  ;;  %v3680_v61 = vsel %vm3282_vm1, %v3678_v63, %v9516_v14  ;;  %v408_v19 = vsel %vm406_vm7, 0, %v407_v3  ;;  %v8291_v34 = vld [vmem:[#allocation9 + $0x630] sm:$0xff]   ;;  %v6697_v58 = vcombine.high %v3162_v35, %v3162_v35  ;;  %v9608_v3 = vld [vmem:[#allocation2 + $0x3c] ss:$12 sps:$4 sm:$0xff]  }
 0x180   : > { %v6993_v41 = vpop.f32.mrf.mxu0  ;;  %7371 = vmatprep.subr.bf16.mxu0 %v8287_v0  ;;  %409 = vst [vmem:[#allocation2 + $0x84] sm:$0x11] %v408_v19  ;;  %v3705_v4 = vor.u32 %v3691_v60, %v10489_v53  ;;  %v6696_v0 = vcombine.low %v3162_v35, %v3162_v35  ;;  %v3687_v22 = vor.u32 %v9516_v14, %v10491_v45  ;;  %v8300_v53 = vld [vmem:[#allocation9 + $0x618] sm:$0xff]  }
 0x181   : > { %7714 = vmatpush3.bf16.msra.mxu1 %v8286_v31  ;;  %v3709_v31 = vrot.slane %v3707_v40, 1  ;;  %v6994_v49 = vadd.f32 %v6993_v41, %v6992_v56  ;;  %v3675_v40 = vor.u32 %v9508_v1, %v10490_v26  ;;  %v4154_v32 = vor.u32 %v4153_v33, %v4149_v59  ;;  %v8299_v41 = vld [vmem:[#allocation9 + $0x658] sm:$0xff]  }
 0x182   : > { %7723 = vmatprep.subr.bf16.mxu1 %v8289_v52  ;;  %v7023_v55 = vpop.f32.mrf.mxu0  ;;  %3900 = vmatmul.mubr.bf16.vlgmr.msra.gmra.mxu0 %v3656_v9  ;;  %v9599_v60 = vshll.u32 %v6696_v0, 16  ;;  %v3689_v35 = vsel %vm3282_vm1, %v3687_v22, %v9527_v10  ;;  %v8297_v9 = vld [vmem:[#allocation9 + $0x620] sm:$0xff]   ;;  %v4127_v59 = vshll.u32 %v9601_v54, 16  ;;  %v10493_v33 = vshrl.u32 %v9071_v30, 16  ;;  %v9636_v0 = vld [vmem:[#allocation2 + $0x5c] ss:$12 sps:$4 sm:$0xff]  }
 0x183   : > { %v9586_v47 = vadd.f32 %v9510_v28, %v6994_v49  ;;  %7372 = vmatpush3.bf16.msra.mxu0 %v8288_v23  ;;  %3907 = vmatprep.mubr.bf16.mxu0 %v3680_v61  ;;  %v9594_v28 = vshll.u32 %v6697_v58, 16  ;;  %v3710_v1 = vsel %vm3282_vm1, %v3705_v4, %v3709_v31  ;;  %v9603_v23 = vrot.slane %v4156_v42, 1  ;;  %v8305_v4 = vld [vmem:[#allocation9 + $0x690] sm:$0xff]  }
 0x184   : > { %7716 = vmatmul.mubr.bf16.vlgmr.msra.gmra.mxu1 %v3683_v50  ;;  %v9579_v5 = vpop.f32.mrf.mxu1  ;;  %v7024_v6 = vpop.f32.mrf.mxu0  ;;  %7373 = vmatprep.subr.bf16.mxu0 %v8290_v44  ;;  %v3677_v14 = vsel %vm3282_vm1, %v3675_v40, %v9523_v46  ;;  %v9610_v50 = vld [vmem:[#allocation2 + $0x28] ss:$12 sps:$4 sm:$0xff]   ;;  %v9612_v44 = vld [vmem:[#allocation2 + $0x40] ss:$12 sps:$4 sm:$0xff]   ;;  %v4125_v58 = vshrl.u32 %v9601_v54, 16  ;;  %v3699_v42 = vor.u32 %v9527_v10, %v10493_v33  ;;  %v4129_v30 = vrot.slane %v4127_v59, 1 }
 0x185   : > { %7724 = vmatpush3.bf16.msra.mxu1 %v8289_v52  ;;  %v7025_v52 = vadd.f32 %v7024_v6, %v7023_v55  ;;  %7719 = vmatprep.mubr.bf16.mxu1 %v3692_v11  ;;  %v3703_v61 = vrot.slane %v9594_v28, 1  ;;  %v4159_v19 = vsel %vm3282_vm1, %v4154_v32, %v9603_v23  ;;  %v4139_v55 = vshll.u32 %v9610_v50, 16  ;;  %v8303_v40 = vld [vmem:[#allocation9 + $0x650] sm:$0xff]   ;;  %v8309_v59 = vld [vmem:[#allocation9 + $0x608] sm:$0xff]  }
 0x186   : > { %v1181_v62 = vpop.f32.mrf.mxu1  ;;  %7725 = vmatprep.subr.bf16.mxu1 %v8292_v37  ;;  %v7026_v63 = vpop.f32.mrf.mxu0  ;;  %v4137_v10 = vshrl.u32 %v9610_v50, 16  ;;  %v8308_v50 = vld [vmem:[#allocation9 + $0x648] sm:$0xff]  }
 0x187   : > { %7374 = vmatpush3.bf16.msra.mxu0 %v8291_v34  ;;  %v1117_v24 = vadd.f32 %v7025_v52, %v9457_v16  ;;  %v8301_v34 = vld [vmem:[#allocation9 + $0x698] sm:$0xff]   ;;  %v3704_v22 = vsel %vm3282_vm1, %v3699_v42, %v3703_v61 }
 0x188   : > { %v9596_v2 = vpop.f32.mrf.mxu1  ;;  %v7027_v56 = vpop.f32.mrf.mxu0  ;;  %7375 = vmatprep.subr.bf16.mxu0 %v8293_v15  ;;  %v4144_v15 = vshll.u32 %v9612_v44, 16 }
 0x189   : > { %7726 = vmatpush3.bf16.msra.mxu1 %v8292_v37  ;;  %v7028_v7 = vadd.f32 %v7027_v56, %v7026_v63  ;;  %v9614_v48 = vadd.f32 %v1181_v62, %v1117_v24  ;;  %v10492_v37 = vshrl.u32 %v9065_v20, 16  ;;  %v4132_v20 = vshll.u32 %v9608_v3, 16 }
 0x18a   : > { %7727 = vmatprep.subr.bf16.mxu1 %v8295_v38  ;;  %v7029_v16 = vpop.f32.mrf.mxu0  ;;  %3908 = vmatmul.mubr.bf16.gmra.mxu0 %v3677_v14  ;;  %v1184_v57 = vpop.f32.mrf.mxu1  ;;  %v9652_v32 = vrot.slane %v4144_v15, 1  ;;  %v4180_v24 = vshll.u32 %v9636_v0, 16 }
 0x18b   : > { %v3684_v31 = vor.u32 %v9523_v46, %v10492_v37  ;;  %7376 = vmatpush3.bf16.msra.mxu0 %v8294_v8  ;;  %v1120_v49 = vadd.f32 %v7028_v7, %v9472_v13  ;;  %3915 = vmatprep.mubr.bf16.mxu0 %v3689_v35  ;;  %v9644_v8 = vld [vmem:[#allocation2 + $0x58] ss:$12 sps:$4 sm:$0xff]   ;;  %v9647_v28 = vrot.slane %v4132_v20, 1  ;;  %v9655_v7 = vld [vmem:[#allocation2 + $0x74] ss:$12 sps:$4 sm:$0xff]  }
 0x18c   : > { %7720 = vmatmul.mubr.bf16.gmra.mxu1 %v3710_v1  ;;  %v7030_v46 = vpop.f32.mrf.mxu0  ;;  %7377 = vmatprep.subr.bf16.mxu0 %v8296_v12  ;;  %v9638_v26 = vpop.f32.mrf.mxu1  ;;  %v8304_v1 = vld [vmem:[#allocation9 + $0x610] sm:$0xff]   ;;  %v4182_v20 = vrot.slane %v4180_v24, 1  ;;  %v4192_v54 = vshrl.u32 %v9644_v8, 16 }
 0x18d   : > { %7728 = vmatpush3.bf16.msra.mxu1 %v8295_v38  ;;  %v3697_v38 = vrot.slane %v9599_v60, 1  ;;  %v7031_v13 = vadd.f32 %v7030_v46, %v7029_v16  ;;  %v9634_v11 = vadd.f32 %v1184_v57, %v1120_v49  ;;  %7739 = vmatprep.mubr.bf16.mxu1 %v4159_v19  ;;  %v3686_v52 = vsel %vm3282_vm1, %v3684_v31, %v9540_v25  ;;  %v9663_v37 = vld [vmem:[#allocation2 + $0x54] ss:$12 sps:$4 sm:$0xff]   ;;  %v4009_v49 = vld [vmem:[#allocation2 + $0x6c] sm:$0xff] }
 0x18e   : > { %7729 = vmatprep.subr.bf16.mxu1 %v8298_v39  ;;  %v7032_v62 = vpop.f32.mrf.mxu0  ;;  %v1197_v56 = vpop.f32.mrf.mxu1  ;;  %v4176_v57 = vshrl.u32 %v9554_v18, 16  ;;  %v8313_v19 = vld [vmem:[#allocation9 + $0x680] sm:$0xff]   ;;  %v4204_v46 = vshll.u32 %v9655_v7, 16 }
 0x18f   : > { %v1125_v6 = vadd.f32 %v7031_v13, %v9484_v21  ;;  %7378 = vmatpush3.bf16.msra.mxu0 %v8297_v9  ;;  %v8310_v21 = vld [vmem:[#allocation9 + $0x688] sm:$0xff]   ;;  %v4172_v9 = vshll.u32 %v9644_v8, 16 }
 0x190   : > { %v7033_v45 = vpop.f32.mrf.mxu0  ;;  %7379 = vmatprep.subr.bf16.mxu0 %v8299_v41  ;;  %v9669_v18 = vpop.f32.mrf.mxu1 }
 0x191   : > { %7730 = vmatpush3.bf16.msra.mxu1 %v8298_v39  ;;  %v4141_v39 = vrot.slane %v4139_v55, 1  ;;  %v9650_v63 = vadd.f32 %v9579_v5, %v1125_v6  ;;  %v7034_v12 = vadd.f32 %v7033_v45, %v7032_v62  ;;  %v10494_v5 = vshrl.u32 %v9117_v51, 16  ;;  %v8327_v55 = vld [vmem:[#allocation2 + $0x8c] ss:$0 sps:$4 sm:$0x11]  }
 0x192   : > { %7731 = vmatprep.subr.bf16.mxu1 %v8301_v34  ;;  %v7035_v14 = vpop.f32.mrf.mxu0  ;;  %3916 = vmatmul.mubr.bf16.gmra.mxu0 %v3686_v52  ;;  %v4168_v51 = vshrl.u32 %v9612_v44, 16  ;;  %v9676_v42 = vrot.slane %v4172_v9, 1  ;;  %v4200_v44 = vshrl.u32 %v9636_v0, 16  ;;  %v4160_v62 = vshrl.u32 %v9608_v3, 16  ;;  %v8439_v6 = vld [vmem:[#allocation2 + $0xc] sm:$0xff] }
 0x193   : > { %v1128_v35 = vadd.f32 %v7034_v12, %v9492_v17  ;;  %7380 = vmatpush3.bf16.msra.mxu0 %v8300_v53  ;;  %v3693_v16 = vor.u32 %v9540_v25, %v10494_v5  ;;  %3923 = vmatprep.mubr.bf16.mxu0 %v3704_v22  ;;  %v4142_v41 = vor.u32 %v4141_v39, %v4137_v10  ;;  %v1200_v10 = vpop.f32.mrf.mxu1  ;;  %v4013_v3 = vld [vmem:[#allocation2 + $0x84] sm:$0x11]  ;;  %v4228_v24 = vshll.u32 %v8327_v55, 16 }
 0x194   : > { %v7036_v31 = vpop.f32.mrf.mxu0  ;;  %7381 = vmatprep.subr.bf16.mxu0 %v8303_v40  ;;  %v4130_v53 = vor.u32 %v4129_v30, %v4125_v58  ;;  %v4164_v40 = vshll.u32 %v9663_v37, 16  ;;  %v9688_v52 = vcombine.high %v4009_v49, %v8439_v6  ;;  %v4206_v58 = vrot.slane %v4204_v46, 1 }
 0x195   : > { %7732 = vmatpush3.bf16.msra.mxu1 %v8301_v34  ;;  %v9666_v61 = vadd.f32 %v9596_v2, %v1128_v35  ;;  %v7037_v17 = vadd.f32 %v7036_v31, %v7035_v14  ;;  %v8311_v34 = vld [vmem:[#allocation9 + $0x640] sm:$0xff]   ;;  %v3698_v2 = vsel %vm3282_vm1, %v3693_v16, %v3697_v38  ;;  %v4147_v13 = vsel %vm3282_vm1, %v4142_v41, %v9652_v32 }
 0x196   : > { %7733 = vmatprep.subr.bf16.mxu1 %v8305_v4  ;;  %v7038_v25 = vpop.f32.mrf.mxu0  ;;  %v8312_v38 = vld [vmem:[#allocation9 + $0x600] sm:$0xff]   ;;  %v9692_v30 = vcombine.low %v4009_v49, %v8439_v6  ;;  %v4202_v45 = vor.u32 %v4200_v44, %v4182_v20  ;;  %v4135_v39 = vsel %vm3282_vm1, %v4130_v53, %v9647_v28  ;;  %v4170_v12 = vor.u32 %v4168_v51, %v9652_v32 }
 0x197   : > { %7382 = vmatpush3.bf16.msra.mxu0 %v8304_v1  ;;  %v1133_v33 = vadd.f32 %v7037_v17, %v9503_v43  ;;  %v4178_v43 = vor.u32 %v4176_v57, %v9603_v23  ;;  %v4166_v14 = vrot.slane %v4164_v40, 1  ;;  %v6735_v35 = vcombine.low %v4013_v3, %v4013_v3 }
 0x198   : > { %v7039_v15 = vpop.f32.mrf.mxu0  ;;  %7383 = vmatprep.subr.bf16.mxu0 %v8308_v50  ;;  %v6736_v50 = vcombine.high %v4013_v3, %v4013_v3  ;;  %v4196_v16 = vshll.u32 %v9688_v52, 16  ;;  %v4188_v32 = vshll.u32 %v9692_v30, 16  ;;  %v4207_v57 = vsel %vm3282_vm1, %v4202_v45, %v4206_v58 }
 0x199   : > { %7734 = vmatpush3.bf16.msra.mxu1 %v8305_v4  ;;  %v7040_v4 = vadd.f32 %v7039_v15, %v7038_v25  ;;  %v9684_v60 = vadd.f32 %v1197_v56, %v1133_v33  ;;  %v4183_v8 = vsel %vm3282_vm1, %v4178_v43, %v4182_v20  ;;  %v4224_v56 = vshrl.u32 %v9655_v7, 16 }
 0x19a   : > { %7735 = vmatprep.subr.bf16.mxu1 %v8310_v21  ;;  %v7041_v0 = vpop.f32.mrf.mxu0  ;;  %3924 = vmatmul.mubr.bf16.gmra.mxu0 %v3698_v2  ;;  %v4175_v31 = vsel %vm3282_vm1, %v4170_v12, %v9676_v42  ;;  %v4220_v49 = vshll.u32 %v6736_v50, 16  ;;  %v4212_v25 = vshll.u32 %v6735_v35, 16  ;;  %v4162_v46 = vor.u32 %v4160_v62, %v9647_v28 }
 0x19b   : > { %7384 = vmatpush3.bf16.msra.mxu0 %v8309_v59  ;;  %v1136_v23 = vadd.f32 %v7040_v4, %v9548_v29  ;;  %4420 = vmatprep.mubr.bf16.mxu0 %v4147_v13  ;;  %v4184_v59 = vshrl.u32 %v9663_v37, 16  ;;  %v4226_v51 = vor.u32 %v4224_v56, %v4206_v58  ;;  %v4190_v33 = vrot.slane %v4188_v32, 1 }
 0x19c   : > { %v7042_v22 = vpop.f32.mrf.mxu0  ;;  %7385 = vmatprep.subr.bf16.mxu0 %v8311_v34  ;;  %v4194_v44 = vor.u32 %v4192_v54, %v9676_v42  ;;  %v4216_v13 = vshrl.u32 %v9688_v52, 16  ;;  %v4208_v53 = vshrl.u32 %v9692_v30, 16  ;;  %v4222_v4 = vrot.slane %v4220_v49, 1 }
 0x19d   : > { %7736 = vmatpush3.bf16.msra.mxu1 %v8310_v21  ;;  %v7043_v1 = vadd.f32 %v7042_v22, %v7041_v0  ;;  %v9697_v21 = vadd.f32 %v1200_v10, %v1136_v23  ;;  %v4167_v62 = vsel %vm3282_vm1, %v4162_v46, %v4166_v14  ;;  %v4186_v54 = vor.u32 %v4184_v59, %v4166_v14 }
 0x19e   : > { %7737 = vmatprep.subr.bf16.mxu1 %v8313_v19  ;;  %v7044_v29 = vpop.f32.mrf.mxu0  ;;  %v4210_v50 = vor.u32 %v4208_v53, %v4190_v33 }
 0x19f   : > { %v1141_v5 = vadd.f32 %v7043_v1, %v9567_v27  ;;  %7386 = vmatpush3.bf16.msra.mxu0 %v8312_v38  ;;  %v4230_v27 = vrot.slane %v4228_v24, 1  ;;  %v4214_v38 = vrot.slane %v4212_v25, 1  ;;  %v4191_v12 = vsel %vm3282_vm1, %v4186_v54, %v4190_v33 }
 0x1a0   : > { %v7045_v9 = vpop.f32.mrf.mxu0 }
 0x1a1   : > { %7738 = vmatpush3.bf16.msra.mxu1 %v8313_v19  ;;  %v9708_v41 = vadd.f32 %v9638_v26, %v1141_v5  ;;  %v7046_v17 = vadd.f32 %v7045_v9, %v7044_v29  ;;  %v4198_v26 = vrot.slane %v4196_v16, 1  ;;  %v4215_v9 = vsel %vm3282_vm1, %v4210_v50, %v4214_v38 }
 0x1a2   : > { %v7075_v19 = vpop.f32.mrf.mxu0  ;;  %4421 = vmatmul.mubr.bf16.vlgmr.msra.gmra.mxu0 %v4135_v39 }
 0x1a3   : > { %v1144_v34 = vadd.f32 %v7046_v17, %v9586_v47  ;;  %4428 = vmatprep.mubr.bf16.mxu0 %v4175_v31  ;;  %v4231_v47 = vsel %vm3282_vm1, %v4226_v51, %v4230_v27  ;;  %v4199_v42 = vsel %vm3282_vm1, %v4194_v44, %v4198_v26  ;;  %v4218_v30 = vor.u32 %v4216_v13, %v4198_v26 }
 0x1a4   : > { %v7597_v7 = vpop.f32.mrf.mxu1  ;;  %7740 = vmatmul.mubr.bf16.vlgmr.msra.gmra.mxu1 %v4183_v8  ;;  %v7076_v2 = vpop.f32.mrf.mxu0 }
 0x1a5   : > { %7743 = vmatprep.mubr.bf16.mxu1 %v4207_v57  ;;  %v9715_v37 = vadd.f32 %v9669_v18, %v1144_v34  ;;  %v7077_v55 = vadd.f32 %v7076_v2, %v7075_v19  ;;  %v4223_v8 = vsel %vm3282_vm1, %v4218_v30, %v4222_v4 }
 0x1a6   : > { %v1584_v20 = vpop.f32.mrf.mxu1  ;;  %v7078_v43 = vpop.f32.mrf.mxu0 }
 0x1a7   : > { %v1585_v28 = vadd.f32 %v7077_v55, %v1584_v20 }
 0x1a8   : > { %v7598_v15 = vpop.f32.mrf.mxu1  ;;  %v7079_v40 = vpop.f32.mrf.mxu0 }
 0x1a9   : > { %v9723_v18 = vadd.f32 %v1585_v28, %v9614_v48  ;;  %v7080_v10 = vadd.f32 %v7079_v40, %v7078_v43 }
 0x1aa   : > { %v1587_v0 = vpop.f32.mrf.mxu1  ;;  %v7081_v6 = vpop.f32.mrf.mxu0  ;;  %4429 = vmatmul.mubr.bf16.gmra.mxu0 %v4167_v62 }
 0x1ab   : > { %v1588_v52 = vadd.f32 %v7080_v10, %v1587_v0  ;;  %4436 = vmatprep.mubr.bf16.mxu0 %v4199_v42 }
 0x1ac   : > { %7744 = vmatmul.mubr.bf16.gmra.mxu1 %v4231_v47  ;;  %v7082_v58 = vpop.f32.mrf.mxu0  ;;  %v7601_v23 = vpop.f32.mrf.mxu1 }
 0x1ad   : > { %v9726_v45 = vadd.f32 %v1588_v52, %v9634_v11  ;;  %v7083_v3 = vadd.f32 %v7082_v58, %v7081_v6 }
 0x1ae   : > { %v7084_v22 = vpop.f32.mrf.mxu0  ;;  %v1600_v1 = vpop.f32.mrf.mxu1 }
 0x1af   : > { %v1593_v39 = vadd.f32 %v7597_v7, %v7083_v3 }
 0x1b0   : > { %v7085_v48 = vpop.f32.mrf.mxu0  ;;  %v7602_v35 = vpop.f32.mrf.mxu1 }
 0x1b1   : > { %v9731_v24 = vadd.f32 %v1593_v39, %v9650_v63  ;;  %v7086_v29 = vadd.f32 %v7085_v48, %v7084_v22 }
 0x1b2   : > { %v7087_v14 = vpop.f32.mrf.mxu0  ;;  %4437 = vmatmul.mubr.bf16.gmra.mxu0 %v4191_v12  ;;  %v1603_v17 = vpop.f32.mrf.mxu1 }
 0x1b3   : > { %v1596_v56 = vadd.f32 %v7598_v15, %v7086_v29  ;;  %4444 = vmatprep.mubr.bf16.mxu0 %v4223_v8 }
 0x1b4   : > { %v7088_v11 = vpop.f32.mrf.mxu0 }
 0x1b5   : > { %v9734_v5 = vadd.f32 %v1596_v56, %v9666_v61  ;;  %v7089_v16 = vadd.f32 %v7088_v11, %v7087_v14 }
 0x1b6   : > { %v7090_v32 = vpop.f32.mrf.mxu0 }
 0x1b7   : > { %v1601_v57 = vadd.f32 %v7089_v16, %v1600_v1 }
 0x1b8   : > { %v7091_v31 = vpop.f32.mrf.mxu0 }
 0x1b9   : > { %v9738_v63 = vadd.f32 %v1601_v57, %v9684_v60  ;;  %v7092_v7 = vadd.f32 %v7091_v31, %v7090_v32 }
 0x1ba   : > { %v7093_v59 = vpop.f32.mrf.mxu0  ;;  %4445 = vmatmul.mubr.bf16.gmra.mxu0 %v4215_v9 }
 0x1bb   : > { %v1604_v27 = vadd.f32 %v7092_v7, %v1603_v17 }
 0x1bc   : > { %v7094_v19 = vpop.f32.mrf.mxu0 }
 0x1bd   : > { %v9741_v51 = vadd.f32 %v1604_v27, %v9697_v21  ;;  %v7095_v61 = vadd.f32 %v7094_v19, %v7093_v59 }
 0x1be   : > { %v7096_v49 = vpop.f32.mrf.mxu0 }
 0x1bf   : > { %v1609_v25 = vadd.f32 %v7601_v23, %v7095_v61 }
 0x1c0   : > { %v7097_v34 = vpop.f32.mrf.mxu0 }
 0x1c1   : > { %v9744_v20 = vadd.f32 %v1609_v25, %v9708_v41  ;;  %v7098_v46 = vadd.f32 %v7097_v34, %v7096_v49  ;;  %v8330_v34 = vld [vmem:[#allocation10 + $0x138] sm:$0xff]  }
 0x1c2   : > { %v7127_v33 = vpop.f32.mrf.mxu0  ;;  %7747 = vmatprep.subr.bf16.mxu0 %v8330_v34 }
 0x1c3   : > { %v1612_v60 = vadd.f32 %v7602_v35, %v7098_v46  ;;  %v8331_v46 = vld [vmem:[#allocation10 + $0x78] sm:$0xff]   ;;  %7748 = vmatpush3.bf16.msra.mxu0 %v8330_v34  ;;  %v8342_v34 = vld [vmem:[#allocation10 + $0x108] sm:$0xff]  }
 0x1c4   : > { %v7621_v26 = vpop.f32.mrf.mxu1  ;;  %v7128_v44 = vpop.f32.mrf.mxu0  ;;  %7771 = vmatprep.subr.bf16.mxu1 %v8331_v46 }
 0x1c5   : > { %v9747_v55 = vadd.f32 %v1612_v60, %v9715_v37  ;;  %v7129_v15 = vadd.f32 %v7128_v44, %v7127_v33  ;;  %7772 = vmatpush3.bf16.msra.mxu1 %v8331_v46  ;;  %v8343_v46 = vld [vmem:[#allocation10 + $0x48] sm:$0xff]  }
 0x1c6   : > { %v2187_v2 = vpop.f32.mrf.mxu1  ;;  %v7130_v21 = vpop.f32.mrf.mxu0 }
 0x1c7   : > { %v2188_v53 = vadd.f32 %v7129_v15, %v2187_v2 }
 0x1c8   : > { %v7622_v13 = vpop.f32.mrf.mxu1  ;;  %v7131_v43 = vpop.f32.mrf.mxu0 }
 0x1c9   : > { %v7132_v4 = vadd.f32 %v7131_v43, %v7130_v21  ;;  %v8333_v21 = vld [vmem:[#allocation10 + $0x70] sm:$0xff]  }
 0x1ca   : > { %v2190_v47 = vpop.f32.mrf.mxu1  ;;  %v7133_v38 = vpop.f32.mrf.mxu0  ;;  %7773 = vmatprep.subr.bf16.mxu1 %v8333_v21 }
 0x1cb   : > { %v2191_v28 = vadd.f32 %v7132_v4, %v2190_v47  ;;  %7774 = vmatpush3.bf16.msra.mxu1 %v8333_v21 }
 0x1cc   : > { %v7134_v41 = vpop.f32.mrf.mxu0  ;;  %v7625_v62 = vpop.f32.mrf.mxu1 }
 0x1cd   : > { %v7135_v40 = vadd.f32 %v7134_v41, %v7133_v38  ;;  %v8334_v41 = vld [vmem:[#allocation10 + $0x128] sm:$0xff]  }
 0x1ce   : > { %v7136_v0 = vpop.f32.mrf.mxu0  ;;  %v2203_v6 = vpop.f32.mrf.mxu1 }
 0x1cf   : > { %v2196_v42 = vadd.f32 %v7621_v26, %v7135_v40 }
 0x1d0   : > { %v7137_v10 = vpop.f32.mrf.mxu0  ;;  %v7626_v23 = vpop.f32.mrf.mxu1 }
 0x1d1   : > { %v7138_v52 = vadd.f32 %v7137_v10, %v7136_v0 }
 0x1d2   : > { %v7139_v54 = vpop.f32.mrf.mxu0  ;;  %v2206_v12 = vpop.f32.mrf.mxu1 }
 0x1d3   : > { %v2199_v37 = vadd.f32 %v7622_v13, %v7138_v52  ;;  %v8332_v13 = vld [vmem:[#allocation10 + $0x130] sm:$0xff]  }
 0x1d4   : > { %v7140_v58 = vpop.f32.mrf.mxu0  ;;  %7749 = vmatprep.subr.bf16.mxu0 %v8332_v13 }
 0x1d5   : > { %v7141_v30 = vadd.f32 %v7140_v58, %v7139_v54  ;;  %7750 = vmatpush3.bf16.msra.mxu0 %v8332_v13  ;;  %v8336_v58 = vld [vmem:[#allocation10 + $0x120] sm:$0xff]  }
 0x1d6   : > { %v7142_v3 = vpop.f32.mrf.mxu0  ;;  %7751 = vmatprep.subr.bf16.mxu0 %v8334_v41 }
 0x1d7   : > { %v2204_v22 = vadd.f32 %v7141_v30, %v2203_v6 }
 0x1d8   : > { %v7143_v39 = vpop.f32.mrf.mxu0 }
 0x1d9   : > { %v7144_v48 = vadd.f32 %v7143_v39, %v7142_v3  ;;  %7752 = vmatpush3.bf16.msra.mxu0 %v8334_v41 }
 0x1da   : > { %v7145_v1 = vpop.f32.mrf.mxu0  ;;  %7753 = vmatprep.subr.bf16.mxu0 %v8336_v58 }
 0x1db   : > { %v9749_v8 = vadd.f32 %v7144_v48, %v2206_v12  ;;  %v1623_v12 = vlaneseq }
 0x1dc   : > { %v7146_v29 = vpop.f32.mrf.mxu0 }
 0x1dd   : > { %v7147_v14 = vadd.f32 %v7146_v29, %v7145_v1  ;;  %7754 = vmatpush3.bf16.msra.mxu0 %v8336_v58  ;;  %v8338_v29 = vld [vmem:[#allocation10 + $0x118] sm:$0xff]  }
 0x1de   : > { %v7148_v56 = vpop.f32.mrf.mxu0  ;;  %7755 = vmatprep.subr.bf16.mxu0 %v8338_v29 }
 0x1df   : > { %v9751_v50 = vadd.f32 %v7625_v62, %v7147_v14  ;;  %v8335_v62 = vld [vmem:[#allocation10 + $0x68] sm:$0xff]   ;;  %v8339_v14 = vld [vmem:[#allocation10 + $0x58] sm:$0xff]  }
 0x1e0   : > { %v7149_v11 = vpop.f32.mrf.mxu0  ;;  %7775 = vmatprep.subr.bf16.mxu1 %v8335_v62 }
 0x1e1   : > { %v7150_v35 = vadd.f32 %v7149_v11, %v7148_v56  ;;  %7776 = vmatpush3.bf16.msra.mxu1 %v8335_v62  ;;  %7756 = vmatpush3.bf16.msra.mxu0 %v8338_v29 }
 0x1e2   : > { %v7179_v32 = vpop.f32.mrf.mxu0 }
 0x1e3   : > { %v9753_v57 = vadd.f32 %v7626_v23, %v7150_v35  ;;  %v8337_v23 = vld [vmem:[#allocation10 + $0x60] sm:$0xff]   ;;  %v9770_v35 = vshrl.u32 %v1623_v12, 7 }
 0x1e4   : > { %v7645_v16 = vpop.f32.mrf.mxu1  ;;  %v7180_v9 = vpop.f32.mrf.mxu0  ;;  %7777 = vmatprep.subr.bf16.mxu1 %v8337_v23 }
 0x1e5   : > { %v7181_v17 = vadd.f32 %v7180_v9, %v7179_v32  ;;  %7778 = vmatpush3.bf16.msra.mxu1 %v8337_v23  ;;  %v8340_v9 = vld [vmem:[#allocation10 + $0x110] sm:$0xff]   ;;  %v9815_v29 = vadd.s32 32, %v9770_v35 }
 0x1e6   : > { %v2616_v31 = vpop.f32.mrf.mxu1  ;;  %v7182_v7 = vpop.f32.mrf.mxu0  ;;  %7779 = vmatprep.subr.bf16.mxu1 %v8339_v14  ;;  %7757 = vmatprep.subr.bf16.mxu0 %v8340_v9 }
 0x1e7   : > { %v2552_v59 = vadd.f32 %v7181_v17, %v2188_v53  ;;  %7758 = vmatpush3.bf16.msra.mxu0 %v8340_v9  ;;  %v9826_v9 = vadd.s32 40, %v9770_v35 }
 0x1e8   : > { %v7183_v27 = vpop.f32.mrf.mxu0  ;;  %v7646_v19 = vpop.f32.mrf.mxu1  ;;  %7759 = vmatprep.subr.bf16.mxu0 %v8342_v34 }
 0x1e9   : > { %v7184_v61 = vadd.f32 %v7183_v27, %v7182_v7  ;;  %v9755_v49 = vadd.f32 %v2616_v31, %v2552_v59  ;;  %7780 = vmatpush3.bf16.msra.mxu1 %v8339_v14  ;;  %v8341_v31 = vld [vmem:[#allocation10 + $0x50] sm:$0xff]   ;;  %v10408_v27 = vand.u32 7, %v9770_v35 }
 0x1ea   : > { %v7185_v25 = vpop.f32.mrf.mxu0  ;;  %v9759_v60 = vpop.f32.mrf.mxu1  ;;  %7781 = vmatprep.subr.bf16.mxu1 %v8341_v31 }
 0x1eb   : > { %v9757_v26 = vadd.f32 %v7184_v61, %v2191_v28  ;;  %vm1640_vm8 = vcmp.ge.s32.totalorder %v10408_v27, 1  ;;  %7760 = vmatpush3.bf16.msra.mxu0 %v8342_v34 }
 0x1ec   : > { %v7186_v33 = vpop.f32.mrf.mxu0  ;;  %v7649_v15 = vpop.f32.mrf.mxu1 }
 0x1ed   : > { %v7187_v2 = vadd.f32 %v7186_v33, %v7185_v25  ;;  %7782 = vmatpush3.bf16.msra.mxu1 %v8341_v31 }
 0x1ee   : > { %v7188_v44 = vpop.f32.mrf.mxu0  ;;  %v2632_v28 = vpop.f32.mrf.mxu1  ;;  %7783 = vmatprep.subr.bf16.mxu1 %v8343_v46 }
 0x1ef   : > { %v2560_v53 = vadd.f32 %v7187_v2, %v2196_v42  ;;  %v9781_v2 = vadd.s32 16, %v9770_v35 }
 0x1f0   : > { %v7189_v43 = vpop.f32.mrf.mxu0  ;;  %v7650_v52 = vpop.f32.mrf.mxu1 }
 0x1f1   : > { %v9761_v47 = vadd.f32 %v7645_v16, %v2560_v53  ;;  %v7190_v4 = vadd.f32 %v7189_v43, %v7188_v44  ;;  %7784 = vmatpush3.bf16.msra.mxu1 %v8343_v46  ;;  %v8349_v43 = vld [vmem:[#allocation10 + $0x100] sm:$0xff]  }
 0x1f2   : > { %v7191_v38 = vpop.f32.mrf.mxu0  ;;  %v2635_v48 = vpop.f32.mrf.mxu1  ;;  %7761 = vmatprep.subr.bf16.mxu0 %v8349_v43 }
 0x1f3   : > { %v2563_v40 = vadd.f32 %v7190_v4, %v2199_v37  ;;  %v8350_v4 = vld [vmem:[#allocation10 + $0x40] sm:$0xff]   ;;  %7762 = vmatpush3.bf16.msra.mxu0 %v8349_v43 }
 0x1f4   : > { %v7192_v0 = vpop.f32.mrf.mxu0  ;;  %7785 = vmatprep.subr.bf16.mxu1 %v8350_v4 }
 0x1f5   : > { %v9763_v10 = vadd.f32 %v7646_v19, %v2563_v40  ;;  %v7193_v6 = vadd.f32 %v7192_v0, %v7191_v38  ;;  %v9777_v19 = vadd.s32 8, %v9770_v35  ;;  %v10406_v38 = vmov 0.0   ;;  %7786 = vmatpush3.bf16.msra.mxu1 %v8350_v4 }
 0x1f6   : > { %v7194_v42 = vpop.f32.mrf.mxu0  ;;  %v10404_v40 = vand.u32 7, %v9781_v2  ;;  %v9793_v0 = vadd.s32 24, %v9770_v35 }
 0x1f7   : > { %v2568_v54 = vadd.f32 %v7193_v6, %v2204_v22  ;;  %v10405_v21 = vand.u32 7, %v9777_v19 }
 0x1f8   : > { %v7195_v30 = vpop.f32.mrf.mxu0  ;;  %vm1642_vm10 = vcmp.ge.s32.totalorder %v10404_v40, 1 }
 0x1f9   : > { %v7196_v3 = vadd.f32 %v7195_v30, %v7194_v42  ;;  %v9765_v39 = vadd.f32 %v2632_v28, %v2568_v54  ;;  %v9789_v28 = vsel %vm1640_vm8, 1.0, %v10406_v38  ;;  %vm1641_vm9 = vcmp.ge.s32.totalorder %v10405_v21, 1  ;;  %v9801_v30 = vld [vmem:[#allocation10 + $0x1f8] sm:$0xff]  }
 0x1fa   : > { %v7197_v37 = vpop.f32.mrf.mxu0  ;;  %10495 = vst [vmem:[#allocation22_spill] sm:$0xff] %v9789_v28  ;;  %v2620_v54 = vadd.f32 %v9759_v60, %v9757_v26  ;;  %10496 = vst [vmem:[#allocation21_spill] sm:$0xff] %v9801_v30  ;;  %7795 = vmatprep.subr.bf16.mxu0 %v9801_v30 }
 0x1fb   : > { %v2571_v1 = vadd.f32 %v7196_v3, %v9749_v8  ;;  %v9803_v3 = vld [vmem:[#allocation10 + $0xf8] sm:$0xff]  }
 0x1fc   : > { %v7198_v56 = vpop.f32.mrf.mxu0  ;;  %10497 = vst [vmem:[#allocation23_spill] sm:$0xff] %v9803_v3  ;;  %7819 = vmatprep.subr.bf16.mxu1 %v9803_v3 }
 0x1fd   : > { %v7199_v11 = vadd.f32 %v7198_v56, %v7197_v37  ;;  %v9768_v22 = vadd.f32 %v2635_v48, %v2571_v1  ;;  %v10403_v37 = vand.u32 7, %v9793_v0 }
 0x1fe   : > { %v7200_v16 = vpop.f32.mrf.mxu0 }
 0x1ff   : > { %v2576_v32 = vadd.f32 %v7199_v11, %v9751_v50  ;;  %vm1643_vm11 = vcmp.ge.s32.totalorder %v10403_v37, 1 }
 0x200   : > { %v7201_v17 = vpop.f32.mrf.mxu0  ;;  %v9835_v34 = vsel %vm1643_vm11, 1.0, %v10406_v38 }
 0x201   : > { %v9773_v7 = vadd.f32 %v7649_v15, %v2576_v32  ;;  %v7202_v8 = vadd.f32 %v7201_v17, %v7200_v16  ;;  %v9821_v16 = vsel %vm1642_vm10, 1.0, %v10406_v38  ;;  %10500 = vst [vmem:[#allocation26_spill] sm:$0xff] %v9835_v34 }
 0x202   : > { %v7231_v61 = vpop.f32.mrf.mxu0  ;;  %10499 = vst [vmem:[#allocation25_spill] sm:$0xff] %v9821_v16 }
 0x203   : > { %v2579_v25 = vadd.f32 %v7202_v8, %v9753_v57 }
 0x204   : > { %v7669_v59 = vpop.f32.mrf.mxu1  ;;  %v7232_v33 = vpop.f32.mrf.mxu0 }
 0x205   : > { %v9783_v44 = vadd.f32 %v7650_v52, %v2579_v25  ;;  %v7233_v15 = vadd.f32 %v7232_v33, %v7231_v61  ;;  %v10402_v61 = vand.u32 7, %v9815_v29 }
 0x206   : > { %v3105_v50 = vpop.f32.mrf.mxu1  ;;  %v7234_v53 = vpop.f32.mrf.mxu0 }
 0x207   : > { %v3106_v57 = vadd.f32 %v7233_v15, %v3105_v50  ;;  %v10401_v15 = vand.u32 7, %v9826_v9  ;;  %vm1644_vm12 = vcmp.ge.s32.totalorder %v10402_v61, 1 }
 0x208   : > { %v7670_v13 = vpop.f32.mrf.mxu1  ;;  %v7235_v41 = vpop.f32.mrf.mxu0 }
 0x209   : > { %v3136_v6 = vadd.f32 %v3106_v57, %v9755_v49  ;;  %v7236_v42 = vadd.f32 %v7235_v41, %v7234_v53  ;;  %v9806_v49 = vsel %vm1641_vm9, 1.0, %v10406_v38  ;;  %v9839_v53 = vadd.s32 48, %v9770_v35 }
 0x20a   : > { %v3108_v62 = vpop.f32.mrf.mxu1  ;;  %v7237_v52 = vpop.f32.mrf.mxu0  ;;  %10498 = vst [vmem:[#allocation24_spill] sm:$0xff] %v9806_v49  ;;  %v9849_v41 = vsel %vm1644_vm12, 1.0, %v10406_v38  ;;  %vm1645_vm13 = vcmp.ge.s32.totalorder %v10401_v15, 1 }
 0x20b   : > { %v3144_v58 = vmul.f32 %v9789_v28, %v3136_v6  ;;  %v3109_v23 = vadd.f32 %v7236_v42, %v3108_v62  ;;  %10501 = vst [vmem:[#allocation27_spill] sm:$0xff] %v9839_v53  ;;  %10502 = vst [vmem:[#allocation28_spill] sm:$0xff] %v9849_v41 }
 0x20c   : > { %v7238_v12 = vpop.f32.mrf.mxu0  ;;  %v7673_v48 = vpop.f32.mrf.mxu1 }
 0x20d   : > { %v9812_v1 = vadd.f32 %v3144_v58, %v9723_v18  ;;  %v3137_v26 = vadd.f32 %v3109_v23, %v2620_v54  ;;  %v7239_v60 = vadd.f32 %v7238_v12, %v7237_v52  ;;  %v9859_v54 = vadd.s32 56, %v9770_v35 }
 0x20e   : > { %v7240_v14 = vpop.f32.mrf.mxu0  ;;  %v3121_v32 = vpop.f32.mrf.mxu1 }
 0x20f   : > { %v3145_v56 = vmul.f32 %v9806_v49, %v3137_v26  ;;  %v3114_v11 = vadd.f32 %v7669_v59, %v7239_v60  ;;  %10504 = vst [vmem:[#allocation30_spill] sm:$0xff] %v9859_v54  ;;  %v9863_v26 = vsel %vm1645_vm13, 1.0, %v10406_v38 }
 0x210   : > { %v7241_v18 = vpop.f32.mrf.mxu0  ;;  %v7674_v33 = vpop.f32.mrf.mxu1  ;;  %10505 = vst [vmem:[#allocation31_spill] sm:$0xff] %v9863_v26 }
 0x211   : > { %v9829_v31 = vadd.f32 %v3145_v56, %v9726_v45  ;;  %v3138_v17 = vadd.f32 %v3114_v11, %v9761_v47  ;;  %v7242_v8 = vadd.f32 %v7241_v18, %v7240_v14  ;;  %v10399_v56 = vand.u32 7, %v9859_v54 }
 0x212   : > { %v7243_v59 = vpop.f32.mrf.mxu0  ;;  %v3124_v6 = vpop.f32.mrf.mxu1 }
 0x213   : > { %v3146_v25 = vmul.f32 %v9821_v16, %v3138_v17  ;;  %v3117_v50 = vadd.f32 %v7670_v13, %v7242_v8  ;;  %vm1647_vm15 = vcmp.ge.s32.totalorder %v10399_v56, 1 }
 0x214   : > { %v7244_v46 = vpop.f32.mrf.mxu0 }
 0x215   : > { %v9842_v45 = vadd.f32 %v3146_v25, %v9731_v24  ;;  %v3139_v47 = vadd.f32 %v3117_v50, %v9763_v10  ;;  %v7245_v57 = vadd.f32 %v7244_v46, %v7243_v59  ;;  %v10400_v24 = vand.u32 7, %v9839_v53 }
 0x216   : > { %v7246_v13 = vpop.f32.mrf.mxu0 }
 0x217   : > { %v3147_v43 = vmul.f32 %v9835_v34, %v3139_v47  ;;  %v3122_v4 = vadd.f32 %v7245_v57, %v3121_v32  ;;  %vm1646_vm14 = vcmp.ge.s32.totalorder %v10400_v24, 1  ;;  %v9884_v47 = vsel %vm1647_vm15, 1.0, %v10406_v38 }
 0x218   : > { %v7247_v62 = vpop.f32.mrf.mxu0  ;;  %v9874_v17 = vsel %vm1646_vm14, 1.0, %v10406_v38  ;;  %10509 = vst [vmem:[#allocation35_spill] sm:$0xff] %v9884_v47 }
 0x219   : > { %v9855_v10 = vadd.f32 %v3147_v43, %v9734_v5  ;;  %v3140_v42 = vadd.f32 %v3122_v4, %v9765_v39  ;;  %v7248_v52 = vadd.f32 %v7247_v62, %v7246_v13  ;;  %10507 = vst [vmem:[#allocation33_spill] sm:$0xff] %v9874_v17 }
 0x21a   : > { %v7249_v58 = vpop.f32.mrf.mxu0 }
 0x21b   : > { %10503 = vst [vmem:[#allocation29_spill] sm:$0xff] %v9855_v10  ;;  %v3148_v23 = vmul.f32 %v9849_v41, %v3140_v42  ;;  %v3125_v12 = vadd.f32 %v7248_v52, %v3124_v6 }
 0x21c   : > { %v7250_v60 = vpop.f32.mrf.mxu0 }
 0x21d   : > { %v9868_v5 = vadd.f32 %v3148_v23, %v9738_v63  ;;  %v3141_v39 = vadd.f32 %v3125_v12, %v9768_v22  ;;  %v7251_v14 = vadd.f32 %v7250_v60, %v7249_v58 }
 0x21e   : > { %v7252_v11 = vpop.f32.mrf.mxu0 }
 0x21f   : > { %10506 = vst [vmem:[#allocation32_spill] sm:$0xff] %v9868_v5  ;;  %v3149_v18 = vmul.f32 %v9863_v26, %v3141_v39  ;;  %v3130_v32 = vadd.f32 %v7673_v48, %v7251_v14 }
 0x220   : > { %v7253_v8 = vpop.f32.mrf.mxu0 }
 0x221   : > { %v9877_v59 = vadd.f32 %v3149_v18, %v9741_v51  ;;  %v3142_v25 = vadd.f32 %v3130_v32, %v9773_v7  ;;  %v7254_v63 = vadd.f32 %v7253_v8, %v7252_v11 }
 0x222   : > { %v7283_v22 = vpop.f32.mrf.mxu0 }
 0x223   : > { %10508 = vst [vmem:[#allocation34_spill] sm:$0xff] %v9877_v59  ;;  %v3150_v50 = vmul.f32 %v9874_v17, %v3142_v25  ;;  %v3133_v46 = vadd.f32 %v7674_v33, %v7254_v63 }
 0x224   : > { %v7284_v48 = vpop.f32.mrf.mxu0  ;;  %v9894_v6 = vpop.f32.mrf.mxu1 }
 0x225   : > { %v9887_v57 = vadd.f32 %v3150_v50, %v9744_v20  ;;  %v3143_v51 = vadd.f32 %v3133_v46, %v9783_v44  ;;  %v7285_v13 = vadd.f32 %v7284_v48, %v7283_v22  ;;  %v416_v20 = vld [vmem:[#allocation3 + $0x2c] sm:$0x1] }
 0x226   : > { %v7286_v43 = vpop.f32.mrf.mxu0  ;;  %v3601_v52 = vpop.f32.mrf.mxu1  ;;  %v417_v44 = vsel %vm9544_vm6, 0, %v416_v20 }
 0x227   : > { %10510 = vst [vmem:[#allocation36_spill] sm:$0xff] %v9887_v57  ;;  %v3151_v7 = vmul.f32 %v9884_v47, %v3143_v51  ;;  %418 = vst [vmem:[#allocation3 + $0x2c] sm:$0x1] %v417_v44  ;;  %v3602_v16 = vadd.f32 %v7285_v13, %v3601_v52 }
 0x228   : > { %v7287_v4 = vpop.f32.mrf.mxu0  ;;  %v9904_v60 = vpop.f32.mrf.mxu1 }
 0x229   : > { %v9892_v62 = vadd.f32 %v3151_v7, %v9747_v55  ;;  %v7288_v3 = vadd.f32 %v7287_v4, %v7286_v43  ;;  %v10518_v43 = vmov 0.0  }
 0x22a   : > { %v7289_v33 = vpop.f32.mrf.mxu0  ;;  %v3604_v14 = vpop.f32.mrf.mxu1 }
 0x22b   : > { %10511 = vst [vmem:[#allocation37_spill] sm:$0xff] %v9892_v62  ;;  %v3605_v5 = vadd.f32 %v7288_v3, %v3604_v14 }
 0x22c   : > { %v7290_v42 = vpop.f32.mrf.mxu0  ;;  %v9910_v32 = vpop.f32.mrf.mxu1 }
 0x22d   : > { %v9896_v58 = vadd.f32 %v7290_v42, %v7289_v33 }
 0x22e   : > { %v9898_v23 = vpop.f32.mrf.mxu0  ;;  %v9914_v63 = vpop.f32.mrf.mxu1 }
 0x22f   : > { %v3610_v13 = vadd.f32 %v9894_v6, %v9896_v58  ;;  %v9965_v6 = vld [vmem:[%s10366_s3] ss:$0 sm:$0xff] }
 0x230   : > { %v9902_v12 = vpop.f32.mrf.mxu0  ;;  %v9920_v46 = vpop.f32.mrf.mxu1 }
 0x231   : > { %10512 = vst [vmem:[#allocation38_spill] sm:$0xff] %v9920_v46  ;;  %v7294_v3 = vadd.f32 %v9902_v12, %v9898_v23 }
 0x232   : > { %v7295_v55 = vpop.f32.mrf.mxu0  ;;  %v9924_v7 = vpop.f32.mrf.mxu1 }
 0x234   : > { %v7296_v39 = vpop.f32.mrf.mxu0 }
 0x235   : > { %v9906_v11 = vadd.f32 %v7296_v39, %v7295_v55 }
 0x236   : > { %v9908_v18 = vpop.f32.mrf.mxu0 }
 0x238   : > { %v9912_v8 = vpop.f32.mrf.mxu0 }
 0x23a   : > { %v7301_v25 = vpop.f32.mrf.mxu0 }
 0x23c   : > { %v7302_v36 = vpop.f32.mrf.mxu0 }
 0x23d   : > { %v9916_v22 = vadd.f32 %v7302_v36, %v7301_v25 }
 0x23e   : > { %v9918_v50 = vpop.f32.mrf.mxu0 }
 0x240   : > { %v9922_v48 = vpop.f32.mrf.mxu0 }
 0x242   : > { %v7335_v51 = vpop.f32.mrf.mxu0 }
 0x244   : > { %v7336_v33 = vpop.f32.mrf.mxu0  ;;  %v9926_v42 = vpop.f32.mrf.mxu1 }
 0x245   : > { %v7337_v17 = vadd.f32 %v7336_v33, %v7335_v51 }
 0x246   : > { %v7338_v20 = vpop.f32.mrf.mxu0  ;;  %v3966_v55 = vpop.f32.mrf.mxu1 }
 0x247   : > { %v3902_v59 = vadd.f32 %v7337_v17, %v3602_v16 }
 0x248   : > { %v7339_v44 = vpop.f32.mrf.mxu0  ;;  %v9928_v24 = vpop.f32.mrf.mxu1 }
 0x249   : > { %v7340_v57 = vadd.f32 %v7339_v44, %v7338_v20  ;;  %v3967_v33 = vadd.f32 %v3966_v55, %v3902_v59 }
 0x24a   : > { %v7341_v39 = vpop.f32.mrf.mxu0  ;;  %v3969_v15 = vpop.f32.mrf.mxu1 }
 0x24c   : > { %v7342_v56 = vpop.f32.mrf.mxu0  ;;  %v9930_v37 = vpop.f32.mrf.mxu1 }
 0x24d   : > { %10513 = vst [vmem:[#allocation39_spill] sm:$0xff] %v9930_v37 }
 0x24e   : > { %v7344_v25 = vpop.f32.mrf.mxu0  ;;  %v9934_v38 = vpop.f32.mrf.mxu1 }
 0x250   : > { %v7345_v36 = vpop.f32.mrf.mxu0  ;;  %v9940_v49 = vpop.f32.mrf.mxu1 }
 0x251   : > { %10514 = vst [vmem:[#allocation40_spill] sm:$0xff] %v9940_v49  ;;  %v10517_v49 = vand.u32 7, %v9770_v35 }
 0x252   : > { %v7347_v61 = vpop.f32.mrf.mxu0  ;;  %v9946_v34 = vpop.f32.mrf.mxu1 }
 0x253   : > { %10516 = vst [vmem:[#allocation42_spill] sm:$0xff] %v9946_v34  ;;  %vm1664_vm2 = vcmp.le.s32.totalorder %v10517_v49, 6  ;;  %v3905_v34 = vadd.f32 %v7340_v57, %v3605_v5  ;;  %v10520_v49 = vand.u32 7, %v9777_v19 }
 0x254   : > { %v7348_v40 = vpop.f32.mrf.mxu0  ;;  %v9955_v4 = vsel %vm1664_vm2, 1.0, %v10518_v43 }
 0x255   : > { %10519 = vst [vmem:[#allocation43_spill] sm:$0xff] %v9955_v4  ;;  %vm1665_vm3 = vcmp.le.s32.totalorder %v10520_v49, 6  ;;  %v3970_v5 = vadd.f32 %v3969_v15, %v3905_v34  ;;  %v3613_v34 = vadd.f32 %v9904_v60, %v7294_v3 }
 0x256   : > { %v9932_v21 = vpop.f32.mrf.mxu0  ;;  %v9968_v52 = vsel %vm1665_vm3, 1.0, %v10518_v43 }
 0x257   : > { %10521 = vst [vmem:[#allocation44_spill] sm:$0xff] %v9968_v52 }
 0x258   : > { %v9936_v27 = vpop.f32.mrf.mxu0 }
 0x25a   : > { %v9938_v26 = vpop.f32.mrf.mxu0 }
 0x25c   : > { %v9942_v47 = vpop.f32.mrf.mxu0 }
 0x25e   : > { %v9944_v41 = vpop.f32.mrf.mxu0 }
 0x25f   : > { %10515 = vst [vmem:[#allocation41_spill] sm:$0xff] %v9944_v41  ;;  %v7343_v41 = vadd.f32 %v7342_v56, %v7341_v39 }
 0x260   : > { %v9948_v28 = vpop.f32.mrf.mxu0 }
 0x261   : > { %v3910_v56 = vadd.f32 %v7343_v41, %v3610_v13 }
 0x262   : > { %v7387_v62 = vpop.f32.mrf.mxu0 }
 0x263   : > { %v3975_v14 = vadd.f32 %v9926_v42, %v3910_v56 }
 0x264   : > { %v7741_v30 = vpop.f32.mrf.mxu1  ;;  %v7388_v37 = vpop.f32.mrf.mxu0 }
 0x265   : > { %v7389_v46 = vadd.f32 %v7388_v37, %v7387_v62 }
 0x266   : > { %v4487_v54 = vpop.f32.mrf.mxu1  ;;  %v7390_v51 = vpop.f32.mrf.mxu0 }
 0x267   : > { %v4488_v10 = vadd.f32 %v7389_v46, %v4487_v54  ;;  %v7346_v54 = vadd.f32 %v7345_v36, %v7344_v25  ;;  %v7349_v46 = vadd.f32 %v7348_v40, %v7347_v61  ;;  %v10526_v36 = vand.u32 7, %v9793_v0 }
 0x268   : > { %v7742_v53 = vpop.f32.mrf.mxu1  ;;  %v7391_v16 = vpop.f32.mrf.mxu0  ;;  %v7352_v0 = vadd.f32 %v9936_v27, %v9932_v21  ;;  %v7355_v21 = vadd.f32 %v9942_v47, %v9938_v26  ;;  %v10532_v26 = vand.u32 7, %v9826_v9  ;;  %v7306_v47 = vadd.f32 %v9922_v48, %v9918_v50 }
 0x269   : > { %v4518_v37 = vadd.f32 %v4488_v10, %v3967_v33  ;;  %v7392_v35 = vadd.f32 %v7391_v16, %v7390_v51  ;;  %v10522_v10 = vand.u32 7, %v9781_v2  ;;  %v3913_v44 = vadd.f32 %v7346_v54, %v3613_v34  ;;  %v9984_v2 = vld [vmem:[%s10367_s4] ss:$0 sm:$0xff] }
 0x26a   : > { %v4490_v17 = vpop.f32.mrf.mxu1  ;;  %v7393_v59 = vpop.f32.mrf.mxu0  ;;  %vm1667_vm5 = vcmp.le.s32.totalorder %v10526_v36, 6  ;;  %vm1669_vm7 = vcmp.le.s32.totalorder %v10532_v26, 6  ;;  %v10539_v36 = vld [vmem:[#allocation38_spill] sm:$0xff] }
 0x26b   : > { %v4526_v57 = vmul.f32 %v9955_v4, %v4518_v37  ;;  %v4491_v62 = vadd.f32 %v7392_v35, %v4490_v17  ;;  %vm9972_vm4 = vcmp.le.s32.totalorder %v10522_v10, 6  ;;  %v3978_v16 = vadd.f32 %v9928_v24, %v3913_v44 }
 0x26c   : > { %v7394_v41 = vpop.f32.mrf.mxu0  ;;  %v9978_v12 = vpop.f32.mrf.mxu1  ;;  %v9993_v42 = vsel %vm9972_vm4, 1.0, %v10518_v43  ;;  %v10007_v37 = vsel %vm1667_vm5, 1.0, %v10518_v43  ;;  %v10042_v48 = vsel %vm1669_vm7, 1.0, %v10518_v43 }
 0x26d   : > { %v4534_v15 = vadd.f32 %v4526_v57, %v9812_v1  ;;  %v4519_v58 = vadd.f32 %v4491_v62, %v3970_v5  ;;  %v7395_v23 = vadd.f32 %v7394_v41, %v7393_v59  ;;  %v3618_v1 = vadd.f32 %v9906_v11, %v9914_v63  ;;  %10525 = vst [vmem:[#allocation45_spill] sm:$0xff] %v9993_v42 }
 0x26e   : > { %v7396_v20 = vpop.f32.mrf.mxu0  ;;  %v4503_v33 = vpop.f32.mrf.mxu1  ;;  %10527 = vst [vmem:[#allocation46_spill] sm:$0xff] %v10007_v37 }
 0x26f   : > { %v4548_v55 = vmul.f32 %v9965_v6, %v4534_v15  ;;  %v4527_v60 = vmul.f32 %v9968_v52, %v4519_v58  ;;  %v4496_v39 = vadd.f32 %v7741_v30, %v7395_v23  ;;  %v7300_v30 = vadd.f32 %v9912_v8, %v9908_v18  ;;  %v10533_v15 = vld [vmem:[#allocation29_spill] sm:$0xff] }
 0x270   : > { %v7397_v40 = vpop.f32.mrf.mxu0  ;;  %v3918_v13 = vadd.f32 %v7349_v46, %v3618_v1  ;;  %v10528_v18 = vand.u32 7, %v9815_v29  ;;  %10536 = vst [vmem:[#allocation29_spill] sm:$0xff] %v10042_v48 }
 0x271   : > { %v4535_v61 = vadd.f32 %v4527_v60, %v9829_v31  ;;  %v4520_v25 = vadd.f32 %v4496_v39, %v3975_v14  ;;  %v7398_v51 = vadd.f32 %v7397_v40, %v7396_v20  ;;  %v4562_v11 = vadd.f32 %v9984_v2, %v4548_v55  ;;  %v10534_v20 = vld [vmem:[#allocation41_spill] sm:$0xff]  ;;  %v10535_v39 = vld [vmem:[#allocation42_spill] sm:$0xff]  ;;  %v10537_v40 = vld [vmem:[#allocation27_spill] sm:$0xff] }
 0x272   : > { %v7399_v63 = vpop.f32.mrf.mxu0  ;;  %vm10011_vm6 = vcmp.le.s32.totalorder %v10528_v18, 6  ;;  %v3621_v5 = vadd.f32 %v7300_v30, %v9924_v7  ;;  %v3983_v27 = vadd.f32 %v9934_v38, %v3918_v13  ;;  %v7358_v44 = vadd.f32 %v9948_v28, %v10534_v20 }
 0x273   : > { %v4549_v17 = vmul.f32 %v9965_v6, %v4535_v61  ;;  %v4528_v3 = vmul.f32 %v9993_v42, %v4520_v25  ;;  %v4499_v31 = vadd.f32 %v7742_v53, %v7398_v51  ;;  %v7746_v53 = vpop.f32.mrf.mxu1  ;;  %v4570_v54 = vmax.f32 %v4562_v11, 0.0  ;;  %v10541_v11 = vld [vmem:[#allocation39_spill] sm:$0xff] }
 0x274   : > { %v7400_v35 = vpop.f32.mrf.mxu0  ;;  %v3921_v41 = vadd.f32 %v7352_v0, %v3621_v5  ;;  %v10028_v7 = vsel %vm10011_vm6, 1.0, %v10518_v43  ;;  %v10538_v61 = vand.u32 7, %v10537_v40  ;;  %v3629_v51 = vadd.f32 %v10539_v36, %v7306_v47  ;;  %v10543_v5 = vld [vmem:[#allocation30_spill] sm:$0xff] }
 0x275   : > { %v4563_v24 = vadd.f32 %v9984_v2, %v4549_v17  ;;  %v4536_v49 = vadd.f32 %v4528_v3, %v9842_v45  ;;  %v4521_v56 = vadd.f32 %v4499_v31, %v3978_v16  ;;  %v7401_v59 = vadd.f32 %v7400_v35, %v7399_v63  ;;  %10531 = vst [vmem:[#allocation47_spill] sm:$0xff] %v10028_v7  ;;  %v4506_v14 = vpop.f32.mrf.mxu1 }
 0x276   : > { %v7402_v29 = vpop.f32.mrf.mxu0  ;;  %v3626_v45 = vadd.f32 %v9910_v32, %v9916_v22  ;;  %v3986_v50 = vadd.f32 %v10535_v39, %v3921_v41  ;;  %vm1670_vm8 = vcmp.le.s32.totalorder %v10538_v61, 6  ;;  %v3929_v3 = vadd.f32 %v7358_v44, %v3629_v51  ;;  %v10549_v44 = vld [vmem:[#allocation37_spill] sm:$0xff]  ;;  %v8353_v61 = vld [vmem:[#allocation10 + $0x1f0] sm:$0xff]  }
 0x277   : > { %v4571_v57 = vmax.f32 %v4563_v24, 0.0  ;;  %v4550_v62 = vmul.f32 %v9965_v6, %v4536_v49  ;;  %v4529_v10 = vmul.f32 %v10007_v37, %v4521_v56  ;;  %v4504_v19 = vadd.f32 %v7401_v59, %v4503_v33  ;;  %v10540_v33 = vld [vmem:[#allocation32_spill] sm:$0xff]  ;;  %v10550_v51 = vld [vmem:[#allocation21_spill] sm:$0xff] }
 0x278   : > { %v7403_v38 = vpop.f32.mrf.mxu0  ;;  %v3926_v46 = vadd.f32 %v7355_v21, %v3626_v45  ;;  %v10054_v24 = vsel %vm1670_vm8, 1.0, %v10518_v43 }
 0x279   : > { %v6911_v34 = vpack.c.bf16 %v4571_v57, %v4570_v54  ;;  %v4537_v58 = vadd.f32 %v4529_v10, %v10533_v15  ;;  %v4522_v23 = vadd.f32 %v4504_v19, %v3983_v27  ;;  %v7404_v32 = vadd.f32 %v7403_v38, %v7402_v29  ;;  %10542 = vst [vmem:[#allocation41_spill] sm:$0xff] %v10054_v24  ;;  %v10058_v54 = vld [vmem:[#allocation3 + $0x4] sm:$0xf]  ;;  %v10545_v29 = vld [vmem:[#allocation34_spill] sm:$0xff]  ;;  %v10546_v10 = vld [vmem:[#allocation40_spill] sm:$0xff] }
 0x27a   : > { %v7405_v22 = vpop.f32.mrf.mxu0  ;;  %v4564_v55 = vadd.f32 %v9984_v2, %v4550_v62  ;;  %v3991_v63 = vadd.f32 %v10541_v11, %v3926_v46  ;;  %v10544_v27 = vand.u32 7, %v10543_v5  ;;  %v3994_v19 = vadd.f32 %v10546_v10, %v3929_v3  ;;  %v8356_v11 = vld [vmem:[#allocation10 + $0xe8] sm:$0xff]  }
 0x27b   : > { %6948 = vst [vmem:[#allocation3 + $0x8] sm:$0xff] %v6911_v34   ;;  %v4551_v9 = vmul.f32 %v9965_v6, %v4537_v58  ;;  %v4530_v60 = vmul.f32 %v10028_v7, %v4522_v23  ;;  %v4507_v1 = vadd.f32 %v7404_v32, %v4506_v14  ;;  %v10548_v58 = vld [vmem:[#allocation36_spill] sm:$0xff] }
 0x27c   : > { %v7406_v25 = vpop.f32.mrf.mxu0  ;;  %v4572_v31 = vmax.f32 %v4564_v55, 0.0  ;;  %vm1671_vm9 = vcmp.le.s32.totalorder %v10544_v27, 6  ;;  %v8361_v27 = vld [vmem:[#allocation10 + $0x1d8] sm:$0xff]  }
 0x27d   : > { %v4565_v28 = vadd.f32 %v9984_v2, %v4551_v9  ;;  %v4538_v30 = vadd.f32 %v4530_v60, %v10540_v33  ;;  %v7407_v13 = vadd.f32 %v7406_v25, %v7405_v22  ;;  %v4523_v16 = vadd.f32 %v4507_v1, %v3986_v50  ;;  %v8354_v25 = vld [vmem:[#allocation10 + $0xf0] sm:$0xff]  }
 0x27e   : > { %v7408_v17 = vpop.f32.mrf.mxu0  ;;  %v10071_v34 = vsel %vm1671_vm9, 1.0, %v10518_v43  ;;  %v5108_v33 = vld [vmem:[#allocation3 + $0x4] sm:$0x8] }
 0x27f   : > { %v4573_v0 = vmax.f32 %v4565_v28, 0.0  ;;  %v4512_v35 = vadd.f32 %v9978_v12, %v7407_v13  ;;  %v4552_v18 = vmul.f32 %v9965_v6, %v4538_v30  ;;  %v4531_v8 = vmul.f32 %v10042_v48, %v4523_v16  ;;  %10547 = vst [vmem:[#allocation42_spill] sm:$0xff] %v10071_v34  ;;  %v10551_v28 = vld [vmem:[#allocation23_spill] sm:$0xff]  ;;  %v8355_v13 = vld [vmem:[#allocation10 + $0x1e8] sm:$0xff]  }
 0x280   : > { %v7409_v49 = vpop.f32.mrf.mxu0 }
 0x281   : > { %v6916_v56 = vpack.c.bf16 %v4573_v0, %v4572_v31  ;;  %v4524_v59 = vadd.f32 %v4512_v35, %v3991_v63  ;;  %v7410_v21 = vadd.f32 %v7409_v49, %v7408_v17  ;;  %v4539_v57 = vadd.f32 %v4531_v8, %v10545_v29  ;;  %v8360_v8 = vld [vmem:[#allocation10 + $0xe0] sm:$0xff]  }
 0x282   : > { %v10061_v62 = vld [vmem:[#allocation3 + $0x8] sm:$0xf]  ;;  %v4620_v12 = vld [vmem:[#allocation3 + $0xc] sm:$0xf]  ;;  %v4566_v26 = vadd.f32 %v9984_v2, %v4552_v18  ;;  %v8359_v18 = vld [vmem:[#allocation10 + $0x1e0] sm:$0xff]  }
 0x283   : > { %6949 = vst [vmem:[#allocation3 + $0x10] sm:$0xff] %v6916_v56   ;;  %v4532_v45 = vmul.f32 %v10054_v24, %v4524_v59  ;;  %v4515_v41 = vadd.f32 %v7746_v53, %v7410_v21  ;;  %v10066_v38 = vcombine.low %v10061_v62, %v4620_v12  ;;  %v4553_v47 = vmul.f32 %v9965_v6, %v4539_v57  ;;  %v8362_v21 = vld [vmem:[#allocation10 + $0xd8] sm:$0xff]  }
 0x284   : > { %v6784_v15 = vcombine.low %v10058_v54, %v10061_v62  ;;  %v4574_v22 = vmax.f32 %v4566_v26, 0.0  ;;  %v6808_v16 = vcombine.low %v5108_v33, %v10061_v62 }
 0x285   : > { %v4540_v23 = vadd.f32 %v4532_v45, %v10548_v58  ;;  %v4525_v14 = vadd.f32 %v4515_v41, %v3994_v19  ;;  %7763 = vmatprep.mubr.bf16.mxu0 %v10066_v38  ;;  %v4567_v53 = vadd.f32 %v9984_v2, %v4553_v47  ;;  %v10104_v41 = vld [vmem:[#allocation3 + $0xc] sm:$0xf]  ;;  %v8373_v58 = vld [vmem:[#allocation10 + $0x1d0] sm:$0xff]  }
 0x286   : > { %7787 = vmatprep.mubr.bf16.mxu1 %v6784_v15  ;;  %v5131_v49 = vshrl.u32 %v6808_v16, 16  ;;  %v5134_v56 = vshll.u32 %v6808_v16, 16 }
 0x287   : > { %v4554_v46 = vmul.f32 %v9965_v6, %v4540_v23  ;;  %v4533_v32 = vmul.f32 %v10071_v34, %v4525_v14  ;;  %v4575_v20 = vmax.f32 %v4567_v53, 0.0  ;;  %v8374_v14 = vld [vmem:[#allocation10 + $0xd0] sm:$0xff]  }
 0x288   : > { %v5133_v57 = vrot.slane %v5131_v49, 3 }
 0x289   : > { %v4541_v43 = vadd.f32 %v4533_v32, %v10549_v44  ;;  %v6921_v55 = vpack.c.bf16 %v4575_v20, %v4574_v22  ;;  %v4568_v39 = vadd.f32 %v9984_v2, %v4554_v46  ;;  %v5091_v22 = vld [vmem:[#allocation3] sm:$0x8]  ;;  %v8375_v20 = vld [vmem:[#allocation10 + $0x1c8] sm:$0xff]  }
 0x28a   : > { %v4621_v9 = vld [vmem:[#allocation3 + $0x10] sm:$0xf]  ;;  %v4622_v60 = vld [vmem:[#allocation3 + $0x14] sm:$0xf]  ;;  %v8376_v44 = vld [vmem:[#allocation10 + $0xc8] sm:$0xff]  }
 0x28b   : > { %v4555_v50 = vmul.f32 %v9965_v6, %v4541_v43  ;;  %v10083_v1 = vcombine.low %v4621_v9, %v4622_v60  ;;  %v10085_v40 = vcombine.low %v4620_v12, %v4621_v9  ;;  %6950 = vst [vmem:[#allocation3 + $0x18] sm:$0xff] %v6921_v55   ;;  %v4576_v30 = vmax.f32 %v4568_v39, 0.0  ;;  %v4922_v29 = vld [vmem:[#allocation3 + $0x10] sm:$0xf]  ;;  %v4923_v55 = vld [vmem:[#allocation3 + $0x14] sm:$0xf] }
 0x28c   : > { %v5136_v12 = vrot.slane %v5134_v56, 4  ;;  %v6796_v15 = vcombine.low %v10104_v41, %v4922_v29  ;;  %v6818_v39 = vcombine.low %v5091_v22, %v10058_v54  ;;  %v8385_v22 = vld [vmem:[#allocation10 + $0x1b0] sm:$0xff]  }
 0x28d   : > { %v4569_v36 = vadd.f32 %v9984_v2, %v4555_v50  ;;  %7764 = vmatmul.mubr.bf16.vlgmr.msra.gmra.mxu0 %v10083_v1  ;;  %7788 = vmatmul.mubr.bf16.vlgmr.msra.gmra.mxu1 %v10085_v40  ;;  %v5139_v3 = vshrl.u32 %v10085_v40, 16  ;;  %v5142_v31 = vshll.u32 %v10085_v40, 16 }
 0x28e   : > { %7796 = vmatpush3.bf16.msra.mxu0 %v10550_v51  ;;  %7820 = vmatpush3.bf16.msra.mxu1 %v10551_v28  ;;  %v5137_v23 = vor.u32 %v5136_v12, %v5133_v57  ;;  %v5296_v16 = vshrl.u32 %v6818_v39, 16 }
 0x28f   : > { %v4577_v6 = vmax.f32 %v4569_v36, 0.0  ;;  %7797 = vmatprep.subr.bf16.mxu0 %v8353_v61  ;;  %7821 = vmatprep.subr.bf16.mxu1 %v8354_v25  ;;  %v5141_v59 = vrot.slane %v5139_v3, 3  ;;  %v5144_v5 = vrot.slane %v5142_v31, 4  ;;  %v10113_v32 = vrot.slane %v5142_v31, 1  ;;  %v8378_v36 = vld [vmem:[#allocation10 + $0xc0] sm:$0xff]   ;;  %v8379_v31 = vld [vmem:[#allocation10 + $0x38] sm:$0xff]  }
 0x291   : > { %v6926_v63 = vpack.c.bf16 %v4577_v6, %v4576_v30  ;;  %v10106_v26 = vor.u32 %v5144_v5, %v5141_v59  ;;  %v5863_v50 = vor.u32 %v10113_v32, %v5139_v3  ;;  %v5456_v30 = vld [vmem:[#allocation3 + $0x8] sm:$0x8] }
 0x292   : > { %7798 = vmatpush3.bf16.msra.mxu0 %v8353_v61  ;;  %7822 = vmatpush3.bf16.msra.mxu1 %v8354_v25  ;;  %v4623_v2 = vld [vmem:[#allocation3 + $0x18] sm:$0xf]  ;;  %v4624_v17 = vld [vmem:[#allocation3 + $0x1c] sm:$0xf]  ;;  %v10118_v61 = vcombine.low %v4922_v29, %v4923_v55  ;;  %v8377_v25 = vld [vmem:[#allocation10 + $0x1c0] sm:$0xff]   ;;  %v6828_v3 = vcombine.low %v5456_v30, %v10104_v41 }
 0x293   : > { %6951 = vst [vmem:[#allocation3 + $0x20] sm:$0xff] %v6926_v63   ;;  %7799 = vmatprep.subr.bf16.mxu0 %v8355_v13  ;;  %7823 = vmatprep.subr.bf16.mxu1 %v8356_v11  ;;  %v10095_v0 = vcombine.low %v4623_v2, %v4624_v17  ;;  %v10097_v35 = vcombine.low %v4622_v60, %v4623_v2  ;;  %v5299_v2 = vshll.u32 %v6818_v39, 16 }
 0x294   : > { %v5146_v46 = vsel %vm404_vm0, %v5137_v23, %v10106_v26  ;;  %v5493_v29 = vshll.u32 %v10118_v61, 16  ;;  %v5482_v23 = vshrl.u32 %v6828_v3, 16 }
 0x295   : > { %7767 = vmatprep.mubr.bf16.mxu0 %v10095_v0  ;;  %7791 = vmatprep.mubr.bf16.mxu1 %v10097_v35  ;;  %v5151_v53 = vshll.u32 %v10097_v35, 16  ;;  %v5148_v43 = vshrl.u32 %v10097_v35, 16  ;;  %v8380_v35 = vld [vmem:[#allocation10 + $0x1b8] sm:$0xff]  }
 0x296   : > { %7800 = vmatpush3.bf16.msra.mxu0 %v8355_v13  ;;  %7824 = vmatpush3.bf16.msra.mxu1 %v8356_v11  ;;  %v5484_v39 = vrot.slane %v5482_v23, 3 }
 0x297   : > { %7801 = vmatprep.subr.bf16.mxu0 %v8359_v18  ;;  %7825 = vmatprep.subr.bf16.mxu1 %v8360_v8  ;;  %v5864_v40 = vrot.slane %v5151_v53, 1  ;;  %v5150_v51 = vrot.slane %v5148_v43, 3  ;;  %v5153_v28 = vrot.slane %v5151_v53, 4 }
 0x299   : > { %v10121_v6 = vsel %vm3282_vm1, %v5863_v50, %v5864_v40  ;;  %v5866_v11 = vor.u32 %v5864_v40, %v5148_v43  ;;  %v5154_v49 = vor.u32 %v5153_v28, %v5150_v51  ;;  %v8389_v51 = vld [vmem:[#allocation10 + $0x1a8] sm:$0xff]  }
 0x29a   : > { %v10101_v10 = vld [vmem:[#allocation3 + $0x20] sm:$0xf]  ;;  %v4643_v19 = vld [vmem:[#allocation3 + $0x24] sm:$0xf]  ;;  %7802 = vmatpush3.bf16.msra.mxu0 %v8359_v18  ;;  %7826 = vmatpush3.bf16.msra.mxu1 %v8360_v8  ;;  %v10128_v8 = vld [vmem:[#allocation3 + $0x18] sm:$0xf] }
 0x29b   : > { %v6775_v45 = vcombine.low %v10101_v10, %v4643_v19  ;;  %7803 = vmatprep.subr.bf16.mxu0 %v8361_v27  ;;  %7827 = vmatprep.subr.bf16.mxu1 %v8362_v21  ;;  %v6787_v47 = vcombine.low %v4624_v17, %v10101_v10  ;;  %v6809_v33 = vcombine.low %v4643_v19, %v4643_v19  ;;  %v5304_v17 = vshrl.u32 %v10066_v38, 16  ;;  %v10135_v57 = vld [vmem:[#allocation3 + $0x20] sm:$0xf]  ;;  %v4927_v40 = vld [vmem:[#allocation3 + $0x24] sm:$0xf] }
 0x29c   : > { %v5298_v19 = vrot.slane %v5296_v16, 3  ;;  %v8391_v16 = vld [vmem:[#allocation10 + $0x1a0] sm:$0xff]  }
 0x29d   : > { %7768 = vmatmul.mubr.bf16.gmra.mxu0 %v6775_v45  ;;  %7792 = vmatmul.mubr.bf16.gmra.mxu1 %v6787_v47  ;;  %v5157_v9 = vshrl.u32 %v6787_v47, 16  ;;  %v5160_v60 = vshll.u32 %v6787_v47, 16  ;;  %v5166_v56 = vshrl.u32 %v6809_v33, 16  ;;  %v5169_v59 = vshll.u32 %v6809_v33, 16 }
 0x29e   : > { %7811 = vmatprep.mubr.bf16.mxu0 %v6796_v15  ;;  %7804 = vmatpush3.bf16.msra.mxu0 %v8361_v27  ;;  %v5307_v27 = vshll.u32 %v10066_v38, 16  ;;  %v5301_v45 = vrot.slane %v5299_v2, 4  ;;  %v6797_v47 = vcombine.low %v4923_v55, %v10128_v8  ;;  %v4925_v15 = vld [vmem:[#allocation3 + $0x1c] sm:$0xf]  ;;  %v5155_v38 = vsel %vm404_vm0, %v10106_v26, %v5154_v49  ;;  %v4928_v26 = vld [vmem:[#allocation3 + $0x28] sm:$0xf] }
 0x29f   : > { %7828 = vmatpush3.bf16.msra.mxu1 %v8362_v21  ;;  %7835 = vmatprep.mubr.bf16.mxu1 %v5146_v46  ;;  %v5159_v13 = vrot.slane %v5157_v9, 3  ;;  %v5162_v54 = vrot.slane %v5160_v60, 4  ;;  %v5867_v63 = vrot.slane %v5160_v60, 1  ;;  %v5490_v21 = vshrl.u32 %v10118_v61, 16  ;;  %v8384_v46 = vld [vmem:[#allocation10 + $0x30] sm:$0xff]  }
 0x2a0   : > { %7805 = vmatprep.subr.bf16.mxu0 %v8373_v58  ;;  %7829 = vmatprep.subr.bf16.mxu1 %v8374_v14  ;;  %v6798_v53 = vcombine.low %v4925_v15, %v10135_v57  ;;  %v5309_v55 = vrot.slane %v5307_v27, 4  ;;  %v5495_v60 = vrot.slane %v5493_v29, 4  ;;  %v5302_v28 = vor.u32 %v5301_v45, %v5298_v19  ;;  %v8397_v19 = vld [vmem:[#allocation10 + $0x188] sm:$0xff]  }
 0x2a1   : > { %v10126_v18 = vsel %vm3282_vm1, %v5866_v11, %v5867_v63  ;;  %v10130_v5 = vor.u32 %v5867_v63, %v5157_v9  ;;  %v5163_v12 = vor.u32 %v5162_v54, %v5159_v13  ;;  %v5492_v9 = vrot.slane %v5490_v21, 3  ;;  %v8390_v63 = vld [vmem:[#allocation10 + $0x20] sm:$0xff]  }
 0x2a2   : > { %7806 = vmatpush3.bf16.msra.mxu0 %v8373_v58  ;;  %v5306_v58 = vrot.slane %v5304_v17, 3  ;;  %v6799_v13 = vcombine.low %v4927_v40, %v4928_v26  ;;  %v5313_v27 = vshrl.u32 %v10083_v1, 16  ;;  %v5316_v45 = vshll.u32 %v10083_v1, 16  ;;  %v8399_v1 = vld [vmem:[#allocation10 + $0x180] sm:$0xff]  }
 0x2a3   : > { %7830 = vmatpush3.bf16.msra.mxu1 %v8374_v14  ;;  %7807 = vmatprep.subr.bf16.mxu0 %v8375_v20  ;;  %v5485_v14 = vshll.u32 %v6828_v3, 16  ;;  %v5164_v43 = vsel %vm404_vm0, %v5154_v49, %v5163_v12  ;;  %v10148_v30 = vor.u32 %v5495_v60, %v5492_v9  ;;  %v8392_v3 = vld [vmem:[#allocation10 + $0x18] sm:$0xff]   ;;  %v8395_v49 = vld [vmem:[#allocation10 + $0x190] sm:$0xff]  }
 0x2a4   : > { %7831 = vmatprep.subr.bf16.mxu1 %v8376_v44  ;;  %v10146_v33 = vor.u32 %v5309_v55, %v5306_v58 }
 0x2a5   : > { %v5487_v50 = vrot.slane %v5485_v14, 4  ;;  %v5315_v14 = vrot.slane %v5313_v27, 3 }
 0x2a6   : > { %7808 = vmatpush3.bf16.msra.mxu0 %v8375_v20  ;;  %v5168_v20 = vrot.slane %v5166_v56, 3  ;;  %v5311_v2 = vsel %vm404_vm0, %v5302_v28, %v10146_v33  ;;  %v10156_v56 = vcombine.low %v10128_v8, %v4925_v15  ;;  %v5322_v8 = vshrl.u32 %v10095_v0, 16 }
 0x2a7   : > { %7832 = vmatpush3.bf16.msra.mxu1 %v8376_v44  ;;  %7809 = vmatprep.subr.bf16.mxu0 %v8377_v25  ;;  %v5171_v44 = vrot.slane %v5169_v59, 4  ;;  %v5488_v54 = vor.u32 %v5487_v50, %v5484_v39  ;;  %v10159_v59 = vcombine.low %v10135_v57, %v4927_v40  ;;  %v5325_v15 = vshll.u32 %v10095_v0, 16  ;;  %v8401_v50 = vld [vmem:[#allocation10 + $0xb8] sm:$0xff]  }
 0x2a8   : > { %7833 = vmatprep.subr.bf16.mxu1 %v8378_v36  ;;  %v5502_v58 = vshll.u32 %v10156_v56, 16  ;;  %v5324_v55 = vrot.slane %v5322_v8, 3 }
 0x2a9   : > { %v5497_v17 = vsel %vm404_vm0, %v5488_v54, %v10148_v30  ;;  %v5508_v57 = vshrl.u32 %v10159_v59, 16  ;;  %v5511_v23 = vshll.u32 %v10159_v59, 16  ;;  %v5327_v9 = vrot.slane %v5325_v15, 4  ;;  %v8404_v15 = vld [vmem:[#allocation10 + $0x168] sm:$0xff]   ;;  %v8426_v59 = vld [vmem:[#allocation10 + $0x220] sm:$0xff]  }
 0x2aa   : > { %7810 = vmatpush3.bf16.msra.mxu0 %v8377_v25  ;;  %v5172_v25 = vor.u32 %v5171_v44, %v5168_v20  ;;  %v6819_v20 = vcombine.low %v10101_v10, %v10101_v10  ;;  %v5685_v44 = vld [vmem:[#allocation3 + $0x8] sm:$0xf] }
 0x2ab   : > { %7834 = vmatpush3.bf16.msra.mxu1 %v8378_v36  ;;  %7843 = vmatprep.subr.bf16.mxu0 %v8379_v31  ;;  %v8388_v36 = vld [vmem:[#allocation10 + $0x28] sm:$0xff]   ;;  %v5510_v60 = vrot.slane %v5508_v57, 3  ;;  %v6841_v39 = vcombine.low %v5685_v44, %v10104_v41  ;;  %v8400_v10 = vld [vmem:[#allocation10 + $0x178] sm:$0xff]  }
 0x2ac   : > { %7867 = vmatprep.subr.bf16.mxu1 %v8380_v35  ;;  %v5173_v11 = vsel %vm404_vm0, %v5163_v12, %v5172_v25  ;;  %v8396_v12 = vld [vmem:[#allocation10 + $0x8] sm:$0xff]   ;;  %v5334_v54 = vshll.u32 %v6819_v20, 16 }
 0x2ad   : > { %7812 = vmatmul.mubr.bf16.vlgmr.msra.gmra.mxu0 %v6797_v47  ;;  %v5499_v47 = vshrl.u32 %v10156_v56, 16 }
 0x2ae   : > { %7836 = vmatmul.mubr.bf16.vlgmr.msra.gmra.mxu1 %v5155_v38  ;;  %7815 = vmatprep.mubr.bf16.mxu0 %v6798_v53  ;;  %v6832_v38 = vcombine.low %v4928_v26, %v4928_v26  ;;  %v8398_v53 = vld [vmem:[#allocation10] sm:$0xff]   ;;  %v5513_v26 = vrot.slane %v5511_v23, 4  ;;  %v5336_v27 = vrot.slane %v5334_v54, 4  ;;  %v5723_v54 = vrot.slane %v5511_v23, 1  ;;  %v8418_v23 = vld [vmem:[#allocation10 + $0x230] sm:$0xff]  }
 0x2af   : > { %7839 = vmatprep.mubr.bf16.mxu1 %v5164_v43  ;;  %7844 = vmatpush3.bf16.msra.mxu0 %v8379_v31  ;;  %v8393_v31 = vld [vmem:[#allocation10 + $0x198] sm:$0xff]   ;;  %v5501_v0 = vrot.slane %v5499_v47, 3  ;;  %v5504_v43 = vrot.slane %v5502_v58, 4 }
 0x2b0   : > { %7868 = vmatpush3.bf16.msra.mxu1 %v8380_v35  ;;  %7845 = vmatprep.subr.bf16.mxu0 %v8384_v46  ;;  %v8394_v35 = vld [vmem:[#allocation10 + $0x10] sm:$0xff]   ;;  %v5517_v40 = vshrl.u32 %v6832_v38, 16  ;;  %v5520_v25 = vshll.u32 %v6832_v38, 16  ;;  %v5711_v38 = vshrl.u32 %v6841_v39, 16 }
 0x2b1   : > { %7869 = vmatprep.subr.bf16.mxu1 %v8385_v22  ;;  %v5505_v28 = vor.u32 %v5504_v43, %v5501_v0  ;;  %v8407_v0 = vld [vmem:[#allocation10 + $0x160] sm:$0xff]  }
 0x2b2   : > { %v5522_v41 = vrot.slane %v5520_v25, 4  ;;  %v8408_v43 = vld [vmem:[#allocation10 + $0xa0] sm:$0xff]   ;;  %v8424_v25 = vld [vmem:[#allocation3 + $0x1c] sm:$0xff]  }
 0x2b3   : > { %7846 = vmatpush3.bf16.msra.mxu0 %v8384_v46  ;;  %v5666_v46 = vld [vmem:[#allocation3 + $0x4] sm:$0xf] }
 0x2b4   : > { %7870 = vmatpush3.bf16.msra.mxu1 %v8385_v22  ;;  %7847 = vmatprep.subr.bf16.mxu0 %v8388_v36  ;;  %v5318_v22 = vrot.slane %v5316_v45, 4 }
 0x2b5   : > { %7871 = vmatprep.subr.bf16.mxu1 %v8389_v51  ;;  %7816 = vmatmul.mubr.bf16.gmra.mxu0 %v6799_v13  ;;  %v5331_v13 = vshrl.u32 %v6819_v20, 16 }
 0x2b6   : > { %7840 = vmatmul.mubr.bf16.gmra.mxu1 %v5173_v11  ;;  %7859 = vmatprep.mubr.bf16.mxu0 %v5311_v2  ;;  %v5328_v11 = vor.u32 %v5327_v9, %v5324_v55  ;;  %v5713_v2 = vshll.u32 %v6841_v39, 16  ;;  %v8409_v9 = vld [vmem:[#allocation10 + $0x158] sm:$0xff]   ;;  %v8412_v39 = vld [vmem:[#allocation10 + $0x90] sm:$0xff]  }
 0x2b7   : > { %7883 = vmatprep.mubr.bf16.mxu1 %v5497_v17  ;;  %7848 = vmatpush3.bf16.msra.mxu0 %v8388_v36  ;;  %v6851_v36 = vcombine.low %v5666_v46, %v10061_v62  ;;  %v5506_v62 = vsel %vm404_vm0, %v10148_v30, %v5505_v28 }
 0x2b8   : > { %7872 = vmatpush3.bf16.msra.mxu1 %v8389_v51  ;;  %7849 = vmatprep.subr.bf16.mxu0 %v8390_v63  ;;  %v5319_v51 = vor.u32 %v5318_v22, %v5315_v14  ;;  %v5715_v45 = vrot.slane %v5713_v2, 1  ;;  %v8405_v14 = vld [vmem:[#allocation10 + $0xa8] sm:$0xff]  }
 0x2b9   : > { %7873 = vmatprep.subr.bf16.mxu1 %v8391_v16  ;;  %v5857_v17 = vshll.u32 %v6851_v36, 16 }
 0x2ba   : > { %v5716_v46 = vor.u32 %v5715_v45, %v5711_v38 }
 0x2bb   : > { %7850 = vmatpush3.bf16.msra.mxu0 %v8390_v63  ;;  %v5514_v63 = vor.u32 %v5513_v26, %v5510_v60  ;;  %v5859_v8 = vrot.slane %v5857_v17, 1  ;;  %v8410_v60 = vld [vmem:[#allocation10 + $0x98] sm:$0xff]   ;;  %v8411_v26 = vld [vmem:[#allocation10 + $0x150] sm:$0xff]  }
 0x2bc   : > { %7874 = vmatpush3.bf16.msra.mxu1 %v8391_v16  ;;  %7851 = vmatprep.subr.bf16.mxu0 %v8392_v3  ;;  %v5519_v16 = vrot.slane %v5517_v40, 3  ;;  %v8416_v40 = vld [vmem:[#allocation10 + $0x80] sm:$0xff]   ;;  %v10204_v17 = vld [vmem:[#allocation3 + $0x24] sm:$0xff]  }
 0x2bd   : > { %7875 = vmatprep.subr.bf16.mxu1 %v8393_v31 }
 0x2be   : > { %v5523_v30 = vor.u32 %v5522_v41, %v5519_v16  ;;  %v8420_v41 = vld [vmem:[#allocation3 + $0x24] ss:$0 sps:$4 sm:$0x11]  }
 0x2bf   : > { %7852 = vmatpush3.bf16.msra.mxu0 %v8392_v3  ;;  %v5320_v3 = vsel %vm404_vm0, %v10146_v33, %v5319_v51  ;;  %v5871_v56 = vshll.u32 %v8420_v41, 16 }
 0x2c0   : > { %7876 = vmatpush3.bf16.msra.mxu1 %v8393_v31  ;;  %7853 = vmatprep.subr.bf16.mxu0 %v8394_v35  ;;  %v8402_v31 = vld [vmem:[#allocation10 + $0x170] sm:$0xff]   ;;  %v5524_v44 = vsel %vm404_vm0, %v5514_v63, %v5523_v30 }
 0x2c1   : > { %7877 = vmatprep.subr.bf16.mxu1 %v8395_v49 }
 0x2c3   : > { %7854 = vmatpush3.bf16.msra.mxu0 %v8394_v35  ;;  %v8403_v35 = vld [vmem:[#allocation10 + $0xb0] sm:$0xff]  }
 0x2c4   : > { %7878 = vmatpush3.bf16.msra.mxu1 %v8395_v49  ;;  %7855 = vmatprep.subr.bf16.mxu0 %v8396_v12  ;;  %v5333_v49 = vrot.slane %v5331_v13, 3  ;;  %v8419_v13 = vld [vmem:[#allocation3 + $0x28] ss:$0 sps:$4 sm:$0x11]  }
 0x2c5   : > { %7879 = vmatprep.subr.bf16.mxu1 %v8397_v19 }
 0x2c6   : > { %v5337_v33 = vor.u32 %v5336_v27, %v5333_v49  ;;  %v6065_v49 = vshll.u32 %v10204_v17, 16 }
 0x2c7   : > { %7856 = vmatpush3.bf16.msra.mxu0 %v8396_v12  ;;  %v5329_v12 = vsel %vm404_vm0, %v5319_v51, %v5328_v11  ;;  %v8417_v51 = vld [vmem:[#allocation10 + $0x238] sm:$0xff]  }
 0x2c8   : > { %7880 = vmatpush3.bf16.msra.mxu1 %v8397_v19  ;;  %7857 = vmatprep.subr.bf16.mxu0 %v8398_v53  ;;  %v5515_v19 = vsel %vm404_vm0, %v5505_v28, %v5514_v63  ;;  %v5338_v20 = vsel %vm404_vm0, %v5328_v11, %v5337_v33  ;;  %v8422_v28 = vld [vmem:[#allocation3 + $0xc] sm:$0xff]   ;;  %v10198_v11 = vld [vmem:[#allocation3 + $0x14] sm:$0xff]   ;;  %v6057_v63 = vshll.u32 %v8424_v25, 16  ;;  %v5873_v33 = vrot.slane %v5871_v56, 1 }
 0x2c9   : > { %7881 = vmatprep.subr.bf16.mxu1 %v8399_v1  ;;  %v6044_v2 = vshll.u32 %v8422_v28, 16  ;;  %v6067_v30 = vrot.slane %v6065_v49, 1 }
 0x2cb   : > { %7858 = vmatpush3.bf16.msra.mxu0 %v8398_v53  ;;  %v5717_v53 = vrot.slane %v5493_v29, 1 }
 0x2cc   : > { %7882 = vmatpush3.bf16.msra.mxu1 %v8399_v1  ;;  %7891 = vmatprep.subr.bf16.mxu0 %v8400_v10  ;;  %v5855_v1 = vshrl.u32 %v6851_v36, 16  ;;  %v5720_v36 = vrot.slane %v5502_v58, 1 }
 0x2cd   : > { %7915 = vmatprep.subr.bf16.mxu1 %v8401_v50  ;;  %v5718_v55 = vsel %vm3282_vm1, %v5716_v46, %v5717_v53  ;;  %v5719_v16 = vor.u32 %v5717_v53, %v5490_v21  ;;  %v6049_v21 = vshll.u32 %v10198_v11, 16  ;;  %v8427_v53 = vld [vmem:[#allocation10 + $0x218] sm:$0xff]  }
 0x2ce   : > { %7860 = vmatmul.mubr.bf16.vlgmr.msra.gmra.mxu0 %v5320_v3  ;;  %v5860_v22 = vor.u32 %v5859_v8, %v5855_v1  ;;  %v5722_v58 = vor.u32 %v5720_v36, %v5499_v47  ;;  %v6046_v47 = vrot.slane %v6044_v2, 1  ;;  %v8429_v1 = vld [vmem:[#allocation10 + $0x208] sm:$0xff]   ;;  %v8431_v46 = vld [vmem:[#allocation3 + $0x2c] ss:$0 sps:$4 sm:$0x11]  }
 0x2cf   : > { %7884 = vmatmul.mubr.bf16.vlgmr.msra.gmra.mxu1 %v5506_v62  ;;  %7863 = vmatprep.mubr.bf16.mxu0 %v5329_v12  ;;  %v5721_v3 = vsel %vm3282_vm1, %v5719_v16, %v5720_v36  ;;  %v5727_v62 = vshll.u32 %v8419_v13, 16  ;;  %v8421_v12 = vld [vmem:[#allocation10 + $0x228] sm:$0xff]   ;;  %v6051_v45 = vrot.slane %v6049_v21, 1 }
 0x2d0   : > { %7887 = vmatprep.mubr.bf16.mxu1 %v5515_v19  ;;  %7892 = vmatpush3.bf16.msra.mxu0 %v8400_v10  ;;  %v5862_v29 = vsel %vm3282_vm1, %v5860_v22, %v10113_v32  ;;  %v8413_v10 = vld [vmem:[#allocation10 + $0x148] sm:$0xff]   ;;  %v5724_v61 = vsel %vm3282_vm1, %v5722_v58, %v5723_v54  ;;  %v6042_v19 = vshrl.u32 %v8422_v28, 16  ;;  %v8430_v22 = vld [vmem:[#allocation10 + $0x200] sm:$0xff]  }
 0x2d1   : > { %7916 = vmatpush3.bf16.msra.mxu1 %v8401_v50  ;;  %7893 = vmatprep.subr.bf16.mxu0 %v8402_v31  ;;  %v8414_v32 = vld [vmem:[#allocation10 + $0x88] sm:$0xff]   ;;  %v8415_v50 = vld [vmem:[#allocation10 + $0x140] sm:$0xff]   ;;  %v5729_v27 = vrot.slane %v5727_v62, 1 }
 0x2d2   : > { %7917 = vmatprep.subr.bf16.mxu1 %v8403_v35 }
 0x2d4   : > { %7894 = vmatpush3.bf16.msra.mxu0 %v8402_v31  ;;  %v10210_v31 = vrot.slane %v6057_v63, 1 }
 0x2d5   : > { %7918 = vmatpush3.bf16.msra.mxu1 %v8403_v35  ;;  %7895 = vmatprep.subr.bf16.mxu0 %v8404_v15  ;;  %v6061_v35 = vshrl.u32 %v8424_v25, 16 }
 0x2d6   : > { %7919 = vmatprep.subr.bf16.mxu1 %v8405_v14  ;;  %7864 = vmatmul.mubr.bf16.gmra.mxu0 %v5338_v20  ;;  %v6073_v20 = vshll.u32 %v8431_v46, 16 }
 0x2d7   : > { %7888 = vmatmul.mubr.bf16.gmra.mxu1 %v5524_v44  ;;  %7907 = vmatprep.mubr.bf16.mxu0 %v5718_v55  ;;  %v6063_v8 = vor.u32 %v6061_v35, %v10210_v31  ;;  %v6069_v44 = vshrl.u32 %v10204_v17, 16 }
 0x2d8   : > { %7931 = vmatprep.mubr.bf16.mxu1 %v5862_v29  ;;  %7896 = vmatpush3.bf16.msra.mxu0 %v8404_v15  ;;  %v6075_v55 = vrot.slane %v6073_v20, 1 }
 0x2d9   : > { %7920 = vmatpush3.bf16.msra.mxu1 %v8405_v14  ;;  %7897 = vmatprep.subr.bf16.mxu0 %v8407_v0  ;;  %v5874_v14 = vsel %vm3282_vm1, %v10130_v5, %v5873_v33  ;;  %v6068_v38 = vsel %vm3282_vm1, %v6063_v8, %v6067_v30  ;;  %v8428_v5 = vld [vmem:[#allocation10 + $0x210] sm:$0xff]  }
 0x2da   : > { %7921 = vmatprep.subr.bf16.mxu1 %v8408_v43 }
 0x2dc   : > { %7898 = vmatpush3.bf16.msra.mxu0 %v8407_v0  ;;  %v6053_v0 = vshrl.u32 %v10198_v11, 16 }
 0x2dd   : > { %7922 = vmatpush3.bf16.msra.mxu1 %v8408_v43  ;;  %7899 = vmatprep.subr.bf16.mxu0 %v8409_v9  ;;  %v6071_v43 = vor.u32 %v6069_v44, %v6067_v30 }
 0x2de   : > { %7923 = vmatprep.subr.bf16.mxu1 %v8410_v60  ;;  %v6055_v29 = vor.u32 %v6053_v0, %v6051_v45 }
 0x2e0   : > { %7900 = vmatpush3.bf16.msra.mxu0 %v8409_v9  ;;  %v6060_v9 = vsel %vm3282_vm1, %v6055_v29, %v10210_v31 }
 0x2e1   : > { %7924 = vmatpush3.bf16.msra.mxu1 %v8410_v60  ;;  %7901 = vmatprep.subr.bf16.mxu0 %v8411_v26  ;;  %v6076_v60 = vsel %vm3282_vm1, %v6071_v43, %v6075_v55 }
 0x2e2   : > { %7925 = vmatprep.subr.bf16.mxu1 %v8412_v39 }
 0x2e4   : > { %7902 = vmatpush3.bf16.msra.mxu0 %v8411_v26 }
 0x2e5   : > { %7926 = vmatpush3.bf16.msra.mxu1 %v8412_v39  ;;  %7903 = vmatprep.subr.bf16.mxu0 %v8413_v10 }
 0x2e6   : > { %7927 = vmatprep.subr.bf16.mxu1 %v8414_v32 }
 0x2e8   : > { %7904 = vmatpush3.bf16.msra.mxu0 %v8413_v10 }
 0x2e9   : > { %7928 = vmatpush3.bf16.msra.mxu1 %v8414_v32  ;;  %7905 = vmatprep.subr.bf16.mxu0 %v8415_v50 }
 0x2ea   : > { %7929 = vmatprep.subr.bf16.mxu1 %v8416_v40 }
 0x2ec   : > { %7906 = vmatpush3.bf16.msra.mxu0 %v8415_v50 }
 0x2ed   : > { %7930 = vmatpush3.bf16.msra.mxu1 %v8416_v40  ;;  %7939 = vmatprep.subr.bf16.mxu0 %v8417_v51 }
 0x2ee   : > { %7963 = vmatprep.subr.bf16.mxu1 %v8417_v51 }
 0x2ef   : > { %7908 = vmatmul.mubr.bf16.vlgmr.msra.gmra.mxu0 %v5721_v3 }
 0x2f0   : > { %7932 = vmatmul.mubr.bf16.vlgmr.msra.gmra.mxu1 %v10121_v6  ;;  %7911 = vmatprep.mubr.bf16.mxu0 %v5724_v61  ;;  %v5725_v6 = vor.u32 %v5723_v54, %v5508_v57 }
 0x2f1   : > { %7935 = vmatprep.mubr.bf16.mxu1 %v10126_v18  ;;  %7940 = vmatpush3.bf16.msra.mxu0 %v8417_v51  ;;  %v6047_v18 = vor.u32 %v6046_v47, %v6042_v19 }
 0x2f2   : > { %7971 = vmatpush3.bf16.msra.mxu1 %v8417_v51  ;;  %7941 = vmatprep.subr.bf16.mxu0 %v8418_v23  ;;  %v5730_v15 = vsel %vm3282_vm1, %v5725_v6, %v5729_v27 }
 0x2f3   : > { %7964 = vmatprep.subr.bf16.mxu1 %v8418_v23  ;;  %v6052_v57 = vsel %vm3282_vm1, %v6047_v18, %v6051_v45 }
 0x2f5   : > { %7942 = vmatpush3.bf16.msra.mxu0 %v8418_v23 }
 0x2f6   : > { %7972 = vmatpush3.bf16.msra.mxu1 %v8418_v23  ;;  %7943 = vmatprep.subr.bf16.mxu0 %v8421_v12 }
 0x2f7   : > { %7965 = vmatprep.subr.bf16.mxu1 %v8421_v12  ;;  %7912 = vmatmul.mubr.bf16.gmra.mxu0 %v5730_v15 }
 0x2f8   : > { %7936 = vmatmul.mubr.bf16.gmra.mxu1 %v5874_v14  ;;  %7955 = vmatprep.mubr.bf16.mxu0 %v6052_v57 }
 0x2f9   : > { %7959 = vmatprep.mubr.bf16.mxu1 %v6068_v38  ;;  %7944 = vmatpush3.bf16.msra.mxu0 %v8421_v12 }
 0x2fa   : > { %7973 = vmatpush3.bf16.msra.mxu1 %v8421_v12  ;;  %7945 = vmatprep.subr.bf16.mxu0 %v8426_v59 }
 0x2fb   : > { %7966 = vmatprep.subr.bf16.mxu1 %v8426_v59 }
 0x2fd   : > { %7946 = vmatpush3.bf16.msra.mxu0 %v8426_v59 }
 0x2fe   : > { %7974 = vmatpush3.bf16.msra.mxu1 %v8426_v59  ;;  %7947 = vmatprep.subr.bf16.mxu0 %v8427_v53 }
 0x2ff   : > { %7967 = vmatprep.subr.bf16.mxu1 %v8427_v53 }
 0x301   : > { %7948 = vmatpush3.bf16.msra.mxu0 %v8427_v53 }
 0x302   : > { %7975 = vmatpush3.bf16.msra.mxu1 %v8427_v53  ;;  %7949 = vmatprep.subr.bf16.mxu0 %v8428_v5 }
 0x303   : > { %7968 = vmatprep.subr.bf16.mxu1 %v8428_v5 }
 0x305   : > { %7950 = vmatpush3.bf16.msra.mxu0 %v8428_v5 }
 0x306   : > { %7976 = vmatpush3.bf16.msra.mxu1 %v8428_v5  ;;  %7951 = vmatprep.subr.bf16.mxu0 %v8429_v1 }
 0x307   : > { %7969 = vmatprep.subr.bf16.mxu1 %v8429_v1 }
 0x309   : > { %7952 = vmatpush3.bf16.msra.mxu0 %v8429_v1 }
 0x30a   : > { %7977 = vmatpush3.bf16.msra.mxu1 %v8429_v1  ;;  %7953 = vmatprep.subr.bf16.mxu0 %v8430_v22 }
 0x30b   : > { %7970 = vmatprep.subr.bf16.mxu1 %v8430_v22 }
 0x30d   : > { %7954 = vmatpush3.bf16.msra.mxu0 %v8430_v22 }
 0x30e   : > { %7978 = vmatpush3.bf16.msra.mxu1 %v8430_v22 }
 0x310   : > { %7956 = vmatmul.mubr.bf16.vlgmr.msra.gmra.mxu0 %v6060_v9 }
 0x311   : > { %7960 = vmatmul.mubr.bf16.vlgmr.msra.gmra.mxu1 %v6076_v60 }
 0x34d   : > { %v7765_v26 = vpop.f32.mrf.mxu0  ;;  %v7789_v39 = vpop.f32.mrf.mxu1 }
 0x34e   : > { %v10227_v10 = vadd.f32 %v7789_v39, %v7765_v26 }
 0x34f   : > { %v4767_v32 = vpop.f32.mrf.mxu0  ;;  %v4890_v50 = vpop.f32.mrf.mxu1 }
 0x350   : > { %v10229_v40 = vadd.f32 %v4890_v50, %v4767_v32 }
 0x351   : > { %v10231_v25 = vpop.f32.mrf.mxu0  ;;  %v10233_v36 = vpop.f32.mrf.mxu1 }
 0x353   : > { %v10235_v51 = vpop.f32.mrf.mxu0  ;;  %v4893_v28 = vpop.f32.mrf.mxu1 }
 0x35d   : > { %v7769_v13 = vpop.f32.mrf.mxu0  ;;  %v7793_v54 = vpop.f32.mrf.mxu1 }
 0x35f   : > { %v4783_v11 = vpop.f32.mrf.mxu0  ;;  %v4906_v63 = vpop.f32.mrf.mxu1 }
 0x361   : > { %v10237_v16 = vpop.f32.mrf.mxu0  ;;  %v10239_v41 = vpop.f32.mrf.mxu1 }
 0x363   : > { %v10241_v58 = vpop.f32.mrf.mxu0  ;;  %v10243_v2 = vpop.f32.mrf.mxu1 }
 0x36d   : > { %v10245_v17 = vpop.f32.mrf.mxu0 }
 0x36e   : > { %v7837_v3 = vpop.f32.mrf.mxu1 }
 0x36f   : > { %v10247_v23 = vpop.f32.mrf.mxu0 }
 0x370   : > { %v5260_v62 = vpop.f32.mrf.mxu1 }
 0x371   : > { %v10249_v61 = vpop.f32.mrf.mxu0 }
 0x372   : > { %v7838_v21 = vpop.f32.mrf.mxu1 }
 0x373   : > { %v10251_v31 = vpop.f32.mrf.mxu0 }
 0x374   : > { %10552 = vst [vmem:[#allocation27_spill] sm:$0xff] %v10251_v31  ;;  %v5263_v56 = vpop.f32.mrf.mxu1 }
 0x375   : > { %v10253_v47 = vpop.f32.mrf.mxu0 }
 0x376   : > { %10553 = vst [vmem:[#allocation38_spill] sm:$0xff] %v10253_v47  ;;  %v7841_v35 = vpop.f32.mrf.mxu1 }
 0x377   : > { %v10255_v49 = vpop.f32.mrf.mxu0 }
 0x378   : > { %10554 = vst [vmem:[#allocation32_spill] sm:$0xff] %v10255_v49  ;;  %v5276_v6 = vpop.f32.mrf.mxu1  ;;  %v4907_v49 = vadd.f32 %v4906_v63, %v4783_v11 }
 0x379   : > { %v10257_v27 = vpop.f32.mrf.mxu0 }
 0x37a   : > { %10555 = vst [vmem:[#allocation39_spill] sm:$0xff] %v10257_v27  ;;  %v7842_v12 = vpop.f32.mrf.mxu1 }
 0x37b   : > { %v10259_v19 = vpop.f32.mrf.mxu0 }
 0x37c   : > { %10556 = vst [vmem:[#allocation30_spill] sm:$0xff] %v10259_v19  ;;  %v5279_v45 = vpop.f32.mrf.mxu1 }
 0x37d   : > { %v10564_v63 = vld [vmem:[#allocation38_spill] sm:$0xff] }
 0x38e   : > { %v7861_v8 = vpop.f32.mrf.mxu0 }
 0x38f   : > { %v7885_v33 = vpop.f32.mrf.mxu1  ;;  %v5434_v48 = vadd.f32 %v7861_v8, %v7837_v3 }
 0x390   : > { %v5425_v18 = vpop.f32.mrf.mxu0 }
 0x391   : > { %v5611_v30 = vpop.f32.mrf.mxu1  ;;  %v5426_v52 = vadd.f32 %v5425_v18, %v5260_v62  ;;  %v5644_v42 = vadd.f32 %v7885_v33, %v5434_v48  ;;  %v5085_v48 = vadd.f32 %v10245_v17, %v10227_v10  ;;  %v10567_v17 = vld [vmem:[#allocation33_spill] sm:$0xff] }
 0x392   : > { %v7862_v15 = vpop.f32.mrf.mxu0 }
 0x393   : > { %v7886_v14 = vpop.f32.mrf.mxu1  ;;  %v5437_v34 = vadd.f32 %v7862_v15, %v7838_v21  ;;  %v5642_v19 = vadd.f32 %v5611_v30, %v5426_v52  ;;  %v4910_v52 = vadd.f32 %v10243_v2, %v10241_v58  ;;  %v10566_v2 = vld [vmem:[#allocation26_spill] sm:$0xff]  ;;  %v10571_v15 = vld [vmem:[#allocation35_spill] sm:$0xff] }
 0x394   : > { %v5428_v59 = vpop.f32.mrf.mxu0 }
 0x395   : > { %v5614_v57 = vpop.f32.mrf.mxu1  ;;  %v5429_v47 = vadd.f32 %v5428_v59, %v5263_v56 }
 0x396   : > { %v7865_v38 = vpop.f32.mrf.mxu0 }
 0x397   : > { %v7889_v53 = vpop.f32.mrf.mxu1  ;;  %v5450_v37 = vadd.f32 %v7865_v38, %v7841_v35  ;;  %v4918_v35 = vadd.f32 %v10239_v41, %v10237_v16  ;;  %v10565_v41 = vld [vmem:[#allocation32_spill] sm:$0xff]  ;;  %v5643_v10 = vadd.f32 %v5614_v57, %v5429_v47 }
 0x398   : > { %v5441_v5 = vpop.f32.mrf.mxu0  ;;  %v5087_v58 = vadd.f32 %v10565_v41, %v4907_v49 }
 0x399   : > { %v5627_v1 = vpop.f32.mrf.mxu1  ;;  %v5442_v7 = vadd.f32 %v5441_v5, %v5276_v6  ;;  %v5648_v31 = vadd.f32 %v7889_v53, %v5450_v37 }
 0x39a   : > { %v7866_v46 = vpop.f32.mrf.mxu0 }
 0x39b   : > { %v7890_v22 = vpop.f32.mrf.mxu1  ;;  %v5453_v27 = vadd.f32 %v7866_v46, %v7842_v12  ;;  %v5646_v3 = vadd.f32 %v5627_v1, %v5442_v7  ;;  %v5656_v6 = vmul.f32 %v10567_v17, %v5648_v31  ;;  %v10572_v1 = vld [vmem:[#allocation24_spill] sm:$0xff] }
 0x39c   : > { %v5444_v20 = vpop.f32.mrf.mxu0  ;;  %v5651_v46 = vmul.f32 %v10572_v1, %v5643_v10 }
 0x39d   : > { %v5630_v44 = vpop.f32.mrf.mxu1  ;;  %v5649_v37 = vadd.f32 %v7890_v22, %v5453_v27  ;;  %v5445_v7 = vadd.f32 %v5444_v20, %v5279_v45  ;;  %v10570_v45 = vld [vmem:[#allocation30_spill] sm:$0xff] }
 0x39e   : > { %v5088_v8 = vadd.f32 %v10570_v45, %v4910_v52  ;;  %v6874_v52 = vld [vmem:[%s10369_s6] ss:$0 sm:$0xff] }
 0x39f   : > { %v5647_v49 = vadd.f32 %v5630_v44, %v5445_v7 }
 0x3af   : > { %v7909_v0 = vpop.f32.mrf.mxu0 }
 0x3b0   : > { %v7933_v43 = vpop.f32.mrf.mxu1 }
 0x3b1   : > { %v5817_v55 = vpop.f32.mrf.mxu0 }
 0x3b2   : > { %v5961_v29 = vpop.f32.mrf.mxu1 }
 0x3b3   : > { %v10261_v9 = vpop.f32.mrf.mxu0  ;;  %v5962_v47 = vadd.f32 %v5961_v29, %v5817_v55 }
 0x3b4   : > { %10557 = vst [vmem:[#allocation34_spill] sm:$0xff] %v10261_v9  ;;  %v10263_v60 = vpop.f32.mrf.mxu1  ;;  %v4902_v9 = vadd.f32 %v10233_v36, %v10231_v25  ;;  %v5083_v25 = vadd.f32 %v10247_v23, %v10229_v40  ;;  %v10561_v36 = vld [vmem:[#allocation25_spill] sm:$0xff]  ;;  %v10568_v40 = vld [vmem:[#allocation28_spill] sm:$0xff] }
 0x3b5   : > { %10558 = vst [vmem:[#allocation40_spill] sm:$0xff] %v10263_v60  ;;  %v10265_v26 = vpop.f32.mrf.mxu0  ;;  %v4894_v60 = vadd.f32 %v4893_v28, %v10235_v51  ;;  %v5652_v51 = vmul.f32 %v10561_v36, %v5644_v42  ;;  %v5654_v23 = vmul.f32 %v10568_v40, %v5646_v3  ;;  %v10575_v3 = vld [vmem:[#allocation31_spill] sm:$0xff]  ;;  %v10582_v40 = vld [vmem:[#allocation46_spill] sm:$0xff] }
 0x3b6   : > { %10559 = vst [vmem:[#allocation36_spill] sm:$0xff] %v10265_v26  ;;  %v10267_v39 = vpop.f32.mrf.mxu1  ;;  %v4915_v26 = vadd.f32 %v7793_v54, %v7769_v13  ;;  %v5086_v13 = vadd.f32 %v10249_v61, %v4902_v9  ;;  %v10563_v54 = vld [vmem:[#allocation27_spill] sm:$0xff]  ;;  %v5970_v61 = vadd.f32 %v7933_v43, %v7909_v0  ;;  %v10573_v0 = vld [vmem:[#allocation45_spill] sm:$0xff] }
 0x3b7   : > { %10560 = vst [vmem:[#allocation37_spill] sm:$0xff] %v10267_v39  ;;  %v7913_v32 = vpop.f32.mrf.mxu0  ;;  %v5645_v39 = vadd.f32 %v7886_v14, %v5437_v34  ;;  %v10562_v34 = vld [vmem:[#allocation22_spill] sm:$0xff]  ;;  %v5084_v11 = vadd.f32 %v10563_v54, %v4894_v60  ;;  %v5660_v18 = vadd.f32 %v5652_v51, %v5085_v48  ;;  %v5657_v14 = vmul.f32 %v10571_v15, %v5649_v37  ;;  %v10579_v37 = vld [vmem:[#allocation47_spill] sm:$0xff] }
 0x3b8   : > { %v7937_v50 = vpop.f32.mrf.mxu1  ;;  %v5650_v28 = vmul.f32 %v10562_v34, %v5642_v19  ;;  %v5089_v16 = vadd.f32 %v10564_v63, %v4915_v26  ;;  %v10569_v19 = vld [vmem:[#allocation39_spill] sm:$0xff]  ;;  %v5662_v20 = vadd.f32 %v5654_v23, %v5087_v58  ;;  %v10574_v26 = vld [vmem:[#allocation41_spill] sm:$0xff] }
 0x3b9   : > { %v5833_v4 = vpop.f32.mrf.mxu0  ;;  %v5653_v56 = vmul.f32 %v10566_v2, %v5645_v39  ;;  %v5090_v27 = vadd.f32 %v10569_v19, %v4918_v35  ;;  %v5986_v33 = vadd.f32 %v7937_v50, %v7913_v32  ;;  %v5655_v35 = vmul.f32 %v10575_v3, %v5647_v49  ;;  %v10578_v34 = vld [vmem:[#allocation43_spill] sm:$0xff]  ;;  %v10583_v19 = vld [vmem:[#allocation42_spill] sm:$0xff]  ;;  %v10584_v49 = vld [vmem:[#allocation44_spill] sm:$0xff] }
 0x3ba   : > { %v5977_v24 = vpop.f32.mrf.mxu1  ;;  %v5658_v30 = vadd.f32 %v5650_v28, %v5083_v25  ;;  %v5664_v22 = vadd.f32 %v5656_v6, %v5089_v16  ;;  %v6875_v6 = vld [vmem:[%s10370_s7] ss:$0 sm:$0xff] }
 0x3bb   : > { %v7914_v62 = vpop.f32.mrf.mxu0  ;;  %v5978_v57 = vadd.f32 %v5977_v24, %v5833_v4  ;;  %v5661_v5 = vadd.f32 %v5653_v56, %v5086_v13  ;;  %v5665_v44 = vadd.f32 %v5657_v14, %v5090_v27  ;;  %v10576_v55 = vld [vmem:[#allocation34_spill] sm:$0xff] }
 0x3bc   : > { %v7938_v21 = vpop.f32.mrf.mxu1  ;;  %v10577_v4 = vld [vmem:[#allocation40_spill] sm:$0xff] }
 0x3bd   : > { %v5836_v42 = vpop.f32.mrf.mxu0  ;;  %v5973_v24 = vadd.f32 %v10577_v4, %v10576_v55  ;;  %v5989_v29 = vadd.f32 %v7938_v21, %v7914_v62  ;;  %v10580_v13 = vld [vmem:[#allocation36_spill] sm:$0xff] }
 0x3be   : > { %v5980_v12 = vpop.f32.mrf.mxu1  ;;  %v10581_v54 = vld [vmem:[#allocation37_spill] sm:$0xff] }
 0x3bf   : > { %v5965_v63 = vadd.f32 %v10581_v54, %v10580_v13  ;;  %v5981_v16 = vadd.f32 %v5980_v12, %v5836_v42  ;;  %v5663_v42 = vadd.f32 %v5655_v35, %v5088_v8 }
 0x3d0   : > { %v7957_v59 = vpop.f32.mrf.mxu0 }
 0x3d1   : > { %v7961_v38 = vpop.f32.mrf.mxu1  ;;  %v6196_v31 = vadd.f32 %v7957_v59, %v5970_v61 }
 0x3d2   : > { %v6200_v53 = vadd.f32 %v7961_v38, %v5986_v33  ;;  %v6163_v9 = vpop.f32.mrf.mxu0  ;;  %v5659_v33 = vadd.f32 %v5651_v46, %v5084_v11 }
 0x3d3   : > { %v6179_v60 = vpop.f32.mrf.mxu1  ;;  %v6204_v43 = vmul.f32 %v10573_v0, %v6196_v31  ;;  %v6194_v32 = vadd.f32 %v6163_v9, %v5962_v47 }
 0x3d4   : > { %v6208_v39 = vmul.f32 %v10574_v26, %v6200_v53  ;;  %v6198_v50 = vadd.f32 %v6179_v60, %v5978_v57  ;;  %v7958_v48 = vpop.f32.mrf.mxu0 }
 0x3d5   : > { %v7962_v25 = vpop.f32.mrf.mxu1  ;;  %v6212_v36 = vadd.f32 %v6204_v43, %v5660_v18  ;;  %v6202_v28 = vmul.f32 %v10578_v34, %v6194_v32  ;;  %v6197_v41 = vadd.f32 %v7958_v48, %v5973_v24 }
 0x3d6   : > { %v6216_v51 = vadd.f32 %v6208_v39, %v5664_v22  ;;  %v6206_v7 = vmul.f32 %v10579_v37, %v6198_v50  ;;  %v6201_v58 = vadd.f32 %v7962_v25, %v5989_v29  ;;  %v6166_v2 = vpop.f32.mrf.mxu0 }
 0x3d7   : > { %v6182_v62 = vpop.f32.mrf.mxu1  ;;  %v6226_v21 = vmul.f32 %v6874_v52, %v6212_v36  ;;  %v6210_v10 = vadd.f32 %v6202_v28, %v5658_v30  ;;  %v6205_v23 = vmul.f32 %v10582_v40, %v6197_v41  ;;  %v6195_v45 = vadd.f32 %v6166_v2, %v5965_v63  ;;  %v10585_v30 = vld [vmem:[#allocation29_spill] sm:$0xff] }
 0x3d8   : > { %v6230_v56 = vmul.f32 %v6874_v52, %v6216_v51  ;;  %v6214_v17 = vadd.f32 %v6206_v7, %v5662_v20  ;;  %v6209_v27 = vmul.f32 %v10583_v19, %v6201_v58  ;;  %v6199_v61 = vadd.f32 %v6182_v62, %v5981_v16 }
 0x3d9   : > { %v6224_v12 = vmul.f32 %v6874_v52, %v6210_v10  ;;  %v6213_v15 = vadd.f32 %v6205_v23, %v5661_v5  ;;  %v6203_v59 = vmul.f32 %v10584_v49, %v6195_v45  ;;  %v6240_v47 = vadd.f32 %v6875_v6, %v6226_v21 }
 0x3da   : > { %v6228_v18 = vmul.f32 %v6874_v52, %v6214_v17  ;;  %v6217_v14 = vadd.f32 %v6209_v27, %v5665_v44  ;;  %v6207_v38 = vmul.f32 %v10585_v30, %v6199_v61  ;;  %v6244_v57 = vadd.f32 %v6875_v6, %v6230_v56 }
 0x3db   : > { %v6227_v31 = vmul.f32 %v6874_v52, %v6213_v15  ;;  %v6211_v1 = vadd.f32 %v6203_v59, %v5659_v33  ;;  %v6238_v20 = vadd.f32 %v6875_v6, %v6224_v12  ;;  %v6248_v5 = vmax.f32 %v6240_v47, 0.0 }
 0x3dc   : > { %v6231_v53 = vmul.f32 %v6874_v52, %v6217_v14  ;;  %v6215_v22 = vadd.f32 %v6207_v38, %v5663_v42  ;;  %v6242_v9 = vadd.f32 %v6875_v6, %v6228_v18  ;;  %v6252_v0 = vmax.f32 %v6244_v57, 0.0 }
 0x3dd   : > { %v6241_v11 = vadd.f32 %v6875_v6, %v6227_v31  ;;  %v6225_v46 = vmul.f32 %v6874_v52, %v6211_v1  ;;  %v6246_v50 = vmax.f32 %v6238_v20, 0.0 }
 0x3de   : > { %v6245_v8 = vadd.f32 %v6875_v6, %v6231_v53  ;;  %v6229_v60 = vmul.f32 %v6874_v52, %v6215_v22  ;;  %v6250_v44 = vmax.f32 %v6242_v9, 0.0 }
 0x3df   : > { %v6249_v43 = vmax.f32 %v6241_v11, 0.0  ;;  %v6239_v39 = vadd.f32 %v6875_v6, %v6225_v46 }
 0x3e0   : > { %v6253_v26 = vmax.f32 %v6245_v8, 0.0  ;;  %v6243_v32 = vadd.f32 %v6875_v6, %v6229_v60 }
 0x3e1   : > { %v6936_v3 = vpack.c.bf16 %v6249_v43, %v6248_v5  ;;  %v6247_v55 = vmax.f32 %v6239_v39, 0.0 }
 0x3e2   : > { %v6946_v35 = vpack.c.bf16 %v6253_v26, %v6252_v0  ;;  %v6251_v4 = vmax.f32 %v6243_v32, 0.0 }
 0x3e3   : > { %6952 = vst [vmem:[%s392_s10 + $0x8] sm:$0xff] %v6936_v3   ;;  %v6931_v24 = vpack.c.bf16 %v6247_v55, %v6246_v50 }
 0x3e4   : > { %6954 = vst [vmem:[%s392_s10 + $0x18] sm:$0xff] %v6946_v35   ;;  %v6941_v29 = vpack.c.bf16 %v6251_v4, %v6250_v44 }
 0x3e5   : > { %6932 = vst [vmem:[%s392_s10] sm:$0xff] %v6931_v24  }
 0x3e6   : > { %6953 = vst [vmem:[%s392_s10 + $0x10] sm:$0xff] %v6941_v29  }
 0x3e7   : > { %8561 = shalt.err (!%p8558_p4)
}
 0x3e8   : > { %s8562_s11 = scalar_lea.hbm %s10318_s0, 512  ;;  %s8566_s15 = scalar_lea.hbm %s10371_s8, 1024 }
 0x3e9   : > { %p8563_p5 = scmp.ne.s32.totalorder %s10318_s0, %s8562_s11  ;;  %p8567_p2 = scmp.lt.s32.totalorder %s10318_s0, %s10371_s8 }
 0x3ea   : > { %p8568_p6 = scmp.lt.s32.totalorder %s8566_s15, %s8562_s11 }
 0x3eb   : > { %p8564_p7 = pnand %p8563_p5, %p10586_p10 }
 0x3ec   : > { %p8569_p12 = por %p8568_p6, %p8567_p2 }
 0x3ed   : > { %p8565_p8 = pneg %p8564_p7 }
 0x3ef   : > { %p8570_p0 = pnand %p8569_p12, %p8565_p8 }
 0x3f1   : > { %8573 = shalt.err (!%p8570_p0)
}
 0x3f2   : > { %s8637_s23 = smov 64   ;;  %s8638_s24 = smov 4  }
 0x3f3   : > { %7991 = dma.vmem_to_hbm [thread:$0]  (%p10586_p10), %s10320_s20, 512, %s10318_s0, %s6295_s9, %s8637_s23, %s8637_s23, %s8638_s24  }
 0x3f4 PF: > { %s6323_s26 = sand.u32 1, %s8612_s27   ;;  %p10587_p3 = scmp.ne.s32.totalorder %s10434_s12, 0 }
 0x3f5   : > { %p10588_p11 = scmp.ge.s32.totalorder %s8624_s30, 2  ;;  %s6324_s10 = scalar_lea.sflag [#allocation6], %s6323_s26 }
 0x3f7   : > { %p8008_p9 = pnand %p10588_p11, %p10587_p3 }
 0x3f9   : > { %p8009_p13 = pneg %p8008_p9 }
 0x3fb   : > { %8607 = dma.done.wait (%p8009_p13), %s6324_s10, 512  }
 0x3fc   : > { %8609 = vsyncadd (%p8009_p13), %s6324_s10, 4294966784  ;;  %s10589_s30 = sld [smem:[#allocation19_spill]]  ;;  %s10592_s27 = smov %s8616_s28 }
 0x3fd   : > { %s10590_s2 = sld [smem:[#allocation18_spill]] }
 0x3fe   : > { %s10591_s29 = sld [smem:[#allocation20_spill]] }
 0x402   : > { %p25_p1 = scmp.ge.s32.totalorder %s10589_s30, 4  }
 0x403   : > { %s10593_s28 = smov %s10590_s2 }
 0x404   :  { %27 = sbr.rel (!%p25_p1) target bundleno = 12 (0xc), region = 134 }
 0x409   :  { %6329 = vsyncpa [#allocation5], 1 }
 0x40a   :  { %6331 = vsyncpa [#allocation5 + $0x1], 1 }
 0x40b   :  { %6332 = vsyncpa [#allocation8], 1 }
 0x40c   :  { %6334 = vsyncpa [#allocation8 + $0x1], 1 }
 0x40d   :  { %6335 = vsyncpa [#allocation11], 1 }
 0x40e   :  { %6336 = vsyncpa [#allocation6], 1 }
 0x40f   :  { %6338 = vsyncpa [#allocation6 + $0x1], 1 }

</bundles_post_ra>
